<compile_context>
chip_gen: v6e
topology: v6e:2x2x1
jax: 0.10.0
libtpu: 0.0.40
codegen_flags: <defaults>
</compile_context>

<pallas_src>
import jax
import jax.numpy as jnp
from jax.experimental import pallas as pl
from jax.experimental.pallas import tpu as pltpu

# ---------------- model hyper-parameters (small, MoCo-consistent) -----------
N       = 8            # batch size
C, H, W = 3, 16, 16    # image shape (NCHW)
D_IN    = C * H * W    # 768, multiple of 128
HIDDEN  = 256          # hidden width of the synthetic encoder MLP
DIM     = 128          # MoCo feature dim (default 128)
K_Q     = 512          # queue size (K % N == 0)
M_MOM   = 0.999        # momentum for key-encoder update
TEMP    = 0.07         # softmax temperature

# NOTE: at this size the whole (K_Q, DIM) queue fits comfortably in VMEM. If
# K_Q is scaled to realistic MoCo sizes (65536), tile the queue / l_neg over a
# lane-dense K grid axis instead of passing it as a single VMEM block.


# ---------------------------- fused Pallas kernel ----------------------------
def moco_fused_kernel(ptr_ref, xq_ref, xk_ref,
                      wq1_ref, bq1_ref, wq2_ref, bq2_ref,
                      wk1_ref, bk1_ref, wk2_ref, bk2_ref,
                      queue_ref,
                      lpos_ref, lneg_ref,
                      wk1_out, bk1_out, wk2_out, bk2_out, queue_out):
    """Momentum update + q/k encode + normalize + logits + queue enqueue."""
    inv_t = 1.0 / TEMP

    # Load query-encoder params once (reused by momentum update and encode).
    wq1, bq1 = wq1_ref[...], bq1_ref[...]
    wq2, bq2 = wq2_ref[...], bq2_ref[...]

    # ---- momentum update of key encoder (f32, VPU); aliased outputs --------
    wk1 = M_MOM * wk1_ref[...] + (1.0 - M_MOM) * wq1
    bk1 = M_MOM * bk1_ref[...] + (1.0 - M_MOM) * bq1
    wk2 = M_MOM * wk2_ref[...] + (1.0 - M_MOM) * wq2
    bk2 = M_MOM * bk2_ref[...] + (1.0 - M_MOM) * bq2
    wk1_out[...] = wk1
    bk1_out[...] = bk1
    wk2_out[...] = wk2
    bk2_out[...] = bk2

    def encode(x, w1, b1, w2, b2):
        # bf16 MXU operands, f32 accumulation; elementwise stays f32.
        h = jnp.dot(x.astype(jnp.bfloat16), w1.astype(jnp.bfloat16),
                    preferred_element_type=jnp.float32) + b1
        h = jnp.maximum(h, 0.0)                                   # ReLU
        f = jnp.dot(h.astype(jnp.bfloat16), w2.astype(jnp.bfloat16),
                    preferred_element_type=jnp.float32) + b2
        # F.normalize(f, dim=1): f / max(||f||, 1e-12) == f * rsqrt(max(ss, 1e-24))
        ss = jnp.sum(f * f, axis=1, keepdims=True)
        return f * jax.lax.rsqrt(jnp.maximum(ss, 1e-24))

    q = encode(xq_ref[...], wq1, bq1, wq2, bq2)                   # (N, DIM) f32
    k = encode(xk_ref[...], wk1, bk1, wk2, bk2)                   # (N, DIM) f32

    # l_pos = einsum('nc,nc->n') -> (N, 1), already temperature-scaled.
    lpos_ref[...] = jnp.sum(q * k, axis=1, keepdims=True) * inv_t

    # l_neg = q @ queue.T ; queue stored row-major (K, DIM), contract DIM.
    queue_rows = queue_ref[...]                                   # (K_Q, DIM)
    lneg = jax.lax.dot_general(
        q.astype(jnp.bfloat16), queue_rows.astype(jnp.bfloat16),
        dimension_numbers=(((1,), (1,)), ((), ())),
        preferred_element_type=jnp.float32)                       # (N, K_Q)
    lneg_ref[...] = lneg * inv_t                                  # lane-dense store

    # dequeue & enqueue: write N lane-dense rows at a sublane-aligned offset.
    queue_out[...] = queue_rows
    ptr = pl.multiple_of(ptr_ref[0], N)                           # ptr % N == 0
    queue_out[pl.ds(ptr, N), :] = k


# ------------------------------ wrapper --------------------------------------
def moco_forward(im_q, im_k, params_q, params_k, queue_rows, queue_ptr):
    """Functional MoCo forward.

    queue_rows is the torch `queue` transposed: shape (K, dim), one key per row.
    Returns (logits, labels, new_params_k, new_queue_rows, new_queue_ptr).
    """
    n = im_q.shape[0]
    assert K_Q % n == 0
    x_q = im_q.reshape(n, -1)
    x_k = im_k.reshape(n, -1)
    wq1, bq1, wq2, bq2 = params_q
    wk1, bk1, wk2, bk2 = params_k
    ptr = jnp.reshape(queue_ptr.astype(jnp.int32), (1,))

    vmem = pl.BlockSpec(memory_space=pltpu.MemorySpace.VMEM)
    smem = pl.BlockSpec(memory_space=pltpu.MemorySpace.SMEM)

    out_shape = (
        jax.ShapeDtypeStruct((n, 1), jnp.float32),            # l_pos
        jax.ShapeDtypeStruct((n, K_Q), jnp.float32),          # l_neg (lane-dense)
        jax.ShapeDtypeStruct(wk1.shape, wk1.dtype),           # updated key params
        jax.ShapeDtypeStruct(bk1.shape, bk1.dtype),
        jax.ShapeDtypeStruct(wk2.shape, wk2.dtype),
        jax.ShapeDtypeStruct(bk2.shape, bk2.dtype),
        jax.ShapeDtypeStruct(queue_rows.shape, queue_rows.dtype),  # updated queue
    )

    (l_pos, l_neg, wk1n, bk1n, wk2n, bk2n, queue_new) = pl.pallas_call(
        moco_fused_kernel,
        out_shape=out_shape,
        in_specs=[smem] + [vmem] * 11,
        out_specs=(vmem,) * 7,
        # key-encoder params (inputs 7..10) and queue (input 11) are updated
        # in place -> no extra HBM copy of ~1 MiB of state per step.
        input_output_aliases={7: 2, 8: 3, 9: 4, 10: 5, 11: 6},
    )(ptr, x_q, x_k, wq1, bq1, wq2, bq2, wk1, bk1, wk2, bk2, queue_rows)

    # torch returns logits = cat([l_pos, l_neg], dim=1) / T  (scaling done in-kernel)
    logits = jnp.concatenate([l_pos, l_neg], axis=1)          # (n, 1+K)
    labels = jnp.zeros((n,), dtype=jnp.int32)                 # torch.long -> int32
    new_ptr = (queue_ptr + n) % K_Q
    return logits, labels, (wk1n, bk1n, wk2n, bk2n), queue_new, new_ptr


# ------------------------------ init & main ----------------------------------
def init_params(key):
    k1, k2, _, _ = jax.random.split(key, 4)
    w1 = jax.random.normal(k1, (D_IN, HIDDEN), jnp.float32) * 0.02
    b1 = jnp.zeros((1, HIDDEN), jnp.float32)
    w2 = jax.random.normal(k2, (HIDDEN, DIM), jnp.float32) * 0.02
    b2 = jnp.zeros((1, DIM), jnp.float32)
    return (w1, b1, w2, b2)


if __name__ == "__main__":
    root = jax.random.PRNGKey(0)
    k_params, k_queue, k_imq, k_imk = jax.random.split(root, 4)

    # encoder_q params; encoder_k initialized as a copy (as in MoCo)
    params_q = init_params(k_params)
    params_k = jax.tree_util.tree_map(lambda p: p.copy(), params_q)

    # torch buffer: queue = normalize(randn(dim, K), dim=0). Stored here
    # row-major as (K, dim) == queue.T so enqueue writes full lane-dense rows.
    queue_dimK = jax.random.normal(k_queue, (DIM, K_Q), jnp.float32)
    queue_dimK = queue_dimK / jnp.maximum(
        jnp.sqrt(jnp.sum(queue_dimK * queue_dimK, axis=0, keepdims=True)), 1e-12)
    queue_rows = jnp.asarray(queue_dimK.T)                    # (K_Q, DIM)
    queue_ptr = jnp.int32(0)

    im_q = jax.random.normal(k_imq, (N, C, H, W), jnp.float32)
    im_k = jax.random.normal(k_imk, (N, C, H, W), jnp.float32)

    fwd = jax.jit(moco_forward, donate_argnums=(3, 4))        # in-place k-params/queue
    logits, labels, params_k_new, queue_new, ptr_new = fwd(
        im_q, im_k, params_q, params_k, queue_rows, queue_ptr)
    jax.block_until_ready((logits, labels, params_k_new, queue_new, ptr_new))

    assert logits.shape == (N, 1 + K_Q) and labels.shape == (N,)
    assert queue_new.shape == (K_Q, DIM)
    assert params_k_new[0].shape == (D_IN, HIDDEN)
    print("KERNEL_OK")
</pallas_src>

<mosaic_0001>
module attributes {stable_mosaic.version = 11 : i64} {
  func.func @moco_fused_kernel(%arg0: memref<1xi32, #tpu.memory_space<smem>>, %arg1: memref<8x768xf32, #tpu.memory_space<vmem>>, %arg2: memref<8x768xf32, #tpu.memory_space<vmem>>, %arg3: memref<768x256xf32, #tpu.memory_space<vmem>>, %arg4: memref<1x256xf32, #tpu.memory_space<vmem>>, %arg5: memref<256x128xf32, #tpu.memory_space<vmem>>, %arg6: memref<1x128xf32, #tpu.memory_space<vmem>>, %arg7: memref<768x256xf32, #tpu.memory_space<vmem>>, %arg8: memref<1x256xf32, #tpu.memory_space<vmem>>, %arg9: memref<256x128xf32, #tpu.memory_space<vmem>>, %arg10: memref<1x128xf32, #tpu.memory_space<vmem>>, %arg11: memref<512x128xf32, #tpu.memory_space<vmem>>, %arg12: memref<8x1xf32, #tpu.memory_space<vmem>>, %arg13: memref<8x512xf32, #tpu.memory_space<vmem>>, %arg14: memref<768x256xf32, #tpu.memory_space<vmem>>, %arg15: memref<1x256xf32, #tpu.memory_space<vmem>>, %arg16: memref<256x128xf32, #tpu.memory_space<vmem>>, %arg17: memref<1x128xf32, #tpu.memory_space<vmem>>, %arg18: memref<512x128xf32, #tpu.memory_space<vmem>>) attributes {dimension_semantics = [], scalar_prefetch = 0 : i64, scratch_operands = 0 : i64, tpu.core_type = #tpu.core_type<tc>} {
    %c0 = arith.constant 0 : index
    %c0_0 = arith.constant 0 : index
    %0 = vector.load %arg3[%c0, %c0_0] : memref<768x256xf32, #tpu.memory_space<vmem>>, vector<768x256xf32>
    %c0_1 = arith.constant 0 : index
    %c0_2 = arith.constant 0 : index
    %1 = vector.load %arg4[%c0_1, %c0_2] : memref<1x256xf32, #tpu.memory_space<vmem>>, vector<1x256xf32>
    %c0_3 = arith.constant 0 : index
    %c0_4 = arith.constant 0 : index
    %2 = vector.load %arg5[%c0_3, %c0_4] : memref<256x128xf32, #tpu.memory_space<vmem>>, vector<256x128xf32>
    %c0_5 = arith.constant 0 : index
    %c0_6 = arith.constant 0 : index
    %3 = vector.load %arg6[%c0_5, %c0_6] : memref<1x128xf32, #tpu.memory_space<vmem>>, vector<1x128xf32>
    %c0_7 = arith.constant 0 : index
    %c0_8 = arith.constant 0 : index
    %4 = vector.load %arg7[%c0_7, %c0_8] : memref<768x256xf32, #tpu.memory_space<vmem>>, vector<768x256xf32>
    %cst = arith.constant 9.990000e-01 : f32
    %5 = vector.broadcast %cst : f32 to vector<768x256xf32>
    %6 = arith.mulf %5, %4 : vector<768x256xf32>
    %cst_9 = arith.constant 1.000000e-03 : f32
    %7 = vector.broadcast %cst_9 : f32 to vector<768x256xf32>
    %8 = arith.mulf %7, %0 : vector<768x256xf32>
    %9 = arith.addf %6, %8 : vector<768x256xf32>
    %c0_10 = arith.constant 0 : index
    %c0_11 = arith.constant 0 : index
    %10 = vector.load %arg8[%c0_10, %c0_11] : memref<1x256xf32, #tpu.memory_space<vmem>>, vector<1x256xf32>
    %cst_12 = arith.constant 9.990000e-01 : f32
    %11 = vector.broadcast %cst_12 : f32 to vector<1x256xf32>
    %12 = arith.mulf %11, %10 : vector<1x256xf32>
    %cst_13 = arith.constant 1.000000e-03 : f32
    %13 = vector.broadcast %cst_13 : f32 to vector<1x256xf32>
    %14 = arith.mulf %13, %1 : vector<1x256xf32>
    %15 = arith.addf %12, %14 : vector<1x256xf32>
    %c0_14 = arith.constant 0 : index
    %c0_15 = arith.constant 0 : index
    %16 = vector.load %arg9[%c0_14, %c0_15] : memref<256x128xf32, #tpu.memory_space<vmem>>, vector<256x128xf32>
    %cst_16 = arith.constant 9.990000e-01 : f32
    %17 = vector.broadcast %cst_16 : f32 to vector<256x128xf32>
    %18 = arith.mulf %17, %16 : vector<256x128xf32>
    %cst_17 = arith.constant 1.000000e-03 : f32
    %19 = vector.broadcast %cst_17 : f32 to vector<256x128xf32>
    %20 = arith.mulf %19, %2 : vector<256x128xf32>
    %21 = arith.addf %18, %20 : vector<256x128xf32>
    %c0_18 = arith.constant 0 : index
    %c0_19 = arith.constant 0 : index
    %22 = vector.load %arg10[%c0_18, %c0_19] : memref<1x128xf32, #tpu.memory_space<vmem>>, vector<1x128xf32>
    %cst_20 = arith.constant 9.990000e-01 : f32
    %23 = vector.broadcast %cst_20 : f32 to vector<1x128xf32>
    %24 = arith.mulf %23, %22 : vector<1x128xf32>
    %cst_21 = arith.constant 1.000000e-03 : f32
    %25 = vector.broadcast %cst_21 : f32 to vector<1x128xf32>
    %26 = arith.mulf %25, %3 : vector<1x128xf32>
    %27 = arith.addf %24, %26 : vector<1x128xf32>
    %c0_22 = arith.constant 0 : index
    %c0_23 = arith.constant 0 : index
    %28 = vector.load %arg14[%c0_22, %c0_23] : memref<768x256xf32, #tpu.memory_space<vmem>>, vector<768x256xf32>
    tpu.vector_store %arg14[%c0_22, %c0_23], %9 {strides = array<i32>} : memref<768x256xf32, #tpu.memory_space<vmem>>, vector<768x256xf32>,
    %c0_24 = arith.constant 0 : index
    %c0_25 = arith.constant 0 : index
    %29 = vector.load %arg15[%c0_24, %c0_25] : memref<1x256xf32, #tpu.memory_space<vmem>>, vector<1x256xf32>
    tpu.vector_store %arg15[%c0_24, %c0_25], %15 {strides = array<i32>} : memref<1x256xf32, #tpu.memory_space<vmem>>, vector<1x256xf32>,
    %c0_26 = arith.constant 0 : index
    %c0_27 = arith.constant 0 : index
    %30 = vector.load %arg16[%c0_26, %c0_27] : memref<256x128xf32, #tpu.memory_space<vmem>>, vector<256x128xf32>
    tpu.vector_store %arg16[%c0_26, %c0_27], %21 {strides = array<i32>} : memref<256x128xf32, #tpu.memory_space<vmem>>, vector<256x128xf32>,
    %c0_28 = arith.constant 0 : index
    %c0_29 = arith.constant 0 : index
    %31 = vector.load %arg17[%c0_28, %c0_29] : memref<1x128xf32, #tpu.memory_space<vmem>>, vector<1x128xf32>
    tpu.vector_store %arg17[%c0_28, %c0_29], %27 {strides = array<i32>} : memref<1x128xf32, #tpu.memory_space<vmem>>, vector<1x128xf32>,
    %c0_30 = arith.constant 0 : index
    %c0_31 = arith.constant 0 : index
    %32 = vector.load %arg1[%c0_30, %c0_31] : memref<8x768xf32, #tpu.memory_space<vmem>>, vector<8x768xf32>
    %33 = arith.truncf %32 : vector<8x768xf32> to vector<8x768xbf16>
    %34 = arith.truncf %0 : vector<768x256xf32> to vector<768x256xbf16>
    %cst_32 = arith.constant dense<0.000000e+00> : vector<8x256xf32>
    %35 = tpu.matmul %33, %34, %cst_32 {dimension_numbers = #tpu.dot_dimension_numbers<[1], [0], [0], [1], [0, 0, 1, 1], [], []>} : vector<8x768xbf16>, vector<768x256xbf16>, vector<8x256xf32> -> vector<8x256xf32>
    %36 = vector.broadcast %1 : vector<1x256xf32> to vector<8x256xf32>
    %37 = arith.addf %35, %36 : vector<8x256xf32>
    %cst_33 = arith.constant 0.000000e+00 : f32
    %38 = vector.broadcast %cst_33 : f32 to vector<8x256xf32>
    %39 = arith.maximumf %37, %38 : vector<8x256xf32>
    %40 = arith.truncf %39 : vector<8x256xf32> to vector<8x256xbf16>
    %41 = arith.truncf %2 : vector<256x128xf32> to vector<256x128xbf16>
    %cst_34 = arith.constant dense<0.000000e+00> : vector<8x128xf32>
    %42 = tpu.matmul %40, %41, %cst_34 {dimension_numbers = #tpu.dot_dimension_numbers<[1], [0], [0], [1], [0, 0, 1, 1], [], []>} : vector<8x256xbf16>, vector<256x128xbf16>, vector<8x128xf32> -> vector<8x128xf32>
    %43 = vector.broadcast %3 : vector<1x128xf32> to vector<8x128xf32>
    %44 = arith.addf %42, %43 : vector<8x128xf32>
    %45 = arith.mulf %44, %44 : vector<8x128xf32>
    %cst_35 = arith.constant dense<0.000000e+00> : vector<8xf32>
    %46 = vector.multi_reduction <add>, %45, %cst_35 [1] : vector<8x128xf32> to vector<8xf32>
    %47 = vector.shape_cast %46 : vector<8xf32> to vector<8x1xf32>
    %cst_36 = arith.constant 1.000000e-24 : f32
    %48 = vector.broadcast %cst_36 : f32 to vector<8x1xf32>
    %49 = arith.maximumf %47, %48 : vector<8x1xf32>
    %50 = math.rsqrt %49 : vector<8x1xf32>
    %51 = vector.broadcast %50 : vector<8x1xf32> to vector<8x128xf32>
    %52 = arith.mulf %44, %51 : vector<8x128xf32>
    %c0_37 = arith.constant 0 : index
    %c0_38 = arith.constant 0 : index
    %53 = vector.load %arg2[%c0_37, %c0_38] : memref<8x768xf32, #tpu.memory_space<vmem>>, vector<8x768xf32>
    %54 = arith.truncf %53 : vector<8x768xf32> to vector<8x768xbf16>
    %55 = arith.truncf %9 : vector<768x256xf32> to vector<768x256xbf16>
    %cst_39 = arith.constant dense<0.000000e+00> : vector<8x256xf32>
    %56 = tpu.matmul %54, %55, %cst_39 {dimension_numbers = #tpu.dot_dimension_numbers<[1], [0], [0], [1], [0, 0, 1, 1], [], []>} : vector<8x768xbf16>, vector<768x256xbf16>, vector<8x256xf32> -> vector<8x256xf32>
    %57 = vector.broadcast %15 : vector<1x256xf32> to vector<8x256xf32>
    %58 = arith.addf %56, %57 : vector<8x256xf32>
    %cst_40 = arith.constant 0.000000e+00 : f32
    %59 = vector.broadcast %cst_40 : f32 to vector<8x256xf32>
    %60 = arith.maximumf %58, %59 : vector<8x256xf32>
    %61 = arith.truncf %60 : vector<8x256xf32> to vector<8x256xbf16>
    %62 = arith.truncf %21 : vector<256x128xf32> to vector<256x128xbf16>
    %cst_41 = arith.constant dense<0.000000e+00> : vector<8x128xf32>
    %63 = tpu.matmul %61, %62, %cst_41 {dimension_numbers = #tpu.dot_dimension_numbers<[1], [0], [0], [1], [0, 0, 1, 1], [], []>} : vector<8x256xbf16>, vector<256x128xbf16>, vector<8x128xf32> -> vector<8x128xf32>
    %64 = vector.broadcast %27 : vector<1x128xf32> to vector<8x128xf32>
    %65 = arith.addf %63, %64 : vector<8x128xf32>
    %66 = arith.mulf %65, %65 : vector<8x128xf32>
    %cst_42 = arith.constant dense<0.000000e+00> : vector<8xf32>
    %67 = vector.multi_reduction <add>, %66, %cst_42 [1] : vector<8x128xf32> to vector<8xf32>
    %68 = vector.shape_cast %67 : vector<8xf32> to vector<8x1xf32>
    %cst_43 = arith.constant 1.000000e-24 : f32
    %69 = vector.broadcast %cst_43 : f32 to vector<8x1xf32>
    %70 = arith.maximumf %68, %69 : vector<8x1xf32>
    %71 = math.rsqrt %70 : vector<8x1xf32>
    %72 = vector.broadcast %71 : vector<8x1xf32> to vector<8x128xf32>
    %73 = arith.mulf %65, %72 : vector<8x128xf32>
    %74 = arith.mulf %52, %73 : vector<8x128xf32>
    %cst_44 = arith.constant dense<0.000000e+00> : vector<8xf32>
    %75 = vector.multi_reduction <add>, %74, %cst_44 [1] : vector<8x128xf32> to vector<8xf32>
    %76 = vector.shape_cast %75 : vector<8xf32> to vector<8x1xf32>
    %cst_45 = arith.constant 14.2857141 : f32
    %77 = vector.broadcast %cst_45 : f32 to vector<8x1xf32>
    %78 = arith.mulf %76, %77 : vector<8x1xf32>
    %c0_46 = arith.constant 0 : index
    %c0_47 = arith.constant 0 : index
    %79 = vector.load %arg12[%c0_46, %c0_47] : memref<8x1xf32, #tpu.memory_space<vmem>>, vector<8x1xf32>
    tpu.vector_store %arg12[%c0_46, %c0_47], %78 {strides = array<i32>} : memref<8x1xf32, #tpu.memory_space<vmem>>, vector<8x1xf32>,
    %c0_48 = arith.constant 0 : index
    %c0_49 = arith.constant 0 : index
    %80 = vector.load %arg11[%c0_48, %c0_49] : memref<512x128xf32, #tpu.memory_space<vmem>>, vector<512x128xf32>
    %81 = arith.truncf %52 : vector<8x128xf32> to vector<8x128xbf16>
    %82 = arith.truncf %80 : vector<512x128xf32> to vector<512x128xbf16>
    %cst_50 = arith.constant dense<0.000000e+00> : vector<8x512xf32>
    %83 = tpu.matmul %81, %82, %cst_50 {dimension_numbers = #tpu.dot_dimension_numbers<[1], [1], [0], [0], [0, 0, 1, 0], [], []>} : vector<8x128xbf16>, vector<512x128xbf16>, vector<8x512xf32> -> vector<8x512xf32>
    %cst_51 = arith.constant 14.2857141 : f32
    %84 = vector.broadcast %cst_51 : f32 to vector<8x512xf32>
    %85 = arith.mulf %83, %84 : vector<8x512xf32>
    %c0_52 = arith.constant 0 : index
    %c0_53 = arith.constant 0 : index
    %86 = vector.load %arg13[%c0_52, %c0_53] : memref<8x512xf32, #tpu.memory_space<vmem>>, vector<8x512xf32>
    tpu.vector_store %arg13[%c0_52, %c0_53], %85 {strides = array<i32>} : memref<8x512xf32, #tpu.memory_space<vmem>>, vector<8x512xf32>,
    %c0_54 = arith.constant 0 : index
    %c0_55 = arith.constant 0 : index
    %87 = vector.load %arg18[%c0_54, %c0_55] : memref<512x128xf32, #tpu.memory_space<vmem>>, vector<512x128xf32>
    tpu.vector_store %arg18[%c0_54, %c0_55], %80 {strides = array<i32>} : memref<512x128xf32, #tpu.memory_space<vmem>>, vector<512x128xf32>,
    %c0_56 = arith.constant 0 : index
    %88 = memref.load %arg0[%c0_56] : memref<1xi32, #tpu.memory_space<smem>>
    %89 = tpu.assume_multiple %88, 8 : i32
    %90 = arith.index_cast %89 : i32 to index
    %c0_57 = arith.constant 0 : index
    %91 = vector.load %arg18[%90, %c0_57] : memref<512x128xf32, #tpu.memory_space<vmem>>, vector<8x128xf32>
    tpu.vector_store %arg18[%90, %c0_57], %73 {strides = array<i32>} : memref<512x128xf32, #tpu.memory_space<vmem>>, vector<8x128xf32>,
    return
  }
}

</mosaic_0001>

<bundles_post_ra>
// kernel: moco_forward.1
= control target key start
LH: loop header
LB: loop body
LE: loop exit
PB: predicated region body
PF: predicated region fallthrough
CT: control target
= control target key end

     0   :  { %s4483_s0 = inlined_call_operand.<no memory space> [shape: s32[1], index: 0, kind: input, shape index: {}]   ;;  %s4484_s1 = inlined_call_operand.vmem [shape: f32[8,768], index: 1, kind: input, shape index: {}]   ;;  %s4485_s2 = inlined_call_operand.vmem [shape: f32[8,768], index: 2, kind: input, shape index: {}]   ;;  %s4486_s3 = inlined_call_operand.hbm [shape: f32[768,256], index: 3, kind: input, shape index: {}]   ;;  %s4487_s4 = inlined_call_operand.vmem [shape: f32[1,256], index: 4, kind: input, shape index: {}]   ;;  %s4488_s5 = inlined_call_operand.vmem [shape: f32[256,128], index: 5, kind: input, shape index: {}]   ;;  %s4489_s6 = inlined_call_operand.vmem [shape: f32[1,128], index: 6, kind: input, shape index: {}]   ;;  %s4490_s7 = inlined_call_operand.hbm [shape: f32[768,256], index: 7, kind: input, shape index: {}, may-alias: {7,14}]   ;;  %s4491_s8 = inlined_call_operand.vmem [shape: f32[1,256], index: 8, kind: input, shape index: {}, may-alias: {8,15}]   ;;  %s4492_s9 = inlined_call_operand.hbm [shape: f32[256,128], index: 9, kind: input, shape index: {}, may-alias: {9,16}]   ;;  %s4493_s10 = inlined_call_operand.vmem [shape: f32[1,128], index: 10, kind: input, shape index: {}, may-alias: {10,17}]   ;;  %s4494_s11 = inlined_call_operand.vmem [shape: f32[512,128], index: 11, kind: input, shape index: {}, may-alias: {11,18}]   ;;  %s4495_s12 = inlined_call_operand.vmem [shape: f32[8,1], index: 12, kind: output, shape index: {0}]   ;;  %s4496_s13 = inlined_call_operand.vmem [shape: f32[8,512], index: 13, kind: output, shape index: {1}]   ;;  %s4497_s14 = inlined_call_operand.hbm [shape: f32[768,256], index: 14, kind: output, shape index: {2}, may-alias: {7,14}]   ;;  %s4498_s15 = inlined_call_operand.vmem [shape: f32[1,256], index: 15, kind: output, shape index: {3}, may-alias: {8,15}]   ;;  %s4499_s16 = inlined_call_operand.hbm [shape: f32[256,128], index: 16, kind: output, shape index: {4}, may-alias: {9,16}]   ;;  %s4500_s17 = inlined_call_operand.vmem [shape: f32[1,128], index: 17, kind: output, shape index: {5}, may-alias: {10,17}]   ;;  %s4501_s18 = inlined_call_operand.vmem [shape: f32[512,128], index: 18, kind: output, shape index: {6}, may-alias: {11,18}]  }
   0x1   :  { %4559 = sst [smem:[#allocation69_spill]] %s4483_s0 }
   0x2   :  { %4560 = sst [smem:[#allocation70_spill]] %s4484_s1 }
   0x3   :  { %4561 = sst [smem:[#allocation71_spill]] %s4485_s2 }
   0x4   :  { %25 = vsyncpa [#allocation4], 0 }
   0x5   :  { %26 = vsyncpa [#allocation7], 0 }
   0x6   :  { %27 = vsyncpa [#allocation5], 0 }
   0x7   :  { %28 = vsyncpa [#allocation11], 0  ;;  %s2821_s27 = smov [#allocation6]   ;;  %s2822_s29 = smov [#allocation3]  }
   0x8   :  { %s58_s28 = sshll.u32 %s2821_s27, 4  ;;  %s40_s30 = sshll.u32 %s2822_s29, 4  ;;  %s59_s28 = int_to_ptr.vmem [resolvable:$true] %s58_s28  ;;  %s41_s30 = int_to_ptr.vmem [resolvable:$true] %s40_s30 }
   0x9   :  { %s2721_s0 = scalar_lea.vmem %s59_s28, 24576  ;;  %p2726_p1 = scmp.lt.s32.totalorder %s59_s28, %s59_s28 }
   0xa   :  { %p2722_p0 = scmp.ne.s32.totalorder %s59_s28, %s2721_s0  ;;  %p2727_p2 = scmp.lt.s32.totalorder %s2721_s0, %s2721_s0 }
   0xc   :  { %p2728_p3 = por %p2727_p2, %p2726_p1 }
   0xe   :  { %p2729_p4 = pnand %p2728_p3, %p2722_p0 }
  0x10   :  { %2732 = shalt.err (!%p2729_p4)
}
  0x11   :  { %s2823_s19 = smov 256   ;;  %s2824_s1 = smov 16  }
  0x12   :  { %64 = dma.hbm_to_vmem [thread:$0]  %s4490_s7, 24576, %s59_s28, [#allocation7], %s2823_s19, %s2823_s19, %s2824_s1  }
  0x13   :  { %s2741_s22 = scalar_lea.vmem %s41_s30, 24576  ;;  %p2746_p6 = scmp.lt.s32.totalorder %s41_s30, %s41_s30 }
  0x14   :  { %p2742_p5 = scmp.ne.s32.totalorder %s41_s30, %s2741_s22  ;;  %p2747_p7 = scmp.lt.s32.totalorder %s2741_s22, %s2741_s22 }
  0x16   :  { %p2748_p8 = por %p2747_p7, %p2746_p6 }
  0x18   :  { %p2749_p9 = pnand %p2748_p8, %p2742_p5 }
  0x1a   :  { %2752 = shalt.err (!%p2749_p9)
}
  0x1b   :  { %46 = dma.hbm_to_vmem [thread:$0]  %s4486_s3, 24576, %s41_s30, [#allocation4], %s2823_s19, %s2823_s19, %s2824_s1  }
  0x1c   :  { %s2825_s24 = smov [#allocation8]  }
  0x1d   :  { %s72_s25 = sshll.u32 %s2825_s24, 4  ;;  %s73_s25 = int_to_ptr.vmem [resolvable:$true] %s72_s25 }
  0x1e   :  { %s2761_s26 = scalar_lea.vmem %s73_s25, 4096  ;;  %p2766_p11 = scmp.lt.s32.totalorder %s73_s25, %s73_s25 }
  0x1f   :  { %p2762_p10 = scmp.ne.s32.totalorder %s73_s25, %s2761_s26  ;;  %p2767_p12 = scmp.lt.s32.totalorder %s2761_s26, %s2761_s26 }
  0x21   :  { %p2768_p13 = por %p2767_p12, %p2766_p11 }
  0x23   :  { %p2769_p0 = pnand %p2768_p13, %p2762_p10 }
  0x25   :  { %2772 = shalt.err (!%p2769_p0)
}
  0x26   :  { %s2826_s7 = smov 128   ;;  %s2827_s27 = smov 8  }
  0x27   :  { %78 = dma.hbm_to_vmem [thread:$0]  %s4492_s9, 4096, %s73_s25, [#allocation7], %s2826_s7, %s2826_s7, %s2827_s27  }
  0x28   :  { %2813 = dma.done.wait [#allocation4], 24576  }
  0x29   :  { %2814 = vsyncadd [#allocation4], 4294942720 }
  0x2a   :  { %2815 = dma.done.wait [#allocation7], 28672  }
  0x2b   :  { %2816 = vsyncadd [#allocation7], 4294938624  ;;  %v122_v0 = vld [vmem:[#allocation3 + $0xe8] sm:$0xff]  ;;  %v124_v1 = vld [vmem:[#allocation3 + $0xf8] sm:$0xff]  ;;  %s4562_s30 = sld [smem:[#allocation70_spill]]  ;;  %s2828_s9 = smov [#allocation9]  }
  0x2c   :  { %v348_v2 = vld [vmem:[#allocation6 + $0xe8] sm:$0xff]  ;;  %v350_v3 = vld [vmem:[#allocation6 + $0xf8] sm:$0xff]  ;;  %v732_v5 = vmul.f32 0.001, %v122_v0  ;;  %v1480_v6 = vpack.c.bf16 %v124_v1, %v122_v0  ;;  %v121_v7 = vld [vmem:[#allocation3 + $0xe0] sm:$0xff]  ;;  %s4564_s24 = sld [smem:[#allocation71_spill]] }
  0x2d   :  { %v540_v4 = vmul.f32 0.999, %v348_v2  ;;  %v542_v8 = vmul.f32 0.999, %v350_v3  ;;  %v734_v9 = vmul.f32 0.001, %v124_v1 }
  0x2e   :  { %v123_v10 = vld [vmem:[#allocation3 + $0xf0] sm:$0xff]  ;;  %v347_v11 = vld [vmem:[#allocation6 + $0xe0] sm:$0xff]  ;;  %1572 = vmatprep.subr.bf16.mxu0 %v1480_v6  ;;  %v731_v15 = vmul.f32 0.001, %v121_v7  ;;  %v186_v17 = vld [vmem:[#allocation3 + $0x2e8] sm:$0xff]  ;;  %s4717_s29 = sld [smem:[#allocation69_spill]] }
  0x2f   :  { %v924_v12 = vadd.f32 %v732_v5, %v540_v4  ;;  %v349_v13 = vld [vmem:[#allocation6 + $0xf0] sm:$0xff]  ;;  %v539_v14 = vmul.f32 0.999, %v347_v11  ;;  %v1479_v16 = vpack.c.bf16 %v123_v10, %v121_v7  ;;  %v926_v18 = vadd.f32 %v734_v9, %v542_v8  ;;  %v188_v21 = vld [vmem:[#allocation3 + $0x2f8] sm:$0xff]  ;;  %v412_v22 = vld [vmem:[#allocation6 + $0x2e8] sm:$0xff]  ;;  %s2350_s0 = sshll.u32 %s2828_s9, 4  ;;  %s2351_s0 = int_to_ptr.vmem [resolvable:$true] %s2350_s0 }
  0x30   :  { %v541_v19 = vmul.f32 0.999, %v349_v13  ;;  %v733_v20 = vmul.f32 0.001, %v123_v10  ;;  %v414_v24 = vld [vmem:[#allocation6 + $0x2f8] sm:$0xff]  ;;  %v1512_v27 = vpack.c.bf16 %v188_v21, %v186_v17  ;;  %v185_v28 = vld [vmem:[#allocation3 + $0x2e0] sm:$0xff]  ;;  %p2778_p2 = scmp.lt.s32.totalorder %s2351_s0, %s2351_s0 }
  0x31   :  { %1252 = vst [vmem:[#allocation9 + $0xe8] sm:$0xff] %v924_v12  ;;  %v923_v23 = vadd.f32 %v731_v15, %v539_v14  ;;  %1573 = vmatpush1.bf16.msra.mxu0 %v1479_v16  ;;  %v604_v25 = vmul.f32 0.999, %v412_v22  ;;  %v796_v26 = vmul.f32 0.001, %v186_v17  ;;  %1254 = vst [vmem:[#allocation9 + $0xf8] sm:$0xff] %v926_v18 }
  0x32   :  { %v925_v29 = vadd.f32 %v733_v20, %v541_v19  ;;  %v606_v30 = vmul.f32 0.999, %v414_v24  ;;  %v798_v31 = vmul.f32 0.001, %v188_v21  ;;  %v187_v32 = vld [vmem:[#allocation3 + $0x2f0] sm:$0xff]  ;;  %v411_v33 = vld [vmem:[#allocation6 + $0x2e0] sm:$0xff]  ;;  %1613 = vmatprep.subr.bf16.mxu1 %v1512_v27 }
  0x33   :  { %1251 = vst [vmem:[#allocation9 + $0xe0] sm:$0xff] %v923_v23  ;;  %v988_v34 = vadd.f32 %v796_v26, %v604_v25  ;;  %v413_v35 = vld [vmem:[#allocation6 + $0x2f0] sm:$0xff]  ;;  %v603_v36 = vmul.f32 0.999, %v411_v33  ;;  %v795_v37 = vmul.f32 0.001, %v185_v28  ;;  %v1511_v38 = vpack.c.bf16 %v187_v32, %v185_v28 }
  0x34   :  { %v118_v39 = vld [vmem:[#allocation3 + $0xc8] sm:$0xff]  ;;  %1253 = vst [vmem:[#allocation9 + $0xf0] sm:$0xff] %v925_v29  ;;  %v990_v40 = vadd.f32 %v798_v31, %v606_v30  ;;  %v605_v41 = vmul.f32 0.999, %v413_v35  ;;  %v797_v42 = vmul.f32 0.001, %v187_v32  ;;  %s2339_s3 = scalar_lea.vmem %s4501_s18, %s4717_s29 }
  0x35   :  { %v120_v43 = vld [vmem:[#allocation3 + $0xd8] sm:$0xff]  ;;  %v117_v44 = vld [vmem:[#allocation3 + $0xc0] sm:$0xff]  ;;  %1316 = vst [vmem:[#allocation9 + $0x2e8] sm:$0xff] %v988_v34  ;;  %v987_v45 = vadd.f32 %v795_v37, %v603_v36  ;;  %1614 = vmatpush1.bf16.msra.mxu1 %v1511_v38  ;;  %v119_v47 = vld [vmem:[#allocation3 + $0xd0] sm:$0xff]  ;;  %s2829_s20 = smov [#allocation10]   ;;  %s2773_s21 = scalar_lea.vmem %s2351_s0, 24576 }
  0x36   :  { %v1478_v46 = vpack.c.bf16 %v120_v43, %v118_v39  ;;  %v343_v48 = vld [vmem:[#allocation6 + $0xc0] sm:$0xff]  ;;  %1318 = vst [vmem:[#allocation9 + $0x2f8] sm:$0xff] %v990_v40  ;;  %v989_v49 = vadd.f32 %v797_v42, %v605_v41  ;;  %v345_v50 = vld [vmem:[#allocation6 + $0xd0] sm:$0xff]  ;;  %v727_v52 = vmul.f32 0.001, %v117_v44  ;;  %v1477_v53 = vpack.c.bf16 %v119_v47, %v117_v44  ;;  %v182_v54 = vld [vmem:[#allocation3 + $0x2c8] sm:$0xff]  ;;  %p2774_p1 = scmp.ne.s32.totalorder %s2351_s0, %s2773_s21  ;;  %p2779_p3 = scmp.lt.s32.totalorder %s2773_s21, %s2773_s21 }
  0x37   :  { %v535_v51 = vmul.f32 0.999, %v343_v48  ;;  %1315 = vst [vmem:[#allocation9 + $0x2e0] sm:$0xff] %v987_v45  ;;  %v537_v55 = vmul.f32 0.999, %v345_v50  ;;  %v184_v57 = vld [vmem:[#allocation3 + $0x2d8] sm:$0xff] }
  0x38   :  { %1574 = vmatprep.subr.bf16.mxu0 %v1478_v46  ;;  %v729_v56 = vmul.f32 0.001, %v119_v47  ;;  %v181_v58 = vld [vmem:[#allocation3 + $0x2c0] sm:$0xff]  ;;  %1317 = vst [vmem:[#allocation9 + $0x2f0] sm:$0xff] %v989_v49  ;;  %v1510_v60 = vpack.c.bf16 %v184_v57, %v182_v54  ;;  %v183_v61 = vld [vmem:[#allocation3 + $0x2d0] sm:$0xff]  ;;  %v114_v4 = vld [vmem:[#allocation3 + $0xa8] sm:$0xff]  ;;  %p2780_p4 = por %p2779_p3, %p2778_p2 }
  0x39   :  { %v919_v59 = vadd.f32 %v727_v52, %v535_v51  ;;  %1575 = vmatpush1.bf16.msra.mxu0 %v1477_v53  ;;  %v407_v62 = vld [vmem:[#allocation6 + $0x2c0] sm:$0xff]  ;;  %v409_v0 = vld [vmem:[#allocation6 + $0x2d0] sm:$0xff]  ;;  %v791_v2 = vmul.f32 0.001, %v181_v58  ;;  %v1509_v3 = vpack.c.bf16 %v183_v61, %v181_v58  ;;  %v793_v6 = vmul.f32 0.001, %v183_v61 }
  0x3a   :  { %v921_v63 = vadd.f32 %v729_v56, %v537_v55  ;;  %v599_v1 = vmul.f32 0.999, %v407_v62  ;;  %1615 = vmatprep.subr.bf16.mxu1 %v1510_v60  ;;  %v601_v5 = vmul.f32 0.999, %v409_v0  ;;  %v116_v7 = vld [vmem:[#allocation3 + $0xb8] sm:$0xff]  ;;  %v113_v8 = vld [vmem:[#allocation3 + $0xa0] sm:$0xff]  ;;  %p2781_p5 = pnand %p2780_p4, %p2774_p1 }
  0x3b   :  { %1247 = vst [vmem:[#allocation9 + $0xc0] sm:$0xff] %v919_v59  ;;  %1616 = vmatpush1.bf16.msra.mxu1 %v1509_v3  ;;  %v1476_v10 = vpack.c.bf16 %v116_v7, %v114_v4  ;;  %v115_v11 = vld [vmem:[#allocation3 + $0xb0] sm:$0xff]  ;;  %v339_v12 = vld [vmem:[#allocation6 + $0xa0] sm:$0xff]  ;;  %v723_v16 = vmul.f32 0.001, %v113_v8  ;;  %v178_v18 = vld [vmem:[#allocation3 + $0x2a8] sm:$0xff] }
  0x3c   :  { %1249 = vst [vmem:[#allocation9 + $0xd0] sm:$0xff] %v921_v63  ;;  %v983_v9 = vadd.f32 %v791_v2, %v599_v1  ;;  %v985_v13 = vadd.f32 %v793_v6, %v601_v5  ;;  %v341_v14 = vld [vmem:[#allocation6 + $0xb0] sm:$0xff]  ;;  %v531_v15 = vmul.f32 0.999, %v339_v12  ;;  %v1475_v17 = vpack.c.bf16 %v115_v11, %v113_v8  ;;  %v180_v21 = vld [vmem:[#allocation3 + $0x2b8] sm:$0xff]  ;;  %v177_v22 = vld [vmem:[#allocation3 + $0x2a0] sm:$0xff] }
  0x3d   :  { %1576 = vmatprep.subr.bf16.mxu0 %v1476_v10  ;;  %v533_v19 = vmul.f32 0.999, %v341_v14  ;;  %v725_v20 = vmul.f32 0.001, %v115_v11  ;;  %v1508_v24 = vpack.c.bf16 %v180_v21, %v178_v18  ;;  %v179_v25 = vld [vmem:[#allocation3 + $0x2b0] sm:$0xff]  ;;  %v403_v26 = vld [vmem:[#allocation6 + $0x2a0] sm:$0xff] }
  0x3e   :  { %1311 = vst [vmem:[#allocation9 + $0x2c0] sm:$0xff] %v983_v9  ;;  %1313 = vst [vmem:[#allocation9 + $0x2d0] sm:$0xff] %v985_v13  ;;  %v915_v23 = vadd.f32 %v723_v16, %v531_v15  ;;  %1577 = vmatpush1.bf16.msra.mxu0 %v1475_v17  ;;  %v405_v28 = vld [vmem:[#allocation6 + $0x2b0] sm:$0xff]  ;;  %v595_v29 = vmul.f32 0.999, %v403_v26  ;;  %v1507_v31 = vpack.c.bf16 %v179_v25, %v177_v22  ;;  %v110_v32 = vld [vmem:[#allocation3 + $0x88] sm:$0xff] }
  0x3f   :  { %v917_v27 = vadd.f32 %v725_v20, %v533_v19  ;;  %v787_v30 = vmul.f32 0.001, %v177_v22  ;;  %1617 = vmatprep.subr.bf16.mxu1 %v1508_v24  ;;  %v597_v33 = vmul.f32 0.999, %v405_v28  ;;  %v789_v34 = vmul.f32 0.001, %v179_v25 }
  0x40   :  { %1243 = vst [vmem:[#allocation9 + $0xa0] sm:$0xff] %v915_v23  ;;  %v112_v35 = vld [vmem:[#allocation3 + $0x98] sm:$0xff]  ;;  %v109_v36 = vld [vmem:[#allocation3 + $0x80] sm:$0xff]  ;;  %1618 = vmatpush1.bf16.msra.mxu1 %v1507_v31  ;;  %v111_v39 = vld [vmem:[#allocation3 + $0x90] sm:$0xff] }
  0x41   :  { %1245 = vst [vmem:[#allocation9 + $0xb0] sm:$0xff] %v917_v27  ;;  %v979_v37 = vadd.f32 %v787_v30, %v595_v29  ;;  %v1474_v38 = vpack.c.bf16 %v112_v35, %v110_v32  ;;  %v335_v40 = vld [vmem:[#allocation6 + $0x80] sm:$0xff]  ;;  %v981_v41 = vadd.f32 %v789_v34, %v597_v33  ;;  %v337_v42 = vld [vmem:[#allocation6 + $0x90] sm:$0xff]  ;;  %v719_v44 = vmul.f32 0.001, %v109_v36  ;;  %v174_v46 = vld [vmem:[#allocation3 + $0x288] sm:$0xff] }
  0x42   :  { %v527_v43 = vmul.f32 0.999, %v335_v40  ;;  %v1473_v45 = vpack.c.bf16 %v111_v39, %v109_v36  ;;  %v529_v47 = vmul.f32 0.999, %v337_v42  ;;  %v721_v48 = vmul.f32 0.001, %v111_v39 }
  0x43   :  { %1307 = vst [vmem:[#allocation9 + $0x2a0] sm:$0xff] %v979_v37  ;;  %1578 = vmatprep.subr.bf16.mxu0 %v1474_v38  ;;  %v176_v49 = vld [vmem:[#allocation3 + $0x298] sm:$0xff]  ;;  %v173_v50 = vld [vmem:[#allocation3 + $0x280] sm:$0xff]  ;;  %1309 = vst [vmem:[#allocation9 + $0x2b0] sm:$0xff] %v981_v41 }
  0x44   :  { %v911_v51 = vadd.f32 %v719_v44, %v527_v43  ;;  %1579 = vmatpush1.bf16.msra.mxu0 %v1473_v45  ;;  %v1506_v52 = vpack.c.bf16 %v176_v49, %v174_v46  ;;  %v175_v53 = vld [vmem:[#allocation3 + $0x290] sm:$0xff]  ;;  %v399_v54 = vld [vmem:[#allocation6 + $0x280] sm:$0xff]  ;;  %v913_v55 = vadd.f32 %v721_v48, %v529_v47  ;;  %v783_v58 = vmul.f32 0.001, %v173_v50  ;;  %v106_v60 = vld [vmem:[#allocation3 + $0x68] sm:$0xff] }
  0x45   :  { %v401_v56 = vld [vmem:[#allocation6 + $0x290] sm:$0xff]  ;;  %v591_v57 = vmul.f32 0.999, %v399_v54  ;;  %v1505_v59 = vpack.c.bf16 %v175_v53, %v173_v50  ;;  %v785_v62 = vmul.f32 0.001, %v175_v53  ;;  %v108_v63 = vld [vmem:[#allocation3 + $0x78] sm:$0xff] }
  0x46   :  { %1239 = vst [vmem:[#allocation9 + $0x80] sm:$0xff] %v911_v51  ;;  %1619 = vmatprep.subr.bf16.mxu1 %v1506_v52  ;;  %v593_v61 = vmul.f32 0.999, %v401_v56  ;;  %v105_v0 = vld [vmem:[#allocation3 + $0x60] sm:$0xff]  ;;  %1241 = vst [vmem:[#allocation9 + $0x90] sm:$0xff] %v913_v55  ;;  %v1472_v2 = vpack.c.bf16 %v108_v63, %v106_v60  ;;  %v107_v3 = vld [vmem:[#allocation3 + $0x70] sm:$0xff] }
  0x47   :  { %v975_v1 = vadd.f32 %v783_v58, %v591_v57  ;;  %1620 = vmatpush1.bf16.msra.mxu1 %v1505_v59  ;;  %v331_v4 = vld [vmem:[#allocation6 + $0x60] sm:$0xff]  ;;  %v333_v6 = vld [vmem:[#allocation6 + $0x70] sm:$0xff]  ;;  %v715_v8 = vmul.f32 0.001, %v105_v0  ;;  %v1471_v9 = vpack.c.bf16 %v107_v3, %v105_v0  ;;  %v170_v10 = vld [vmem:[#allocation3 + $0x268] sm:$0xff] }
  0x48   :  { %v977_v5 = vadd.f32 %v785_v62, %v593_v61  ;;  %v523_v7 = vmul.f32 0.999, %v331_v4  ;;  %1580 = vmatprep.subr.bf16.mxu0 %v1472_v2  ;;  %v525_v11 = vmul.f32 0.999, %v333_v6  ;;  %v717_v12 = vmul.f32 0.001, %v107_v3 }
  0x49   :  { %1303 = vst [vmem:[#allocation9 + $0x280] sm:$0xff] %v975_v1  ;;  %v172_v13 = vld [vmem:[#allocation3 + $0x278] sm:$0xff]  ;;  %v169_v14 = vld [vmem:[#allocation3 + $0x260] sm:$0xff]  ;;  %1581 = vmatpush1.bf16.msra.mxu0 %v1471_v9  ;;  %v171_v17 = vld [vmem:[#allocation3 + $0x270] sm:$0xff] }
  0x4a   :  { %1305 = vst [vmem:[#allocation9 + $0x290] sm:$0xff] %v977_v5  ;;  %v907_v15 = vadd.f32 %v715_v8, %v523_v7  ;;  %v1504_v16 = vpack.c.bf16 %v172_v13, %v170_v10  ;;  %v395_v18 = vld [vmem:[#allocation6 + $0x260] sm:$0xff]  ;;  %v909_v19 = vadd.f32 %v717_v12, %v525_v11  ;;  %v397_v20 = vld [vmem:[#allocation6 + $0x270] sm:$0xff]  ;;  %v779_v22 = vmul.f32 0.001, %v169_v14  ;;  %v102_v24 = vld [vmem:[#allocation3 + $0x48] sm:$0xff] }
  0x4b   :  { %v587_v21 = vmul.f32 0.999, %v395_v18  ;;  %v1503_v23 = vpack.c.bf16 %v171_v17, %v169_v14  ;;  %v589_v25 = vmul.f32 0.999, %v397_v20  ;;  %v781_v26 = vmul.f32 0.001, %v171_v17 }
  0x4c   :  { %1235 = vst [vmem:[#allocation9 + $0x60] sm:$0xff] %v907_v15  ;;  %1621 = vmatprep.subr.bf16.mxu1 %v1504_v16  ;;  %v104_v27 = vld [vmem:[#allocation3 + $0x58] sm:$0xff]  ;;  %v101_v28 = vld [vmem:[#allocation3 + $0x40] sm:$0xff]  ;;  %1237 = vst [vmem:[#allocation9 + $0x70] sm:$0xff] %v909_v19 }
  0x4d   :  { %v971_v29 = vadd.f32 %v779_v22, %v587_v21  ;;  %1622 = vmatpush1.bf16.msra.mxu1 %v1503_v23  ;;  %v1470_v30 = vpack.c.bf16 %v104_v27, %v102_v24  ;;  %v103_v31 = vld [vmem:[#allocation3 + $0x50] sm:$0xff]  ;;  %v327_v32 = vld [vmem:[#allocation6 + $0x40] sm:$0xff]  ;;  %v973_v33 = vadd.f32 %v781_v26, %v589_v25  ;;  %v711_v36 = vmul.f32 0.001, %v101_v28  ;;  %v166_v38 = vld [vmem:[#allocation3 + $0x248] sm:$0xff] }
  0x4e   :  { %v329_v34 = vld [vmem:[#allocation6 + $0x50] sm:$0xff]  ;;  %v519_v35 = vmul.f32 0.999, %v327_v32  ;;  %v1469_v37 = vpack.c.bf16 %v103_v31, %v101_v28  ;;  %v713_v40 = vmul.f32 0.001, %v103_v31  ;;  %v168_v41 = vld [vmem:[#allocation3 + $0x258] sm:$0xff] }
  0x4f   :  { %1299 = vst [vmem:[#allocation9 + $0x260] sm:$0xff] %v971_v29  ;;  %1582 = vmatprep.subr.bf16.mxu0 %v1470_v30  ;;  %v521_v39 = vmul.f32 0.999, %v329_v34  ;;  %v165_v42 = vld [vmem:[#allocation3 + $0x240] sm:$0xff]  ;;  %1301 = vst [vmem:[#allocation9 + $0x270] sm:$0xff] %v973_v33  ;;  %v1502_v44 = vpack.c.bf16 %v168_v41, %v166_v38  ;;  %v167_v45 = vld [vmem:[#allocation3 + $0x250] sm:$0xff] }
  0x50   :  { %v903_v43 = vadd.f32 %v711_v36, %v519_v35  ;;  %1583 = vmatpush1.bf16.msra.mxu0 %v1469_v37  ;;  %v391_v46 = vld [vmem:[#allocation6 + $0x240] sm:$0xff]  ;;  %v393_v48 = vld [vmem:[#allocation6 + $0x250] sm:$0xff]  ;;  %v775_v50 = vmul.f32 0.001, %v165_v42  ;;  %v1501_v51 = vpack.c.bf16 %v167_v45, %v165_v42  ;;  %v98_v52 = vld [vmem:[#allocation3 + $0x28] sm:$0xff] }
  0x51   :  { %v905_v47 = vadd.f32 %v713_v40, %v521_v39  ;;  %v583_v49 = vmul.f32 0.999, %v391_v46  ;;  %1623 = vmatprep.subr.bf16.mxu1 %v1502_v44  ;;  %v585_v53 = vmul.f32 0.999, %v393_v48  ;;  %v777_v54 = vmul.f32 0.001, %v167_v45 }
  0x52   :  { %1231 = vst [vmem:[#allocation9 + $0x40] sm:$0xff] %v903_v43  ;;  %v100_v55 = vld [vmem:[#allocation3 + $0x38] sm:$0xff]  ;;  %v97_v56 = vld [vmem:[#allocation3 + $0x20] sm:$0xff]  ;;  %1624 = vmatpush1.bf16.msra.mxu1 %v1501_v51  ;;  %v99_v59 = vld [vmem:[#allocation3 + $0x30] sm:$0xff] }
  0x53   :  { %1233 = vst [vmem:[#allocation9 + $0x50] sm:$0xff] %v905_v47  ;;  %v967_v57 = vadd.f32 %v775_v50, %v583_v49  ;;  %v1468_v58 = vpack.c.bf16 %v100_v55, %v98_v52  ;;  %v323_v60 = vld [vmem:[#allocation6 + $0x20] sm:$0xff]  ;;  %v969_v61 = vadd.f32 %v777_v54, %v585_v53  ;;  %v325_v62 = vld [vmem:[#allocation6 + $0x30] sm:$0xff]  ;;  %v707_v0 = vmul.f32 0.001, %v97_v56  ;;  %v162_v2 = vld [vmem:[#allocation3 + $0x228] sm:$0xff] }
  0x54   :  { %v515_v63 = vmul.f32 0.999, %v323_v60  ;;  %v1467_v1 = vpack.c.bf16 %v99_v59, %v97_v56  ;;  %v517_v3 = vmul.f32 0.999, %v325_v62  ;;  %v709_v4 = vmul.f32 0.001, %v99_v59 }
  0x55   :  { %1295 = vst [vmem:[#allocation9 + $0x240] sm:$0xff] %v967_v57  ;;  %1584 = vmatprep.subr.bf16.mxu0 %v1468_v58  ;;  %v164_v5 = vld [vmem:[#allocation3 + $0x238] sm:$0xff]  ;;  %v161_v6 = vld [vmem:[#allocation3 + $0x220] sm:$0xff]  ;;  %1297 = vst [vmem:[#allocation9 + $0x250] sm:$0xff] %v969_v61 }
  0x56   :  { %v899_v7 = vadd.f32 %v707_v0, %v515_v63  ;;  %1585 = vmatpush1.bf16.msra.mxu0 %v1467_v1  ;;  %v1500_v8 = vpack.c.bf16 %v164_v5, %v162_v2  ;;  %v163_v9 = vld [vmem:[#allocation3 + $0x230] sm:$0xff]  ;;  %v387_v10 = vld [vmem:[#allocation6 + $0x220] sm:$0xff]  ;;  %v901_v11 = vadd.f32 %v709_v4, %v517_v3  ;;  %v771_v14 = vmul.f32 0.001, %v161_v6  ;;  %v94_v16 = vld [vmem:[#allocation3 + $0x8] sm:$0xff] }
  0x57   :  { %v389_v12 = vld [vmem:[#allocation6 + $0x230] sm:$0xff]  ;;  %v579_v13 = vmul.f32 0.999, %v387_v10  ;;  %v1499_v15 = vpack.c.bf16 %v163_v9, %v161_v6  ;;  %v773_v18 = vmul.f32 0.001, %v163_v9  ;;  %v96_v19 = vld [vmem:[#allocation3 + $0x18] sm:$0xff] }
  0x58   :  { %1227 = vst [vmem:[#allocation9 + $0x20] sm:$0xff] %v899_v7  ;;  %1625 = vmatprep.subr.bf16.mxu1 %v1500_v8  ;;  %v581_v17 = vmul.f32 0.999, %v389_v12  ;;  %v93_v20 = vld [vmem:[#allocation3] sm:$0xff]  ;;  %1229 = vst [vmem:[#allocation9 + $0x30] sm:$0xff] %v901_v11  ;;  %v1466_v22 = vpack.c.bf16 %v96_v19, %v94_v16  ;;  %v95_v23 = vld [vmem:[#allocation3 + $0x10] sm:$0xff] }
  0x59   :  { %v963_v21 = vadd.f32 %v771_v14, %v579_v13  ;;  %1626 = vmatpush1.bf16.msra.mxu1 %v1499_v15  ;;  %v319_v24 = vld [vmem:[#allocation6] sm:$0xff]  ;;  %v321_v26 = vld [vmem:[#allocation6 + $0x10] sm:$0xff]  ;;  %v703_v28 = vmul.f32 0.001, %v93_v20  ;;  %v1465_v29 = vpack.c.bf16 %v95_v23, %v93_v20  ;;  %v158_v30 = vld [vmem:[#allocation3 + $0x208] sm:$0xff] }
  0x5a   :  { %v965_v25 = vadd.f32 %v773_v18, %v581_v17  ;;  %v511_v27 = vmul.f32 0.999, %v319_v24  ;;  %1586 = vmatprep.subr.bf16.mxu0 %v1466_v22  ;;  %v513_v31 = vmul.f32 0.999, %v321_v26  ;;  %v705_v32 = vmul.f32 0.001, %v95_v23 }
  0x5b   :  { %1291 = vst [vmem:[#allocation9 + $0x220] sm:$0xff] %v963_v21  ;;  %v160_v33 = vld [vmem:[#allocation3 + $0x218] sm:$0xff]  ;;  %v157_v34 = vld [vmem:[#allocation3 + $0x200] sm:$0xff]  ;;  %1587 = vmatpush1.bf16.msra.mxu0 %v1465_v29  ;;  %v159_v37 = vld [vmem:[#allocation3 + $0x210] sm:$0xff] }
  0x5c   :  { %1293 = vst [vmem:[#allocation9 + $0x230] sm:$0xff] %v965_v25  ;;  %v895_v35 = vadd.f32 %v703_v28, %v511_v27  ;;  %v1498_v36 = vpack.c.bf16 %v160_v33, %v158_v30  ;;  %v383_v38 = vld [vmem:[#allocation6 + $0x200] sm:$0xff]  ;;  %v897_v39 = vadd.f32 %v705_v32, %v513_v31  ;;  %v385_v40 = vld [vmem:[#allocation6 + $0x210] sm:$0xff]  ;;  %v767_v42 = vmul.f32 0.001, %v157_v34  ;;  %v154_v44 = vld [vmem:[#allocation3 + $0x1e8] sm:$0xff] }
  0x5d   :  { %v575_v41 = vmul.f32 0.999, %v383_v38  ;;  %v1497_v43 = vpack.c.bf16 %v159_v37, %v157_v34  ;;  %v577_v45 = vmul.f32 0.999, %v385_v40  ;;  %v769_v46 = vmul.f32 0.001, %v159_v37 }
  0x5e   :  { %1223 = vst [vmem:[#allocation9] sm:$0xff] %v895_v35  ;;  %1627 = vmatprep.subr.bf16.mxu1 %v1498_v36  ;;  %v156_v47 = vld [vmem:[#allocation3 + $0x1f8] sm:$0xff]  ;;  %v153_v48 = vld [vmem:[#allocation3 + $0x1e0] sm:$0xff]  ;;  %1225 = vst [vmem:[#allocation9 + $0x10] sm:$0xff] %v897_v39 }
  0x5f   :  { %v959_v49 = vadd.f32 %v767_v42, %v575_v41  ;;  %1628 = vmatpush1.bf16.msra.mxu1 %v1497_v43  ;;  %v1496_v50 = vpack.c.bf16 %v156_v47, %v154_v44  ;;  %v155_v51 = vld [vmem:[#allocation3 + $0x1f0] sm:$0xff]  ;;  %v379_v52 = vld [vmem:[#allocation6 + $0x1e0] sm:$0xff]  ;;  %v961_v53 = vadd.f32 %v769_v46, %v577_v45  ;;  %v763_v56 = vmul.f32 0.001, %v153_v48  ;;  %v218_v58 = vld [vmem:[#allocation3 + $0x3e8] sm:$0xff] }
  0x60   :  { %v381_v54 = vld [vmem:[#allocation6 + $0x1f0] sm:$0xff]  ;;  %v571_v55 = vmul.f32 0.999, %v379_v52  ;;  %v1495_v57 = vpack.c.bf16 %v155_v51, %v153_v48  ;;  %v765_v60 = vmul.f32 0.001, %v155_v51  ;;  %v220_v61 = vld [vmem:[#allocation3 + $0x3f8] sm:$0xff] }
  0x61   :  { %1287 = vst [vmem:[#allocation9 + $0x200] sm:$0xff] %v959_v49  ;;  %1588 = vmatprep.subr.bf16.mxu0 %v1496_v50  ;;  %v573_v59 = vmul.f32 0.999, %v381_v54  ;;  %v217_v62 = vld [vmem:[#allocation3 + $0x3e0] sm:$0xff]  ;;  %1289 = vst [vmem:[#allocation9 + $0x210] sm:$0xff] %v961_v53  ;;  %v1528_v0 = vpack.c.bf16 %v220_v61, %v218_v58  ;;  %v219_v1 = vld [vmem:[#allocation3 + $0x3f0] sm:$0xff] }
  0x62   :  { %v955_v63 = vadd.f32 %v763_v56, %v571_v55  ;;  %1589 = vmatpush2.bf16.msra.mxu0 %v1495_v57  ;;  %v443_v2 = vld [vmem:[#allocation6 + $0x3e0] sm:$0xff]  ;;  %v445_v4 = vld [vmem:[#allocation6 + $0x3f0] sm:$0xff]  ;;  %v827_v6 = vmul.f32 0.001, %v217_v62  ;;  %v1527_v7 = vpack.c.bf16 %v219_v1, %v217_v62  ;;  %v150_v8 = vld [vmem:[#allocation3 + $0x1c8] sm:$0xff] }
  0x63   :  { %v957_v3 = vadd.f32 %v765_v60, %v573_v59  ;;  %v635_v5 = vmul.f32 0.999, %v443_v2  ;;  %1629 = vmatprep.subr.bf16.mxu1 %v1528_v0  ;;  %v637_v9 = vmul.f32 0.999, %v445_v4  ;;  %v829_v10 = vmul.f32 0.001, %v219_v1 }
  0x64   :  { %1283 = vst [vmem:[#allocation9 + $0x1e0] sm:$0xff] %v955_v63  ;;  %v152_v11 = vld [vmem:[#allocation3 + $0x1d8] sm:$0xff]  ;;  %v149_v12 = vld [vmem:[#allocation3 + $0x1c0] sm:$0xff]  ;;  %1630 = vmatpush2.bf16.msra.mxu1 %v1527_v7  ;;  %v151_v15 = vld [vmem:[#allocation3 + $0x1d0] sm:$0xff] }
  0x65   :  { %1285 = vst [vmem:[#allocation9 + $0x1f0] sm:$0xff] %v957_v3  ;;  %v1019_v13 = vadd.f32 %v827_v6, %v635_v5  ;;  %v1494_v14 = vpack.c.bf16 %v152_v11, %v150_v8  ;;  %v375_v16 = vld [vmem:[#allocation6 + $0x1c0] sm:$0xff]  ;;  %v1021_v17 = vadd.f32 %v829_v10, %v637_v9  ;;  %v377_v18 = vld [vmem:[#allocation6 + $0x1d0] sm:$0xff]  ;;  %v759_v20 = vmul.f32 0.001, %v149_v12  ;;  %v214_v22 = vld [vmem:[#allocation3 + $0x3c8] sm:$0xff] }
  0x66   :  { %v567_v19 = vmul.f32 0.999, %v375_v16  ;;  %v1493_v21 = vpack.c.bf16 %v151_v15, %v149_v12  ;;  %v569_v23 = vmul.f32 0.999, %v377_v18  ;;  %v761_v24 = vmul.f32 0.001, %v151_v15 }
  0x67   :  { %1347 = vst [vmem:[#allocation9 + $0x3e0] sm:$0xff] %v1019_v13  ;;  %1590 = vmatprep.subr.bf16.mxu0 %v1494_v14  ;;  %v216_v25 = vld [vmem:[#allocation3 + $0x3d8] sm:$0xff]  ;;  %v213_v26 = vld [vmem:[#allocation3 + $0x3c0] sm:$0xff]  ;;  %1349 = vst [vmem:[#allocation9 + $0x3f0] sm:$0xff] %v1021_v17 }
  0x68   :  { %v951_v27 = vadd.f32 %v759_v20, %v567_v19  ;;  %1591 = vmatpush2.bf16.msra.mxu0 %v1493_v21  ;;  %v1526_v28 = vpack.c.bf16 %v216_v25, %v214_v22  ;;  %v215_v29 = vld [vmem:[#allocation3 + $0x3d0] sm:$0xff]  ;;  %v439_v30 = vld [vmem:[#allocation6 + $0x3c0] sm:$0xff]  ;;  %v953_v31 = vadd.f32 %v761_v24, %v569_v23  ;;  %v823_v34 = vmul.f32 0.001, %v213_v26  ;;  %v146_v36 = vld [vmem:[#allocation3 + $0x1a8] sm:$0xff] }
  0x69   :  { %v441_v32 = vld [vmem:[#allocation6 + $0x3d0] sm:$0xff]  ;;  %v631_v33 = vmul.f32 0.999, %v439_v30  ;;  %v1525_v35 = vpack.c.bf16 %v215_v29, %v213_v26  ;;  %v825_v38 = vmul.f32 0.001, %v215_v29  ;;  %v148_v39 = vld [vmem:[#allocation3 + $0x1b8] sm:$0xff] }
  0x6a   :  { %1279 = vst [vmem:[#allocation9 + $0x1c0] sm:$0xff] %v951_v27  ;;  %1631 = vmatprep.subr.bf16.mxu1 %v1526_v28  ;;  %v633_v37 = vmul.f32 0.999, %v441_v32  ;;  %v145_v40 = vld [vmem:[#allocation3 + $0x1a0] sm:$0xff]  ;;  %1281 = vst [vmem:[#allocation9 + $0x1d0] sm:$0xff] %v953_v31  ;;  %v1492_v42 = vpack.c.bf16 %v148_v39, %v146_v36  ;;  %v147_v43 = vld [vmem:[#allocation3 + $0x1b0] sm:$0xff] }
  0x6b   :  { %v1015_v41 = vadd.f32 %v823_v34, %v631_v33  ;;  %1632 = vmatpush2.bf16.msra.mxu1 %v1525_v35  ;;  %v371_v44 = vld [vmem:[#allocation6 + $0x1a0] sm:$0xff]  ;;  %v373_v46 = vld [vmem:[#allocation6 + $0x1b0] sm:$0xff]  ;;  %v755_v48 = vmul.f32 0.001, %v145_v40  ;;  %v1491_v49 = vpack.c.bf16 %v147_v43, %v145_v40  ;;  %v210_v50 = vld [vmem:[#allocation3 + $0x3a8] sm:$0xff] }
  0x6c   :  { %v1017_v45 = vadd.f32 %v825_v38, %v633_v37  ;;  %v563_v47 = vmul.f32 0.999, %v371_v44  ;;  %1592 = vmatprep.subr.bf16.mxu0 %v1492_v42  ;;  %v565_v51 = vmul.f32 0.999, %v373_v46  ;;  %v757_v52 = vmul.f32 0.001, %v147_v43 }
  0x6d   :  { %1343 = vst [vmem:[#allocation9 + $0x3c0] sm:$0xff] %v1015_v41  ;;  %v212_v53 = vld [vmem:[#allocation3 + $0x3b8] sm:$0xff]  ;;  %v209_v54 = vld [vmem:[#allocation3 + $0x3a0] sm:$0xff]  ;;  %1593 = vmatpush2.bf16.msra.mxu0 %v1491_v49  ;;  %v211_v57 = vld [vmem:[#allocation3 + $0x3b0] sm:$0xff] }
  0x6e   :  { %1345 = vst [vmem:[#allocation9 + $0x3d0] sm:$0xff] %v1017_v45  ;;  %v947_v55 = vadd.f32 %v755_v48, %v563_v47  ;;  %v1524_v56 = vpack.c.bf16 %v212_v53, %v210_v50  ;;  %v435_v58 = vld [vmem:[#allocation6 + $0x3a0] sm:$0xff]  ;;  %v949_v59 = vadd.f32 %v757_v52, %v565_v51  ;;  %v437_v60 = vld [vmem:[#allocation6 + $0x3b0] sm:$0xff]  ;;  %v819_v62 = vmul.f32 0.001, %v209_v54  ;;  %v142_v0 = vld [vmem:[#allocation3 + $0x188] sm:$0xff] }
  0x6f   :  { %v627_v61 = vmul.f32 0.999, %v435_v58  ;;  %v1523_v63 = vpack.c.bf16 %v211_v57, %v209_v54  ;;  %v629_v1 = vmul.f32 0.999, %v437_v60  ;;  %v821_v2 = vmul.f32 0.001, %v211_v57 }
  0x70   :  { %1275 = vst [vmem:[#allocation9 + $0x1a0] sm:$0xff] %v947_v55  ;;  %1633 = vmatprep.subr.bf16.mxu1 %v1524_v56  ;;  %v144_v3 = vld [vmem:[#allocation3 + $0x198] sm:$0xff]  ;;  %v141_v4 = vld [vmem:[#allocation3 + $0x180] sm:$0xff]  ;;  %1277 = vst [vmem:[#allocation9 + $0x1b0] sm:$0xff] %v949_v59 }
  0x71   :  { %v1011_v5 = vadd.f32 %v819_v62, %v627_v61  ;;  %1634 = vmatpush2.bf16.msra.mxu1 %v1523_v63  ;;  %v1490_v6 = vpack.c.bf16 %v144_v3, %v142_v0  ;;  %v143_v7 = vld [vmem:[#allocation3 + $0x190] sm:$0xff]  ;;  %v367_v8 = vld [vmem:[#allocation6 + $0x180] sm:$0xff]  ;;  %v1013_v9 = vadd.f32 %v821_v2, %v629_v1  ;;  %v751_v12 = vmul.f32 0.001, %v141_v4  ;;  %v206_v14 = vld [vmem:[#allocation3 + $0x388] sm:$0xff] }
  0x72   :  { %v369_v10 = vld [vmem:[#allocation6 + $0x190] sm:$0xff]  ;;  %v559_v11 = vmul.f32 0.999, %v367_v8  ;;  %v1489_v13 = vpack.c.bf16 %v143_v7, %v141_v4  ;;  %v753_v16 = vmul.f32 0.001, %v143_v7  ;;  %v208_v17 = vld [vmem:[#allocation3 + $0x398] sm:$0xff] }
  0x73   :  { %1339 = vst [vmem:[#allocation9 + $0x3a0] sm:$0xff] %v1011_v5  ;;  %1594 = vmatprep.subr.bf16.mxu0 %v1490_v6  ;;  %v561_v15 = vmul.f32 0.999, %v369_v10  ;;  %v205_v18 = vld [vmem:[#allocation3 + $0x380] sm:$0xff]  ;;  %1341 = vst [vmem:[#allocation9 + $0x3b0] sm:$0xff] %v1013_v9  ;;  %v1522_v20 = vpack.c.bf16 %v208_v17, %v206_v14  ;;  %v207_v21 = vld [vmem:[#allocation3 + $0x390] sm:$0xff] }
  0x74   :  { %v943_v19 = vadd.f32 %v751_v12, %v559_v11  ;;  %1595 = vmatpush2.bf16.msra.mxu0 %v1489_v13  ;;  %v431_v22 = vld [vmem:[#allocation6 + $0x380] sm:$0xff]  ;;  %v433_v24 = vld [vmem:[#allocation6 + $0x390] sm:$0xff]  ;;  %v815_v26 = vmul.f32 0.001, %v205_v18  ;;  %v1521_v27 = vpack.c.bf16 %v207_v21, %v205_v18  ;;  %v138_v28 = vld [vmem:[#allocation3 + $0x168] sm:$0xff] }
  0x75   :  { %v945_v23 = vadd.f32 %v753_v16, %v561_v15  ;;  %v623_v25 = vmul.f32 0.999, %v431_v22  ;;  %1635 = vmatprep.subr.bf16.mxu1 %v1522_v20  ;;  %v625_v29 = vmul.f32 0.999, %v433_v24  ;;  %v817_v30 = vmul.f32 0.001, %v207_v21 }
  0x76   :  { %1271 = vst [vmem:[#allocation9 + $0x180] sm:$0xff] %v943_v19  ;;  %v140_v31 = vld [vmem:[#allocation3 + $0x178] sm:$0xff]  ;;  %v137_v32 = vld [vmem:[#allocation3 + $0x160] sm:$0xff]  ;;  %1636 = vmatpush2.bf16.msra.mxu1 %v1521_v27  ;;  %v139_v35 = vld [vmem:[#allocation3 + $0x170] sm:$0xff] }
  0x77   :  { %1273 = vst [vmem:[#allocation9 + $0x190] sm:$0xff] %v945_v23  ;;  %v1007_v33 = vadd.f32 %v815_v26, %v623_v25  ;;  %v1488_v34 = vpack.c.bf16 %v140_v31, %v138_v28  ;;  %v363_v36 = vld [vmem:[#allocation6 + $0x160] sm:$0xff]  ;;  %v1009_v37 = vadd.f32 %v817_v30, %v625_v29  ;;  %v365_v38 = vld [vmem:[#allocation6 + $0x170] sm:$0xff]  ;;  %v747_v40 = vmul.f32 0.001, %v137_v32  ;;  %v202_v42 = vld [vmem:[#allocation3 + $0x368] sm:$0xff] }
  0x78   :  { %v555_v39 = vmul.f32 0.999, %v363_v36  ;;  %v1487_v41 = vpack.c.bf16 %v139_v35, %v137_v32  ;;  %v557_v43 = vmul.f32 0.999, %v365_v38  ;;  %v749_v44 = vmul.f32 0.001, %v139_v35 }
  0x79   :  { %1335 = vst [vmem:[#allocation9 + $0x380] sm:$0xff] %v1007_v33  ;;  %1596 = vmatprep.subr.bf16.mxu0 %v1488_v34  ;;  %v204_v45 = vld [vmem:[#allocation3 + $0x378] sm:$0xff]  ;;  %v201_v46 = vld [vmem:[#allocation3 + $0x360] sm:$0xff]  ;;  %1337 = vst [vmem:[#allocation9 + $0x390] sm:$0xff] %v1009_v37 }
  0x7a   :  { %v939_v47 = vadd.f32 %v747_v40, %v555_v39  ;;  %1597 = vmatpush2.bf16.msra.mxu0 %v1487_v41  ;;  %v1520_v48 = vpack.c.bf16 %v204_v45, %v202_v42  ;;  %v203_v49 = vld [vmem:[#allocation3 + $0x370] sm:$0xff]  ;;  %v427_v50 = vld [vmem:[#allocation6 + $0x360] sm:$0xff]  ;;  %v941_v51 = vadd.f32 %v749_v44, %v557_v43  ;;  %v811_v54 = vmul.f32 0.001, %v201_v46  ;;  %v134_v56 = vld [vmem:[#allocation3 + $0x148] sm:$0xff] }
  0x7b   :  { %v429_v52 = vld [vmem:[#allocation6 + $0x370] sm:$0xff]  ;;  %v619_v53 = vmul.f32 0.999, %v427_v50  ;;  %v1519_v55 = vpack.c.bf16 %v203_v49, %v201_v46  ;;  %v813_v58 = vmul.f32 0.001, %v203_v49  ;;  %v136_v59 = vld [vmem:[#allocation3 + $0x158] sm:$0xff] }
  0x7c   :  { %1267 = vst [vmem:[#allocation9 + $0x160] sm:$0xff] %v939_v47  ;;  %1637 = vmatprep.subr.bf16.mxu1 %v1520_v48  ;;  %v621_v57 = vmul.f32 0.999, %v429_v52  ;;  %v133_v60 = vld [vmem:[#allocation3 + $0x140] sm:$0xff]  ;;  %1269 = vst [vmem:[#allocation9 + $0x170] sm:$0xff] %v941_v51  ;;  %v1486_v62 = vpack.c.bf16 %v136_v59, %v134_v56  ;;  %v135_v63 = vld [vmem:[#allocation3 + $0x150] sm:$0xff] }
  0x7d   :  { %v1003_v61 = vadd.f32 %v811_v54, %v619_v53  ;;  %1638 = vmatpush2.bf16.msra.mxu1 %v1519_v55  ;;  %v359_v0 = vld [vmem:[#allocation6 + $0x140] sm:$0xff]  ;;  %v361_v2 = vld [vmem:[#allocation6 + $0x150] sm:$0xff]  ;;  %v743_v4 = vmul.f32 0.001, %v133_v60  ;;  %v1485_v5 = vpack.c.bf16 %v135_v63, %v133_v60  ;;  %v198_v6 = vld [vmem:[#allocation3 + $0x348] sm:$0xff] }
  0x7e   :  { %v1005_v1 = vadd.f32 %v813_v58, %v621_v57  ;;  %v551_v3 = vmul.f32 0.999, %v359_v0  ;;  %1598 = vmatprep.subr.bf16.mxu0 %v1486_v62  ;;  %v553_v7 = vmul.f32 0.999, %v361_v2  ;;  %v745_v8 = vmul.f32 0.001, %v135_v63 }
  0x7f   :  { %1331 = vst [vmem:[#allocation9 + $0x360] sm:$0xff] %v1003_v61  ;;  %v200_v9 = vld [vmem:[#allocation3 + $0x358] sm:$0xff]  ;;  %v197_v10 = vld [vmem:[#allocation3 + $0x340] sm:$0xff]  ;;  %1599 = vmatpush2.bf16.msra.mxu0 %v1485_v5  ;;  %v199_v13 = vld [vmem:[#allocation3 + $0x350] sm:$0xff] }
  0x80   :  { %1333 = vst [vmem:[#allocation9 + $0x370] sm:$0xff] %v1005_v1  ;;  %v935_v11 = vadd.f32 %v743_v4, %v551_v3  ;;  %v1518_v12 = vpack.c.bf16 %v200_v9, %v198_v6  ;;  %v423_v14 = vld [vmem:[#allocation6 + $0x340] sm:$0xff]  ;;  %v937_v15 = vadd.f32 %v745_v8, %v553_v7  ;;  %v425_v16 = vld [vmem:[#allocation6 + $0x350] sm:$0xff]  ;;  %v807_v18 = vmul.f32 0.001, %v197_v10  ;;  %v130_v20 = vld [vmem:[#allocation3 + $0x128] sm:$0xff] }
  0x81   :  { %v615_v17 = vmul.f32 0.999, %v423_v14  ;;  %v1517_v19 = vpack.c.bf16 %v199_v13, %v197_v10  ;;  %v617_v21 = vmul.f32 0.999, %v425_v16  ;;  %v809_v22 = vmul.f32 0.001, %v199_v13 }
  0x82   :  { %1263 = vst [vmem:[#allocation9 + $0x140] sm:$0xff] %v935_v11  ;;  %1639 = vmatprep.subr.bf16.mxu1 %v1518_v12  ;;  %v132_v23 = vld [vmem:[#allocation3 + $0x138] sm:$0xff]  ;;  %v129_v24 = vld [vmem:[#allocation3 + $0x120] sm:$0xff]  ;;  %1265 = vst [vmem:[#allocation9 + $0x150] sm:$0xff] %v937_v15 }
  0x83   :  { %v999_v25 = vadd.f32 %v807_v18, %v615_v17  ;;  %1640 = vmatpush2.bf16.msra.mxu1 %v1517_v19  ;;  %v1484_v26 = vpack.c.bf16 %v132_v23, %v130_v20  ;;  %v131_v27 = vld [vmem:[#allocation3 + $0x130] sm:$0xff]  ;;  %v355_v28 = vld [vmem:[#allocation6 + $0x120] sm:$0xff]  ;;  %v1001_v29 = vadd.f32 %v809_v22, %v617_v21  ;;  %v739_v32 = vmul.f32 0.001, %v129_v24  ;;  %v194_v34 = vld [vmem:[#allocation3 + $0x328] sm:$0xff] }
  0x84   :  { %v357_v30 = vld [vmem:[#allocation6 + $0x130] sm:$0xff]  ;;  %v547_v31 = vmul.f32 0.999, %v355_v28  ;;  %v1483_v33 = vpack.c.bf16 %v131_v27, %v129_v24  ;;  %v741_v36 = vmul.f32 0.001, %v131_v27  ;;  %v196_v37 = vld [vmem:[#allocation3 + $0x338] sm:$0xff] }
  0x85   :  { %1327 = vst [vmem:[#allocation9 + $0x340] sm:$0xff] %v999_v25  ;;  %1600 = vmatprep.subr.bf16.mxu0 %v1484_v26  ;;  %v549_v35 = vmul.f32 0.999, %v357_v30  ;;  %v193_v38 = vld [vmem:[#allocation3 + $0x320] sm:$0xff]  ;;  %1329 = vst [vmem:[#allocation9 + $0x350] sm:$0xff] %v1001_v29  ;;  %v1516_v40 = vpack.c.bf16 %v196_v37, %v194_v34  ;;  %v195_v41 = vld [vmem:[#allocation3 + $0x330] sm:$0xff] }
  0x86   :  { %v931_v39 = vadd.f32 %v739_v32, %v547_v31  ;;  %1601 = vmatpush2.bf16.msra.mxu0 %v1483_v33  ;;  %v419_v42 = vld [vmem:[#allocation6 + $0x320] sm:$0xff]  ;;  %v421_v44 = vld [vmem:[#allocation6 + $0x330] sm:$0xff]  ;;  %v803_v46 = vmul.f32 0.001, %v193_v38  ;;  %v1515_v47 = vpack.c.bf16 %v195_v41, %v193_v38  ;;  %v126_v48 = vld [vmem:[#allocation3 + $0x108] sm:$0xff] }
  0x87   :  { %v933_v43 = vadd.f32 %v741_v36, %v549_v35  ;;  %v611_v45 = vmul.f32 0.999, %v419_v42  ;;  %1641 = vmatprep.subr.bf16.mxu1 %v1516_v40  ;;  %v613_v49 = vmul.f32 0.999, %v421_v44  ;;  %v805_v50 = vmul.f32 0.001, %v195_v41 }
  0x88   :  { %1259 = vst [vmem:[#allocation9 + $0x120] sm:$0xff] %v931_v39  ;;  %v128_v51 = vld [vmem:[#allocation3 + $0x118] sm:$0xff]  ;;  %v125_v52 = vld [vmem:[#allocation3 + $0x100] sm:$0xff]  ;;  %1642 = vmatpush2.bf16.msra.mxu1 %v1515_v47  ;;  %v127_v55 = vld [vmem:[#allocation3 + $0x110] sm:$0xff] }
  0x89   :  { %1261 = vst [vmem:[#allocation9 + $0x130] sm:$0xff] %v933_v43  ;;  %v995_v53 = vadd.f32 %v803_v46, %v611_v45  ;;  %v1482_v54 = vpack.c.bf16 %v128_v51, %v126_v48  ;;  %v351_v56 = vld [vmem:[#allocation6 + $0x100] sm:$0xff]  ;;  %v997_v57 = vadd.f32 %v805_v50, %v613_v49  ;;  %v353_v58 = vld [vmem:[#allocation6 + $0x110] sm:$0xff]  ;;  %v735_v60 = vmul.f32 0.001, %v125_v52  ;;  %v190_v62 = vld [vmem:[#allocation3 + $0x308] sm:$0xff] }
  0x8a   :  { %v543_v59 = vmul.f32 0.999, %v351_v56  ;;  %v1481_v61 = vpack.c.bf16 %v127_v55, %v125_v52  ;;  %v545_v63 = vmul.f32 0.999, %v353_v58  ;;  %v737_v0 = vmul.f32 0.001, %v127_v55 }
  0x8b   :  { %1323 = vst [vmem:[#allocation9 + $0x320] sm:$0xff] %v995_v53  ;;  %1602 = vmatprep.subr.bf16.mxu0 %v1482_v54  ;;  %v192_v1 = vld [vmem:[#allocation3 + $0x318] sm:$0xff]  ;;  %v1454_v2 = vld [vmem:[%s4562_s30 + $0x8] sm:$0xff]  ;;  %1325 = vst [vmem:[#allocation9 + $0x330] sm:$0xff] %v997_v57 }
  0x8c   :  { %v927_v3 = vadd.f32 %v735_v60, %v543_v59  ;;  %1603 = vmatpush2.bf16.msra.mxu0 %v1481_v61  ;;  %v1514_v4 = vpack.c.bf16 %v192_v1, %v190_v62  ;;  %v189_v5 = vld [vmem:[#allocation3 + $0x300] sm:$0xff]  ;;  %v191_v6 = vld [vmem:[#allocation3 + $0x310] sm:$0xff]  ;;  %v929_v7 = vadd.f32 %v737_v0, %v545_v63  ;;  %v1460_v8 = vpack.c.bf16 %v1454_v2, %v1454_v2  ;;  %v250_v17 = vld [vmem:[#allocation3 + $0x4e8] sm:$0xff] }
  0x8d   :  { %v415_v9 = vld [vmem:[#allocation6 + $0x300] sm:$0xff]  ;;  %v417_v10 = vld [vmem:[#allocation6 + $0x310] sm:$0xff]  ;;  %v799_v11 = vmul.f32 0.001, %v189_v5  ;;  %v801_v12 = vmul.f32 0.001, %v191_v6  ;;  %v1513_v15 = vpack.c.bf16 %v191_v6, %v189_v5 }
  0x8e   :  { %1255 = vst [vmem:[#allocation9 + $0x100] sm:$0xff] %v927_v3  ;;  %1643 = vmatprep.subr.bf16.mxu1 %v1514_v4  ;;  %v607_v13 = vmul.f32 0.999, %v415_v9  ;;  %v609_v14 = vmul.f32 0.999, %v417_v10  ;;  %v1453_v16 = vld [vmem:[%s4562_s30] sm:$0xff]  ;;  %1604 = vmatprep.mubr.bf16.mxu0 %v1460_v8 }
  0x8f   :  { %1257 = vst [vmem:[#allocation9 + $0x110] sm:$0xff] %v929_v7  ;;  %v1459_v18 = vpack.c.bf16 %v1453_v16, %v1453_v16  ;;  %v252_v19 = vld [vmem:[#allocation3 + $0x4f8] sm:$0xff]  ;;  %v249_v21 = vld [vmem:[#allocation3 + $0x4e0] sm:$0xff]  ;;  %1644 = vmatpush2.bf16.msra.mxu1 %v1513_v15  ;;  %v251_v25 = vld [vmem:[#allocation3 + $0x4f0] sm:$0xff] }
  0x90   :  { %v1456_v20 = vld [vmem:[%s4562_s30 + $0x18] sm:$0xff]  ;;  %v991_v22 = vadd.f32 %v799_v11, %v607_v13  ;;  %v993_v23 = vadd.f32 %v801_v12, %v609_v14  ;;  %v1544_v24 = vpack.c.bf16 %v252_v19, %v250_v17  ;;  %v1455_v26 = vld [vmem:[%s4562_s30 + $0x10] sm:$0xff]  ;;  %v246_v27 = vld [vmem:[#allocation3 + $0x4c8] sm:$0xff]  ;;  %v1543_v29 = vpack.c.bf16 %v251_v25, %v249_v21 }
  0x91   :  { %1605 = vmatmul.mubr.bf16.vlgmr.msra.gmra.mxu0 %v1459_v18  ;;  %v1462_v28 = vpack.c.bf16 %v1456_v20, %v1456_v20  ;;  %v248_v30 = vld [vmem:[#allocation3 + $0x4d8] sm:$0xff]  ;;  %v245_v31 = vld [vmem:[#allocation3 + $0x4c0] sm:$0xff]  ;;  %v1461_v32 = vpack.c.bf16 %v1455_v26, %v1455_v26  ;;  %v247_v34 = vld [vmem:[#allocation3 + $0x4d0] sm:$0xff] }
  0x92   :  { %1319 = vst [vmem:[#allocation9 + $0x300] sm:$0xff] %v991_v22  ;;  %1321 = vst [vmem:[#allocation9 + $0x310] sm:$0xff] %v993_v23  ;;  %1654 = vmatprep.subr.bf16.mxu0 %v1544_v24  ;;  %v1542_v33 = vpack.c.bf16 %v248_v30, %v246_v27  ;;  %v242_v35 = vld [vmem:[#allocation3 + $0x4a8] sm:$0xff]  ;;  %v1541_v36 = vpack.c.bf16 %v247_v34, %v245_v31  ;;  %v244_v37 = vld [vmem:[#allocation3 + $0x4b8] sm:$0xff] }
  0x93   :  { %1645 = vmatprep.mubr.bf16.mxu1 %v1462_v28  ;;  %1655 = vmatpush1.bf16.msra.mxu0 %v1543_v29  ;;  %v1540_v38 = vpack.c.bf16 %v244_v37, %v242_v35  ;;  %v241_v39 = vld [vmem:[#allocation3 + $0x4a0] sm:$0xff]  ;;  %v243_v40 = vld [vmem:[#allocation3 + $0x4b0] sm:$0xff]  ;;  %v238_v41 = vld [vmem:[#allocation3 + $0x488] sm:$0xff] }
  0x94   :  { %1646 = vmatmul.mubr.bf16.vlgmr.msra.gmra.mxu1 %v1461_v32  ;;  %1656 = vmatprep.subr.bf16.mxu0 %v1542_v33  ;;  %v240_v42 = vld [vmem:[#allocation3 + $0x498] sm:$0xff]  ;;  %v1539_v43 = vpack.c.bf16 %v243_v40, %v241_v39  ;;  %v237_v45 = vld [vmem:[#allocation3 + $0x480] sm:$0xff]  ;;  %v239_v46 = vld [vmem:[#allocation3 + $0x490] sm:$0xff] }
  0x95   :  { %v1538_v44 = vpack.c.bf16 %v240_v42, %v238_v41  ;;  %v234_v47 = vld [vmem:[#allocation3 + $0x468] sm:$0xff]  ;;  %v236_v48 = vld [vmem:[#allocation3 + $0x478] sm:$0xff]  ;;  %v1537_v49 = vpack.c.bf16 %v239_v46, %v237_v45  ;;  %v233_v51 = vld [vmem:[#allocation3 + $0x460] sm:$0xff] }
  0x96   :  { %v1536_v50 = vpack.c.bf16 %v236_v48, %v234_v47  ;;  %v235_v52 = vld [vmem:[#allocation3 + $0x470] sm:$0xff]  ;;  %v230_v53 = vld [vmem:[#allocation3 + $0x448] sm:$0xff]  ;;  %v232_v54 = vld [vmem:[#allocation3 + $0x458] sm:$0xff] }
  0x97   :  { %1657 = vmatpush1.bf16.msra.mxu0 %v1541_v36  ;;  %v1535_v55 = vpack.c.bf16 %v235_v52, %v233_v51  ;;  %v1534_v56 = vpack.c.bf16 %v232_v54, %v230_v53  ;;  %v229_v57 = vld [vmem:[#allocation3 + $0x440] sm:$0xff]  ;;  %v231_v58 = vld [vmem:[#allocation3 + $0x450] sm:$0xff]  ;;  %v226_v59 = vld [vmem:[#allocation3 + $0x428] sm:$0xff] }
  0x98   :  { %1658 = vmatprep.subr.bf16.mxu0 %v1540_v38  ;;  %v228_v60 = vld [vmem:[#allocation3 + $0x438] sm:$0xff]  ;;  %v1533_v61 = vpack.c.bf16 %v231_v58, %v229_v57  ;;  %v225_v63 = vld [vmem:[#allocation3 + $0x420] sm:$0xff]  ;;  %v227_v0 = vld [vmem:[#allocation3 + $0x430] sm:$0xff] }
  0x99   :  { %v1532_v62 = vpack.c.bf16 %v228_v60, %v226_v59  ;;  %v222_v1 = vld [vmem:[#allocation3 + $0x408] sm:$0xff]  ;;  %v224_v2 = vld [vmem:[#allocation3 + $0x418] sm:$0xff]  ;;  %v1531_v3 = vpack.c.bf16 %v227_v0, %v225_v63  ;;  %v221_v5 = vld [vmem:[#allocation3 + $0x400] sm:$0xff] }
  0x9a   :  { %v1530_v4 = vpack.c.bf16 %v224_v2, %v222_v1  ;;  %v223_v6 = vld [vmem:[#allocation3 + $0x410] sm:$0xff]  ;;  %v282_v7 = vld [vmem:[#allocation3 + $0x5e8] sm:$0xff]  ;;  %v284_v8 = vld [vmem:[#allocation3 + $0x5f8] sm:$0xff] }
  0x9b   :  { %1659 = vmatpush1.bf16.msra.mxu0 %v1539_v43  ;;  %v1529_v9 = vpack.c.bf16 %v223_v6, %v221_v5  ;;  %v1560_v10 = vpack.c.bf16 %v284_v8, %v282_v7  ;;  %v281_v11 = vld [vmem:[#allocation3 + $0x5e0] sm:$0xff]  ;;  %v283_v12 = vld [vmem:[#allocation3 + $0x5f0] sm:$0xff]  ;;  %v278_v13 = vld [vmem:[#allocation3 + $0x5c8] sm:$0xff] }
  0x9c   :  { %1660 = vmatprep.subr.bf16.mxu0 %v1538_v44  ;;  %v280_v14 = vld [vmem:[#allocation3 + $0x5d8] sm:$0xff]  ;;  %v1458_v15 = vld [vmem:[%s4562_s30 + $0x28] sm:$0xff]  ;;  %v1559_v16 = vpack.c.bf16 %v283_v12, %v281_v11  ;;  %v277_v19 = vld [vmem:[#allocation3 + $0x5c0] sm:$0xff] }
  0x9d   :  { %v1464_v17 = vpack.c.bf16 %v1458_v15, %v1458_v15  ;;  %v1558_v18 = vpack.c.bf16 %v280_v14, %v278_v13  ;;  %v279_v20 = vld [vmem:[#allocation3 + $0x5d0] sm:$0xff]  ;;  %v274_v21 = vld [vmem:[#allocation3 + $0x5a8] sm:$0xff]  ;;  %v276_v22 = vld [vmem:[#allocation3 + $0x5b8] sm:$0xff] }
  0x9e   :  { %v1557_v23 = vpack.c.bf16 %v279_v20, %v277_v19  ;;  %v1556_v24 = vpack.c.bf16 %v276_v22, %v274_v21  ;;  %v273_v25 = vld [vmem:[#allocation3 + $0x5a0] sm:$0xff]  ;;  %v275_v26 = vld [vmem:[#allocation3 + $0x5b0] sm:$0xff]  ;;  %v270_v27 = vld [vmem:[#allocation3 + $0x588] sm:$0xff] }
  0x9f   :  { %1661 = vmatpush1.bf16.msra.mxu0 %v1537_v49  ;;  %1686 = vmatprep.mubr.bf16.mxu0 %v1464_v17  ;;  %v272_v28 = vld [vmem:[#allocation3 + $0x598] sm:$0xff]  ;;  %v1555_v29 = vpack.c.bf16 %v275_v26, %v273_v25  ;;  %v269_v31 = vld [vmem:[#allocation3 + $0x580] sm:$0xff]  ;;  %v271_v32 = vld [vmem:[#allocation3 + $0x590] sm:$0xff] }
  0xa0   :  { %1662 = vmatprep.subr.bf16.mxu0 %v1536_v50  ;;  %v1554_v30 = vpack.c.bf16 %v272_v28, %v270_v27  ;;  %v266_v33 = vld [vmem:[#allocation3 + $0x568] sm:$0xff]  ;;  %v268_v34 = vld [vmem:[#allocation3 + $0x578] sm:$0xff]  ;;  %v1553_v35 = vpack.c.bf16 %v271_v32, %v269_v31  ;;  %v265_v37 = vld [vmem:[#allocation3 + $0x560] sm:$0xff] }
  0xa1   :  { %v1552_v36 = vpack.c.bf16 %v268_v34, %v266_v33  ;;  %v267_v38 = vld [vmem:[#allocation3 + $0x570] sm:$0xff]  ;;  %v262_v39 = vld [vmem:[#allocation3 + $0x548] sm:$0xff]  ;;  %v264_v40 = vld [vmem:[#allocation3 + $0x558] sm:$0xff] }
  0xa2   :  { %v1551_v41 = vpack.c.bf16 %v267_v38, %v265_v37  ;;  %v1550_v42 = vpack.c.bf16 %v264_v40, %v262_v39  ;;  %v261_v43 = vld [vmem:[#allocation3 + $0x540] sm:$0xff]  ;;  %v263_v44 = vld [vmem:[#allocation3 + $0x550] sm:$0xff]  ;;  %v258_v45 = vld [vmem:[#allocation3 + $0x528] sm:$0xff] }
  0xa3   :  { %1663 = vmatpush1.bf16.msra.mxu0 %v1535_v55  ;;  %v260_v46 = vld [vmem:[#allocation3 + $0x538] sm:$0xff]  ;;  %v1549_v47 = vpack.c.bf16 %v263_v44, %v261_v43  ;;  %v257_v49 = vld [vmem:[#allocation3 + $0x520] sm:$0xff]  ;;  %v259_v50 = vld [vmem:[#allocation3 + $0x530] sm:$0xff] }
  0xa4   :  { %1664 = vmatprep.subr.bf16.mxu0 %v1534_v56  ;;  %v1548_v48 = vpack.c.bf16 %v260_v46, %v258_v45  ;;  %v254_v51 = vld [vmem:[#allocation3 + $0x508] sm:$0xff]  ;;  %v256_v52 = vld [vmem:[#allocation3 + $0x518] sm:$0xff]  ;;  %v1547_v53 = vpack.c.bf16 %v259_v50, %v257_v49  ;;  %v253_v55 = vld [vmem:[#allocation3 + $0x500] sm:$0xff] }
  0xa5   :  { %v1546_v54 = vpack.c.bf16 %v256_v52, %v254_v51  ;;  %v255_v56 = vld [vmem:[#allocation3 + $0x510] sm:$0xff]  ;;  %v1457_v58 = vld [vmem:[%s4562_s30 + $0x20] sm:$0xff]  ;;  %v301_v0 = vld [vmem:[%s4488_s5 + $0x78] sm:$0xff] }
  0xa6   :  { %v1545_v57 = vpack.c.bf16 %v255_v56, %v253_v55  ;;  %v1463_v59 = vpack.c.bf16 %v1457_v58, %v1457_v58  ;;  %v316_v60 = vld [vmem:[%s4488_s5 + $0xf0] sm:$0xff]  ;;  %v314_v1 = vld [vmem:[%s4488_s5 + $0xe0] sm:$0xff]  ;;  %v299_v6 = vld [vmem:[%s4488_s5 + $0x68] sm:$0xff] }
  0xa7   :  { %1665 = vmatpush1.bf16.msra.mxu0 %v1533_v61  ;;  %v317_v61 = vld [vmem:[%s4488_s5 + $0xf8] sm:$0xff]  ;;  %v312_v7 = vld [vmem:[%s4488_s5 + $0xd0] sm:$0xff]  ;;  %v310_v13 = vld [vmem:[%s4488_s5 + $0xc0] sm:$0xff] }
  0xa8   :  { %1666 = vmatprep.subr.bf16.mxu0 %v1532_v62  ;;  %v300_v62 = vld [vmem:[%s4488_s5 + $0x70] sm:$0xff]  ;;  %v1714_v63 = vpack.c.bf16 %v317_v61, %v316_v60  ;;  %v297_v12 = vld [vmem:[%s4488_s5 + $0x58] sm:$0xff]  ;;  %v311_v14 = vld [vmem:[%s4488_s5 + $0xc8] sm:$0xff] }
  0xa9   :  { %v1706_v2 = vpack.c.bf16 %v301_v0, %v300_v62  ;;  %v296_v11 = vld [vmem:[%s4488_s5 + $0x50] sm:$0xff]  ;;  %v294_v17 = vld [vmem:[%s4488_s5 + $0x40] sm:$0xff]  ;;  %v309_v20 = vld [vmem:[%s4488_s5 + $0xb8] sm:$0xff] }
  0xaa   :  { %2396 = vmatprep.subr.bf16.mxu1 %v1714_v63  ;;  %v1704_v15 = vpack.c.bf16 %v297_v12, %v296_v11  ;;  %v308_v19 = vld [vmem:[%s4488_s5 + $0xb0] sm:$0xff]  ;;  %v306_v25 = vld [vmem:[%s4488_s5 + $0xa0] sm:$0xff]  ;;  %v307_v26 = vld [vmem:[%s4488_s5 + $0xa8] sm:$0xff] }
  0xab   :  { %1667 = vmatpush1.bf16.msra.mxu0 %v1531_v3  ;;  %v315_v3 = vld [vmem:[%s4488_s5 + $0xe8] sm:$0xff]  ;;  %2397 = vmatpush3.bf16.msra.mxu1 %v1706_v2  ;;  %v1710_v22 = vpack.c.bf16 %v309_v20, %v308_v19  ;;  %v1709_v28 = vpack.c.bf16 %v307_v26, %v306_v25  ;;  %v304_v32 = vld [vmem:[%s4488_s5 + $0x90] sm:$0xff]  ;;  %v305_v33 = vld [vmem:[%s4488_s5 + $0x98] sm:$0xff] }
  0xac   :  { %1668 = vmatprep.subr.bf16.mxu0 %v1530_v4  ;;  %v298_v4 = vld [vmem:[%s4488_s5 + $0x60] sm:$0xff]  ;;  %v1713_v5 = vpack.c.bf16 %v315_v3, %v314_v1  ;;  %v1708_v34 = vpack.c.bf16 %v305_v33, %v304_v32  ;;  %v303_v39 = vld [vmem:[%s4488_s5 + $0x88] sm:$0xff]  ;;  %v2490_v46 = vld [vmem:[#allocation3 + $0xd8] sm:$0xff] }
  0xad   :  { %v1705_v8 = vpack.c.bf16 %v299_v6, %v298_v4  ;;  %v302_v38 = vld [vmem:[%s4488_s5 + $0x80] sm:$0xff]  ;;  %v2489_v44 = vld [vmem:[#allocation3 + $0xc8] sm:$0xff]  ;;  %v2492_v50 = vld [vmem:[#allocation3 + $0x2d8] sm:$0xff] }
  0xae   :  { %2398 = vmatprep.subr.bf16.mxu1 %v1713_v5  ;;  %v1707_v40 = vpack.c.bf16 %v303_v39, %v302_v38  ;;  %v728_v45 = vmul.f32 0.001, %v2489_v44  ;;  %v794_v51 = vmul.f32 0.001, %v2492_v50  ;;  %v2493_v52 = vld [vmem:[#allocation3 + $0xa8] sm:$0xff]  ;;  %v2498_v61 = vld [vmem:[#allocation3 + $0x2b8] sm:$0xff] }
  0xaf   :  { %1669 = vmatpush1.bf16.msra.mxu0 %v1529_v9  ;;  %v313_v9 = vld [vmem:[%s4488_s5 + $0xd8] sm:$0xff]  ;;  %2399 = vmatpush3.bf16.msra.mxu1 %v1705_v8  ;;  %v2495_v56 = vld [vmem:[#allocation3 + $0x2a8] sm:$0xff]  ;;  %v790_v62 = vmul.f32 0.001, %v2498_v61 }
  0xb0   :  { %1670 = vmatprep.subr.bf16.mxu0 %v1560_v10  ;;  %v1712_v10 = vpack.c.bf16 %v313_v9, %v312_v7  ;;  %v2496_v58 = vld [vmem:[#allocation9 + $0xe8] sm:$0xff]  ;;  %v2500_v1 = vld [vmem:[#allocation3 + $0x98] sm:$0xff] }
  0xb1   :  { %v2499_v63 = vld [vmem:[#allocation3 + $0x88] sm:$0xff]  ;;  %v3061_v2 = vmul.f32 0.001, %v2500_v1  ;;  %v346_v6 = vld [vmem:[#allocation6 + $0xd8] sm:$0xff] }
  0xb2   :  { %2400 = vmatprep.subr.bf16.mxu1 %v1712_v10  ;;  %v3059_v0 = vmul.f32 0.001, %v2499_v63  ;;  %v2501_v3 = vld [vmem:[#allocation3 + $0x288] sm:$0xff]  ;;  %v2503_v9 = vld [vmem:[#allocation9 + $0x2f8] sm:$0xff]  ;;  %v538_v12 = vmul.f32 0.999, %v346_v6 }
  0xb3   :  { %1671 = vmatpush2.bf16.msra.mxu0 %v1559_v16  ;;  %v1711_v16 = vpack.c.bf16 %v311_v14, %v310_v13  ;;  %2401 = vmatpush3.bf16.msra.mxu1 %v1704_v15  ;;  %v3063_v4 = vmul.f32 0.001, %v2501_v3  ;;  %v344_v5 = vld [vmem:[#allocation6 + $0xc8] sm:$0xff]  ;;  %v410_v13 = vld [vmem:[#allocation6 + $0x2d8] sm:$0xff]  ;;  %v2504_v14 = vld [vmem:[#allocation9 + $0x2e0] sm:$0xff] }
  0xb4   :  { %1672 = vmatprep.subr.bf16.mxu0 %v1558_v18  ;;  %v295_v18 = vld [vmem:[%s4488_s5 + $0x48] sm:$0xff]  ;;  %v536_v11 = vmul.f32 0.999, %v344_v5  ;;  %v2505_v15 = vld [vmem:[#allocation9 + $0x2f0] sm:$0xff]  ;;  %v342_v20 = vld [vmem:[#allocation6 + $0xb8] sm:$0xff] }
  0xb5   :  { %v1703_v21 = vpack.c.bf16 %v295_v18, %v294_v17  ;;  %2402 = vmatprep.subr.bf16.mxu1 %v1711_v16  ;;  %v408_v7 = vld [vmem:[#allocation6 + $0x2c8] sm:$0xff]  ;;  %v1825_v16 = vpack.c.bf16 %v2505_v15, %v2504_v14  ;;  %v602_v18 = vmul.f32 0.999, %v410_v13  ;;  %v406_v32 = vld [vmem:[#allocation6 + $0x2b8] sm:$0xff]  ;;  %v2515_v3 = vld [vmem:[#allocation9 + $0x2a0] sm:$0xff] }
  0xb6   :  { %v2502_v8 = vld [vmem:[#allocation9 + $0x2e8] sm:$0xff]  ;;  %v600_v17 = vmul.f32 0.999, %v408_v7  ;;  %v2514_v63 = vld [vmem:[#allocation3 + $0x58] sm:$0xff]  ;;  %v2516_v5 = vld [vmem:[#allocation9 + $0x2b0] sm:$0xff] }
  0xb7   :  { %1673 = vmatpush2.bf16.msra.mxu0 %v1557_v23  ;;  %v292_v23 = vld [vmem:[%s4488_s5 + $0x30] sm:$0xff]  ;;  %2403 = vmatpush3.bf16.msra.mxu1 %v1703_v21  ;;  %v1826_v10 = vpack.c.bf16 %v2503_v9, %v2502_v8  ;;  %v340_v19 = vld [vmem:[#allocation6 + $0xa8] sm:$0xff]  ;;  %v2506_v21 = vld [vmem:[#allocation3 + $0x298] sm:$0xff]  ;;  %v3093_v1 = vmul.f32 0.001, %v2514_v63  ;;  %v1821_v6 = vpack.c.bf16 %v2516_v5, %v2515_v3 }
  0xb8   :  { %1674 = vmatprep.subr.bf16.mxu0 %v1556_v24  ;;  %v293_v24 = vld [vmem:[%s4488_s5 + $0x38] sm:$0xff]  ;;  %2404 = vmatprep.subr.bf16.mxu1 %v1710_v22  ;;  %v3065_v22 = vmul.f32 0.001, %v2506_v21  ;;  %v532_v25 = vmul.f32 0.999, %v340_v19  ;;  %v2507_v26 = vld [vmem:[#allocation3 + $0x68] sm:$0xff] }
  0xb9   :  { %v1702_v27 = vpack.c.bf16 %v293_v24, %v292_v23  ;;  %v3067_v23 = vadd.f32 %v728_v45, %v536_v11  ;;  %v336_v44 = vld [vmem:[#allocation6 + $0x88] sm:$0xff]  ;;  %v338_v45 = vld [vmem:[#allocation6 + $0x98] sm:$0xff] }
  0xba   :  { %v528_v50 = vmul.f32 0.999, %v336_v44  ;;  %v2513_v61 = vld [vmem:[#allocation3 + $0x48] sm:$0xff]  ;;  %v334_v9 = vld [vmem:[#allocation6 + $0x78] sm:$0xff] }
  0xbb   :  { %1675 = vmatpush2.bf16.msra.mxu0 %v1555_v29  ;;  %v290_v29 = vld [vmem:[%s4488_s5 + $0x20] sm:$0xff]  ;;  %2405 = vmatpush3.bf16.msra.mxu1 %v1702_v27  ;;  %v3071_v27 = vmul.f32 0.001, %v2507_v26  ;;  %1248 = vst [vmem:[#allocation9 + $0xc8] sm:$0xff] %v3067_v23  ;;  %v332_v8 = vld [vmem:[#allocation6 + $0x68] sm:$0xff]  ;;  %v2518_v14 = vld [vmem:[#allocation3 + $0x258] sm:$0xff] }
  0xbc   :  { %1676 = vmatprep.subr.bf16.mxu0 %v1554_v30  ;;  %v291_v30 = vld [vmem:[%s4488_s5 + $0x28] sm:$0xff]  ;;  %2406 = vmatprep.subr.bf16.mxu1 %v1709_v28  ;;  %v524_v13 = vmul.f32 0.999, %v332_v8  ;;  %v778_v15 = vmul.f32 0.001, %v2518_v14  ;;  %v2520_v26 = vld [vmem:[#allocation3 + $0x38] sm:$0xff] }
  0xbd   :  { %v1701_v31 = vpack.c.bf16 %v291_v30, %v290_v29  ;;  %v986_v29 = vadd.f32 %v794_v51, %v602_v18  ;;  %v534_v30 = vmul.f32 0.999, %v342_v20  ;;  %v2512_v51 = vld [vmem:[#allocation3 + $0x278] sm:$0xff]  ;;  %v324_v63 = vld [vmem:[#allocation6 + $0x28] sm:$0xff] }
  0xbe   :  { %v398_v18 = vld [vmem:[#allocation6 + $0x278] sm:$0xff]  ;;  %v3107_v20 = vadd.f32 %v3071_v27, %v524_v13  ;;  %v2529_v5 = vld [vmem:[#allocation3 + $0x208] sm:$0xff] }
  0xbf   :  { %1677 = vmatpush2.bf16.msra.mxu0 %v1553_v35  ;;  %2407 = vmatpush3.bf16.msra.mxu1 %v1701_v31  ;;  %v288_v35 = vld [vmem:[%s4488_s5 + $0x10] sm:$0xff]  ;;  %v404_v31 = vld [vmem:[#allocation6 + $0x2a8] sm:$0xff]  ;;  %1314 = vst [vmem:[#allocation9 + $0x2d8] sm:$0xff] %v986_v29  ;;  %v590_v21 = vmul.f32 0.999, %v398_v18  ;;  %v326_v3 = vld [vmem:[#allocation6 + $0x38] sm:$0xff] }
  0xc0   :  { %1678 = vmatprep.subr.bf16.mxu0 %v1552_v36  ;;  %v289_v36 = vld [vmem:[%s4488_s5 + $0x18] sm:$0xff]  ;;  %2408 = vmatprep.subr.bf16.mxu1 %v1708_v34  ;;  %1236 = vst [vmem:[#allocation9 + $0x68] sm:$0xff] %v3107_v20  ;;  %v388_v13 = vld [vmem:[#allocation6 + $0x228] sm:$0xff] }
  0xc1   :  { %v1700_v37 = vpack.c.bf16 %v289_v36, %v288_v35  ;;  %v596_v35 = vmul.f32 0.999, %v404_v31  ;;  %v598_v36 = vmul.f32 0.999, %v406_v32  ;;  %v390_v14 = vld [vmem:[#allocation6 + $0x238] sm:$0xff] }
  0xc2   :  { %v580_v18 = vmul.f32 0.999, %v388_v13  ;;  %v2542_v13 = vld [vmem:[#allocation3 + $0x3d8] sm:$0xff] }
  0xc3   :  { %1679 = vmatpush2.bf16.msra.mxu0 %v1551_v41  ;;  %2409 = vmatpush3.bf16.msra.mxu1 %v1700_v37  ;;  %v286_v41 = vld [vmem:[%s4488_s5] sm:$0xff]  ;;  %v2508_v37 = vld [vmem:[#allocation3 + $0x78] sm:$0xff] }
  0xc4   :  { %1680 = vmatprep.subr.bf16.mxu0 %v1550_v42  ;;  %v287_v42 = vld [vmem:[%s4488_s5 + $0x8] sm:$0xff]  ;;  %2410 = vmatprep.subr.bf16.mxu1 %v1707_v40  ;;  %v3079_v38 = vmul.f32 0.001, %v2508_v37  ;;  %v2509_v40 = vld [vmem:[#allocation9 + $0x2c0] sm:$0xff] }
  0xc5   :  { %v1699_v43 = vpack.c.bf16 %v287_v42, %v286_v41  ;;  %v2510_v41 = vld [vmem:[#allocation9 + $0x2d0] sm:$0xff]  ;;  %v2523_v37 = vld [vmem:[#allocation3 + $0x228] sm:$0xff] }
  0xc6   :  { %v1823_v42 = vpack.c.bf16 %v2510_v41, %v2509_v40 }
  0xc7   :  { %1681 = vmatpush2.bf16.msra.mxu0 %v1549_v47  ;;  %v730_v47 = vmul.f32 0.001, %v2490_v46  ;;  %2411 = vmatpush3.bf16.msra.mxu1 %v1699_v43  ;;  %v2511_v46 = vld [vmem:[#allocation3 + $0x268] sm:$0xff] }
  0xc8   :  { %1682 = vmatprep.subr.bf16.mxu0 %v1548_v48  ;;  %v2491_v48 = vld [vmem:[#allocation3 + $0x2c8] sm:$0xff] }
  0xc9   :  { %v792_v49 = vmul.f32 0.001, %v2491_v48  ;;  %v3069_v24 = vadd.f32 %v730_v47, %v538_v12  ;;  %v3083_v47 = vmul.f32 0.001, %v2511_v46  ;;  %v392_v46 = vld [vmem:[#allocation6 + $0x248] sm:$0xff] }
  0xcb   :  { %1683 = vmatpush2.bf16.msra.mxu0 %v1547_v53  ;;  %v724_v53 = vmul.f32 0.001, %v2493_v52  ;;  %v984_v28 = vadd.f32 %v792_v49, %v600_v17  ;;  %1250 = vst [vmem:[#allocation9 + $0xd8] sm:$0xff] %v3069_v24  ;;  %v982_v49 = vadd.f32 %v790_v62, %v598_v36  ;;  %v782_v52 = vmul.f32 0.001, %v2512_v51  ;;  %v396_v17 = vld [vmem:[#allocation6 + $0x268] sm:$0xff] }
  0xcc   :  { %1684 = vmatprep.subr.bf16.mxu0 %v1546_v54  ;;  %v2494_v54 = vld [vmem:[#allocation3 + $0xb8] sm:$0xff]  ;;  %v712_v62 = vmul.f32 0.001, %v2513_v61  ;;  %v584_v51 = vmul.f32 0.999, %v392_v46  ;;  %v384_v46 = vld [vmem:[#allocation6 + $0x208] sm:$0xff] }
  0xcd   :  { %v726_v55 = vmul.f32 0.001, %v2494_v54  ;;  %v3077_v34 = vadd.f32 %v724_v53, %v532_v25  ;;  %1312 = vst [vmem:[#allocation9 + $0x2c8] sm:$0xff] %v984_v28  ;;  %v1824_v39 = vpack.c.bf16 %v986_v29, %v984_v28  ;;  %v530_v54 = vmul.f32 0.999, %v338_v45  ;;  %1310 = vst [vmem:[#allocation9 + $0x2b8] sm:$0xff] %v982_v49 }
  0xce   :  { %v3109_v28 = vmul.f32 0.001, %v2520_v26  ;;  %v2521_v29 = vld [vmem:[#allocation9 + $0x280] sm:$0xff]  ;;  %v330_v36 = vld [vmem:[#allocation6 + $0x58] sm:$0xff]  ;;  %v974_v40 = vadd.f32 %v782_v52, %v590_v21  ;;  %v2525_v52 = vld [vmem:[#allocation3 + $0x8] sm:$0xff] }
  0xcf   :  { %1685 = vmatpush2.bf16.msra.mxu0 %v1545_v57  ;;  %v3057_v57 = vmul.f32 0.001, %v2495_v56  ;;  %v3081_v43 = vadd.f32 %v726_v55, %v534_v30  ;;  %1244 = vst [vmem:[#allocation9 + $0xa8] sm:$0xff] %v3077_v34  ;;  %v400_v55 = vld [vmem:[#allocation6 + $0x288] sm:$0xff]  ;;  %v402_v56 = vld [vmem:[#allocation6 + $0x298] sm:$0xff]  ;;  %v3096_v7 = vadd.f32 %v3061_v2, %v530_v54  ;;  %v2522_v30 = vld [vmem:[#allocation9 + $0x290] sm:$0xff] }
  0xd0   :  { %1927 = vmatprep.subr.bf16.mxu0 %v1826_v10  ;;  %v2517_v10 = vld [vmem:[#allocation3 + $0x248] sm:$0xff]  ;;  %v1819_v31 = vpack.c.bf16 %v2522_v30, %v2521_v29  ;;  %v522_v45 = vmul.f32 0.999, %v330_v36  ;;  %1302 = vst [vmem:[#allocation9 + $0x278] sm:$0xff] %v974_v40  ;;  %v704_v54 = vmul.f32 0.001, %v2525_v52 }
  0xd1   :  { %v980_v48 = vadd.f32 %v3057_v57, %v596_v35  ;;  %1246 = vst [vmem:[#allocation9 + $0xb8] sm:$0xff] %v3081_v43  ;;  %v592_v57 = vmul.f32 0.999, %v400_v55  ;;  %v3098_v11 = vmul.f32 0.001, %v2517_v10  ;;  %1242 = vst [vmem:[#allocation9 + $0x98] sm:$0xff] %v3096_v7 }
  0xd2   :  { %1687 = vmatmul.mubr.bf16.vlgmr.msra.gmra.mxu0 %v1463_v59  ;;  %v2497_v59 = vld [vmem:[#allocation9 + $0xf8] sm:$0xff]  ;;  %v328_v35 = vld [vmem:[#allocation6 + $0x48] sm:$0xff]  ;;  %v3126_v61 = vadd.f32 %v3093_v1, %v522_v45  ;;  %v2534_v26 = vld [vmem:[#allocation9 + $0x250] sm:$0xff] }
  0xd3   :  { %v1794_v60 = vpack.c.bf16 %v2497_v59, %v2496_v58  ;;  %1928 = vmatpush1.bf16.msra.mxu0 %v1825_v16  ;;  %1308 = vst [vmem:[#allocation9 + $0x2a8] sm:$0xff] %v980_v48  ;;  %v1822_v58 = vpack.c.bf16 %v982_v49, %v980_v48  ;;  %v3091_v59 = vadd.f32 %v3059_v0, %v528_v50  ;;  %v526_v16 = vmul.f32 0.999, %v334_v9  ;;  %v394_v48 = vld [vmem:[#allocation6 + $0x258] sm:$0xff]  ;;  %v2535_v36 = vld [vmem:[#allocation3 + $0x3e8] sm:$0xff]  ;;  %v2589_v1 = vld [vmem:[#allocation3 + $0x4c0] sm:$0xff] }
  0xd4   :  { %1929 = vmatprep.subr.bf16.mxu0 %v1824_v39  ;;  %v976_v0 = vadd.f32 %v3063_v4, %v592_v57  ;;  %v588_v4 = vmul.f32 0.999, %v396_v17  ;;  %v3114_v39 = vmul.f32 0.001, %v2523_v37  ;;  %v520_v41 = vmul.f32 0.999, %v328_v35 }
  0xd5   :  { %1886 = vmatprep.subr.bf16.mxu1 %v1794_v60  ;;  %v594_v60 = vmul.f32 0.999, %v402_v56  ;;  %1240 = vst [vmem:[#allocation9 + $0x88] sm:$0xff] %v3091_v59  ;;  %v3112_v32 = vadd.f32 %v3079_v38, %v526_v16  ;;  %v2526_v55 = vld [vmem:[#allocation3 + $0x18] sm:$0xff]  ;;  %v2528_v57 = vld [vmem:[#allocation9 + $0x270] sm:$0xff]  ;;  %1234 = vst [vmem:[#allocation9 + $0x58] sm:$0xff] %v3126_v61 }
  0xd6   :  { %1304 = vst [vmem:[#allocation9 + $0x288] sm:$0xff] %v976_v0  ;;  %v972_v27 = vadd.f32 %v3083_v47, %v588_v4  ;;  %v3121_v50 = vadd.f32 %v712_v62, %v520_v41  ;;  %v586_v47 = vmul.f32 0.999, %v394_v48  ;;  %v3123_v56 = vmul.f32 0.001, %v2526_v55  ;;  %v2530_v10 = vld [vmem:[#allocation3 + $0x218] sm:$0xff] }
  0xd7   :  { %1930 = vmatpush1.bf16.msra.mxu0 %v1823_v42  ;;  %v978_v12 = vadd.f32 %v3065_v22, %v594_v60  ;;  %v2519_v22 = vld [vmem:[#allocation3 + $0x28] sm:$0xff]  ;;  %v2524_v42 = vld [vmem:[#allocation3 + $0x238] sm:$0xff]  ;;  %1238 = vst [vmem:[#allocation9 + $0x78] sm:$0xff] %v3112_v32  ;;  %v968_v62 = vadd.f32 %v3098_v11, %v584_v51  ;;  %v516_v9 = vmul.f32 0.999, %v324_v63  ;;  %v2594_v2 = vld [vmem:[#allocation9 + $0x310] sm:$0xff] }
  0xd8   :  { %1931 = vmatprep.subr.bf16.mxu0 %v1822_v58  ;;  %v708_v25 = vmul.f32 0.001, %v2519_v22  ;;  %v774_v44 = vmul.f32 0.001, %v2524_v42  ;;  %1300 = vst [vmem:[#allocation9 + $0x268] sm:$0xff] %v972_v27  ;;  %v1818_v49 = vpack.c.bf16 %v974_v40, %v972_v27  ;;  %v2527_v58 = vld [vmem:[#allocation9 + $0x260] sm:$0xff]  ;;  %v970_v8 = vadd.f32 %v778_v15, %v586_v47 }
  0xd9   :  { %1306 = vst [vmem:[#allocation9 + $0x298] sm:$0xff] %v978_v12  ;;  %v1820_v19 = vpack.c.bf16 %v978_v12, %v976_v0  ;;  %v1817_v60 = vpack.c.bf16 %v2528_v57, %v2527_v58  ;;  %1232 = vst [vmem:[#allocation9 + $0x48] sm:$0xff] %v3121_v50  ;;  %v770_v0 = vmul.f32 0.001, %v2530_v10  ;;  %v518_v12 = vmul.f32 0.999, %v326_v3 }
  0xda   :  { %1296 = vst [vmem:[#allocation9 + $0x248] sm:$0xff] %v968_v62  ;;  %1298 = vst [vmem:[#allocation9 + $0x258] sm:$0xff] %v970_v8  ;;  %v1816_v16 = vpack.c.bf16 %v970_v8, %v968_v62  ;;  %v3135_v17 = vadd.f32 %v708_v25, %v516_v9  ;;  %v582_v11 = vmul.f32 0.999, %v390_v14  ;;  %v2531_v15 = vld [vmem:[#allocation3 + $0x1e8] sm:$0xff]  ;;  %v2532_v4 = vld [vmem:[#allocation3 + $0x1f8] sm:$0xff]  ;;  %v964_v25 = vadd.f32 %v3114_v39, %v580_v18 }
  0xdb   :  { %1932 = vmatpush1.bf16.msra.mxu0 %v1821_v6  ;;  %v3128_v6 = vmul.f32 0.001, %v2529_v5  ;;  %v3137_v21 = vmul.f32 0.001, %v2532_v4  ;;  %v2533_v22 = vld [vmem:[#allocation9 + $0x240] sm:$0xff]  ;;  %v3140_v30 = vadd.f32 %v3109_v28, %v518_v12  ;;  %v322_v35 = vld [vmem:[#allocation6 + $0x18] sm:$0xff] }
  0xdc   :  { %1933 = vmatprep.subr.bf16.mxu0 %v1820_v19  ;;  %v764_v19 = vmul.f32 0.001, %v2531_v15  ;;  %v1815_v29 = vpack.c.bf16 %v2534_v26, %v2533_v22  ;;  %v3142_v37 = vmul.f32 0.001, %v2535_v36  ;;  %1228 = vst [vmem:[#allocation9 + $0x28] sm:$0xff] %v3135_v17  ;;  %v966_v27 = vadd.f32 %v774_v44, %v582_v11  ;;  %v2536_v41 = vld [vmem:[#allocation3 + $0x3f8] sm:$0xff] }
  0xdd   :  { %v830_v42 = vmul.f32 0.001, %v2536_v41  ;;  %1230 = vst [vmem:[#allocation9 + $0x38] sm:$0xff] %v3140_v30  ;;  %v514_v45 = vmul.f32 0.999, %v322_v35  ;;  %v386_v48 = vld [vmem:[#allocation6 + $0x218] sm:$0xff] }
  0xde   :  { %1292 = vst [vmem:[#allocation9 + $0x228] sm:$0xff] %v964_v25  ;;  %1294 = vst [vmem:[#allocation9 + $0x238] sm:$0xff] %v966_v27  ;;  %v576_v47 = vmul.f32 0.999, %v384_v46  ;;  %v578_v39 = vmul.f32 0.999, %v386_v48 }
  0xdf   :  { %1934 = vmatpush1.bf16.msra.mxu0 %v1819_v31  ;;  %v320_v31 = vld [vmem:[#allocation6 + $0x8] sm:$0xff]  ;;  %v2538_v55 = vld [vmem:[#allocation3 + $0x1d8] sm:$0xff]  ;;  %v2539_v57 = vld [vmem:[#allocation9 + $0x220] sm:$0xff]  ;;  %v3154_v3 = vadd.f32 %v3123_v56, %v514_v45  ;;  %v826_v14 = vmul.f32 0.001, %v2542_v13 }
  0xe0   :  { %1935 = vmatprep.subr.bf16.mxu0 %v1818_v49  ;;  %v512_v40 = vmul.f32 0.999, %v320_v31  ;;  %v1814_v49 = vpack.c.bf16 %v966_v27, %v964_v25  ;;  %v2537_v44 = vld [vmem:[#allocation3 + $0x1c8] sm:$0xff]  ;;  %v3151_v58 = vmul.f32 0.001, %v2538_v55  ;;  %v382_v62 = vld [vmem:[#allocation6 + $0x1f8] sm:$0xff]  ;;  %v962_v10 = vadd.f32 %v770_v0, %v578_v39 }
  0xe1   :  { %v760_v52 = vmul.f32 0.001, %v2537_v44  ;;  %v380_v5 = vld [vmem:[#allocation6 + $0x1e8] sm:$0xff]  ;;  %1226 = vst [vmem:[#allocation9 + $0x18] sm:$0xff] %v3154_v3  ;;  %v446_v11 = vld [vmem:[#allocation6 + $0x3f8] sm:$0xff]  ;;  %v2545_v35 = vld [vmem:[#allocation9 + $0x200] sm:$0xff] }
  0xe2   :  { %v3149_v51 = vadd.f32 %v704_v54, %v512_v40  ;;  %v2541_v8 = vld [vmem:[#allocation3 + $0x3c8] sm:$0xff]  ;;  %v960_v54 = vadd.f32 %v3128_v6, %v576_v47  ;;  %v572_v12 = vmul.f32 0.999, %v380_v5  ;;  %1290 = vst [vmem:[#allocation9 + $0x218] sm:$0xff] %v962_v10  ;;  %v638_v6 = vmul.f32 0.999, %v446_v11 }
  0xe3   :  { %1936 = vmatpush1.bf16.msra.mxu0 %v1817_v60  ;;  %v2540_v60 = vld [vmem:[#allocation9 + $0x230] sm:$0xff]  ;;  %v3156_v9 = vmul.f32 0.001, %v2541_v8  ;;  %v444_v18 = vld [vmem:[#allocation6 + $0x3e8] sm:$0xff]  ;;  %v378_v41 = vld [vmem:[#allocation6 + $0x1d8] sm:$0xff] }
  0xe4   :  { %1937 = vmatprep.subr.bf16.mxu0 %v1816_v16  ;;  %v1813_v63 = vpack.c.bf16 %v2540_v60, %v2539_v57  ;;  %1224 = vst [vmem:[#allocation9 + $0x8] sm:$0xff] %v3149_v51  ;;  %v574_v16 = vmul.f32 0.999, %v382_v62  ;;  %1288 = vst [vmem:[#allocation9 + $0x208] sm:$0xff] %v960_v54  ;;  %v1812_v15 = vpack.c.bf16 %v962_v10, %v960_v54  ;;  %v636_v22 = vmul.f32 0.999, %v444_v18 }
  0xe5   :  { %v3163_v4 = vadd.f32 %v764_v19, %v572_v12  ;;  %v2543_v0 = vld [vmem:[#allocation3 + $0x1a8] sm:$0xff]  ;;  %v2546_v36 = vld [vmem:[#allocation9 + $0x210] sm:$0xff]  ;;  %v1022_v48 = vadd.f32 %v830_v42, %v638_v6  ;;  %v2548_v47 = vld [vmem:[#allocation3 + $0x3b8] sm:$0xff]  ;;  %v570_v44 = vmul.f32 0.999, %v378_v41 }
  0xe6   :  { %v756_v26 = vmul.f32 0.001, %v2543_v0  ;;  %v1811_v25 = vpack.c.bf16 %v2546_v36, %v2545_v35  ;;  %v3168_v27 = vadd.f32 %v3137_v21, %v574_v16  ;;  %v376_v40 = vld [vmem:[#allocation6 + $0x1c8] sm:$0xff]  ;;  %v1020_v19 = vadd.f32 %v3142_v37, %v636_v22  ;;  %v442_v57 = vld [vmem:[#allocation6 + $0x3d8] sm:$0xff]  ;;  %v2551_v10 = vld [vmem:[#allocation9 + $0x3e0] sm:$0xff] }
  0xe7   :  { %1938 = vmatpush1.bf16.msra.mxu0 %v1815_v29  ;;  %v2544_v29 = vld [vmem:[#allocation3 + $0x1b8] sm:$0xff]  ;;  %v2547_v45 = vld [vmem:[#allocation3 + $0x3a8] sm:$0xff]  ;;  %1284 = vst [vmem:[#allocation9 + $0x1e8] sm:$0xff] %v3163_v4  ;;  %v822_v39 = vmul.f32 0.001, %v2548_v47  ;;  %1350 = vst [vmem:[#allocation9 + $0x3f8] sm:$0xff] %v1022_v48  ;;  %v3182_v16 = vadd.f32 %v3151_v58, %v570_v44 }
  0xe8   :  { %1939 = vmatprep.subr.bf16.mxu0 %v1814_v49  ;;  %v3165_v31 = vmul.f32 0.001, %v2544_v29  ;;  %v3170_v46 = vmul.f32 0.001, %v2547_v45  ;;  %v568_v49 = vmul.f32 0.999, %v376_v40  ;;  %v1842_v60 = vpack.c.bf16 %v1022_v48, %v1020_v19 }
  0xe9   :  { %1286 = vst [vmem:[#allocation9 + $0x1f8] sm:$0xff] %v3168_v27  ;;  %v440_v55 = vld [vmem:[#allocation6 + $0x3c8] sm:$0xff]  ;;  %1348 = vst [vmem:[#allocation9 + $0x3e8] sm:$0xff] %v1020_v19  ;;  %v634_v37 = vmul.f32 0.999, %v442_v57  ;;  %v2550_v8 = vld [vmem:[#allocation3 + $0x198] sm:$0xff] }
  0xea   :  { %v632_v5 = vmul.f32 0.999, %v440_v55  ;;  %v2549_v42 = vld [vmem:[#allocation3 + $0x188] sm:$0xff]  ;;  %v3179_v54 = vmul.f32 0.001, %v2550_v8  ;;  %v2552_v12 = vld [vmem:[#allocation9 + $0x3f0] sm:$0xff] }
  0xeb   :  { %1940 = vmatpush1.bf16.msra.mxu0 %v1813_v63  ;;  %v3177_v63 = vadd.f32 %v760_v52, %v568_v49  ;;  %v752_v62 = vmul.f32 0.001, %v2549_v42  ;;  %v1841_v13 = vpack.c.bf16 %v2552_v12, %v2551_v10  ;;  %v372_v18 = vld [vmem:[#allocation6 + $0x1a8] sm:$0xff]  ;;  %v374_v11 = vld [vmem:[#allocation6 + $0x1b8] sm:$0xff]  ;;  %v1018_v6 = vadd.f32 %v826_v14, %v634_v37  ;;  %1282 = vst [vmem:[#allocation9 + $0x1d8] sm:$0xff] %v3182_v16  ;;  %v2557_v44 = vld [vmem:[#allocation9 + $0x3c0] sm:$0xff] }
  0xec   :  { %1941 = vmatprep.subr.bf16.mxu0 %v1812_v15  ;;  %v2553_v15 = vld [vmem:[#allocation3 + $0x388] sm:$0xff]  ;;  %v1016_v52 = vadd.f32 %v3156_v9, %v632_v5  ;;  %v564_v0 = vmul.f32 0.999, %v372_v18  ;;  %v2554_v29 = vld [vmem:[#allocation3 + $0x398] sm:$0xff]  ;;  %v566_v36 = vmul.f32 0.999, %v374_v11 }
  0xed   :  { %v3184_v22 = vmul.f32 0.001, %v2553_v15  ;;  %1280 = vst [vmem:[#allocation9 + $0x1c8] sm:$0xff] %v3177_v63  ;;  %v818_v35 = vmul.f32 0.001, %v2554_v29  ;;  %v438_v40 = vld [vmem:[#allocation6 + $0x3b8] sm:$0xff] }
  0xee   :  { %1344 = vst [vmem:[#allocation9 + $0x3c8] sm:$0xff] %v1016_v52  ;;  %1346 = vst [vmem:[#allocation9 + $0x3d8] sm:$0xff] %v1018_v6  ;;  %v1840_v41 = vpack.c.bf16 %v1018_v6, %v1016_v52  ;;  %v3191_v45 = vadd.f32 %v756_v26, %v564_v0  ;;  %v630_v9 = vmul.f32 0.999, %v438_v40  ;;  %v2555_v14 = vld [vmem:[#allocation3 + $0x168] sm:$0xff]  ;;  %v2556_v49 = vld [vmem:[#allocation3 + $0x178] sm:$0xff] }
  0xef   :  { %1942 = vmatpush1.bf16.msra.mxu0 %v1811_v25  ;;  %v436_v25 = vld [vmem:[#allocation6 + $0x3a8] sm:$0xff]  ;;  %v748_v48 = vmul.f32 0.001, %v2555_v14  ;;  %v3193_v47 = vmul.f32 0.001, %v2556_v49  ;;  %v2558_v55 = vld [vmem:[#allocation9 + $0x3d0] sm:$0xff] }
  0xf0   :  { %1943 = vmatprep.subr.bf16.mxu0 %v1842_v60  ;;  %v628_v19 = vmul.f32 0.999, %v436_v25  ;;  %v1839_v57 = vpack.c.bf16 %v2558_v55, %v2557_v44  ;;  %v3196_v60 = vadd.f32 %v3165_v31, %v566_v36  ;;  %v368_v5 = vld [vmem:[#allocation6 + $0x188] sm:$0xff]  ;;  %v370_v37 = vld [vmem:[#allocation6 + $0x198] sm:$0xff]  ;;  %1276 = vst [vmem:[#allocation9 + $0x1a8] sm:$0xff] %v3191_v45  ;;  %v1014_v10 = vadd.f32 %v822_v39, %v630_v9 }
  0xf1   :  { %v2559_v42 = vld [vmem:[#allocation3 + $0x368] sm:$0xff]  ;;  %v560_v12 = vmul.f32 0.999, %v368_v5  ;;  %v562_v11 = vmul.f32 0.999, %v370_v37  ;;  %v434_v52 = vld [vmem:[#allocation6 + $0x398] sm:$0xff] }
  0xf2   :  { %v3198_v8 = vmul.f32 0.001, %v2559_v42  ;;  %v1012_v26 = vadd.f32 %v3170_v46, %v628_v19  ;;  %1278 = vst [vmem:[#allocation9 + $0x1b8] sm:$0xff] %v3196_v60  ;;  %v432_v15 = vld [vmem:[#allocation6 + $0x388] sm:$0xff]  ;;  %1342 = vst [vmem:[#allocation9 + $0x3b8] sm:$0xff] %v1014_v10  ;;  %v2562_v25 = vld [vmem:[#allocation3 + $0x158] sm:$0xff] }
  0xf3   :  { %1944 = vmatpush2.bf16.msra.mxu0 %v1841_v13  ;;  %v2560_v13 = vld [vmem:[#allocation3 + $0x378] sm:$0xff]  ;;  %v3205_v0 = vadd.f32 %v752_v62, %v560_v12  ;;  %v624_v29 = vmul.f32 0.999, %v432_v15  ;;  %v626_v46 = vmul.f32 0.999, %v434_v52  ;;  %v2561_v39 = vld [vmem:[#allocation3 + $0x148] sm:$0xff]  ;;  %v3210_v14 = vadd.f32 %v3179_v54, %v562_v11 }
  0xf4   :  { %1945 = vmatprep.subr.bf16.mxu0 %v1840_v41  ;;  %v814_v18 = vmul.f32 0.001, %v2560_v13  ;;  %1340 = vst [vmem:[#allocation9 + $0x3a8] sm:$0xff] %v1012_v26  ;;  %v1838_v6 = vpack.c.bf16 %v1014_v10, %v1012_v26  ;;  %v744_v36 = vmul.f32 0.001, %v2561_v39  ;;  %v2563_v41 = vld [vmem:[#allocation9 + $0x3a0] sm:$0xff] }
  0xf5   :  { %v3207_v40 = vmul.f32 0.001, %v2562_v25  ;;  %v2564_v19 = vld [vmem:[#allocation9 + $0x3b0] sm:$0xff]  ;;  %v364_v49 = vld [vmem:[#allocation6 + $0x168] sm:$0xff]  ;;  %v366_v44 = vld [vmem:[#allocation6 + $0x178] sm:$0xff]  ;;  %1272 = vst [vmem:[#allocation9 + $0x188] sm:$0xff] %v3205_v0  ;;  %v1008_v62 = vadd.f32 %v3184_v22, %v624_v29  ;;  %v1010_v5 = vadd.f32 %v818_v35, %v626_v46 }
  0xf6   :  { %v1837_v9 = vpack.c.bf16 %v2564_v19, %v2563_v41  ;;  %v2565_v55 = vld [vmem:[#allocation3 + $0x348] sm:$0xff]  ;;  %v556_v37 = vmul.f32 0.999, %v364_v49  ;;  %v2566_v42 = vld [vmem:[#allocation3 + $0x358] sm:$0xff]  ;;  %1274 = vst [vmem:[#allocation9 + $0x198] sm:$0xff] %v3210_v14  ;;  %v2569_v39 = vld [vmem:[#allocation9 + $0x380] sm:$0xff] }
  0xf7   :  { %1946 = vmatpush2.bf16.msra.mxu0 %v1839_v57  ;;  %v3212_v57 = vmul.f32 0.001, %v2565_v55  ;;  %v810_v26 = vmul.f32 0.001, %v2566_v42  ;;  %v558_v10 = vmul.f32 0.999, %v366_v44  ;;  %v1836_v11 = vpack.c.bf16 %v1010_v5, %v1008_v62 }
  0xf8   :  { %1947 = vmatprep.subr.bf16.mxu0 %v1838_v6  ;;  %v428_v12 = vld [vmem:[#allocation6 + $0x368] sm:$0xff]  ;;  %v430_v13 = vld [vmem:[#allocation6 + $0x378] sm:$0xff]  ;;  %1336 = vst [vmem:[#allocation9 + $0x388] sm:$0xff] %v1008_v62  ;;  %1338 = vst [vmem:[#allocation9 + $0x398] sm:$0xff] %v1010_v5  ;;  %v3219_v15 = vadd.f32 %v748_v48, %v556_v37  ;;  %v855_v38 = vmul.f32 0.001, %v2589_v1 }
  0xf9   :  { %v620_v52 = vmul.f32 0.999, %v428_v12  ;;  %v622_v22 = vmul.f32 0.999, %v430_v13  ;;  %v2567_v35 = vld [vmem:[#allocation3 + $0x128] sm:$0xff]  ;;  %v2568_v29 = vld [vmem:[#allocation3 + $0x138] sm:$0xff]  ;;  %v3224_v19 = vadd.f32 %v3193_v47, %v558_v10 }
  0xfa   :  { %v740_v6 = vmul.f32 0.001, %v2567_v35  ;;  %v3221_v46 = vmul.f32 0.001, %v2568_v29  ;;  %v2570_v25 = vld [vmem:[#allocation9 + $0x390] sm:$0xff]  ;;  %v360_v49 = vld [vmem:[#allocation6 + $0x148] sm:$0xff] }
  0xfb   :  { %1948 = vmatpush2.bf16.msra.mxu0 %v1837_v9  ;;  %v1835_v41 = vpack.c.bf16 %v2570_v25, %v2569_v39  ;;  %v362_v9 = vld [vmem:[#allocation6 + $0x158] sm:$0xff]  ;;  %v2571_v44 = vld [vmem:[#allocation3 + $0x328] sm:$0xff]  ;;  %1268 = vst [vmem:[#allocation9 + $0x168] sm:$0xff] %v3219_v15  ;;  %v1004_v48 = vadd.f32 %v3198_v8, %v620_v52  ;;  %v1006_v62 = vadd.f32 %v814_v18, %v622_v22  ;;  %v552_v5 = vmul.f32 0.999, %v360_v49  ;;  %v2575_v25 = vld [vmem:[#allocation9 + $0x360] sm:$0xff] }
  0xfc   :  { %v3226_v55 = vmul.f32 0.001, %v2571_v44  ;;  %1949 = vmatprep.subr.bf16.mxu0 %v1836_v11  ;;  %v2572_v37 = vld [vmem:[#allocation3 + $0x338] sm:$0xff]  ;;  %1270 = vst [vmem:[#allocation9 + $0x178] sm:$0xff] %v3224_v19  ;;  %v554_v10 = vmul.f32 0.999, %v362_v9 }
  0xfd   :  { %v806_v42 = vmul.f32 0.001, %v2572_v37  ;;  %v424_v12 = vld [vmem:[#allocation6 + $0x348] sm:$0xff]  ;;  %v426_v13 = vld [vmem:[#allocation6 + $0x358] sm:$0xff]  ;;  %1332 = vst [vmem:[#allocation9 + $0x368] sm:$0xff] %v1004_v48  ;;  %1334 = vst [vmem:[#allocation9 + $0x378] sm:$0xff] %v1006_v62  ;;  %v1834_v11 = vpack.c.bf16 %v1006_v62, %v1004_v48  ;;  %v3233_v35 = vadd.f32 %v744_v36, %v552_v5 }
  0xfe   :  { %v616_v29 = vmul.f32 0.999, %v424_v12  ;;  %v618_v8 = vmul.f32 0.999, %v426_v13  ;;  %v2573_v18 = vld [vmem:[#allocation3 + $0x108] sm:$0xff]  ;;  %v2574_v22 = vld [vmem:[#allocation3 + $0x118] sm:$0xff]  ;;  %v3240_v9 = vadd.f32 %v3207_v40, %v554_v10 }
  0xff   :  { %1950 = vmatpush2.bf16.msra.mxu0 %v1835_v41  ;;  %v3235_v52 = vmul.f32 0.001, %v2573_v18  ;;  %v3237_v39 = vmul.f32 0.001, %v2574_v22  ;;  %v2576_v49 = vld [vmem:[#allocation9 + $0x370] sm:$0xff]  ;;  %v356_v41 = vld [vmem:[#allocation6 + $0x128] sm:$0xff] }
 0x100   :  { %v1833_v44 = vpack.c.bf16 %v2576_v49, %v2575_v25  ;;  %v358_v37 = vld [vmem:[#allocation6 + $0x138] sm:$0xff]  ;;  %v2577_v47 = vld [vmem:[#allocation3 + $0x308] sm:$0xff]  ;;  %1951 = vmatprep.subr.bf16.mxu0 %v1834_v11  ;;  %1264 = vst [vmem:[#allocation9 + $0x148] sm:$0xff] %v3233_v35  ;;  %v1000_v36 = vadd.f32 %v3212_v57, %v616_v29  ;;  %v1002_v62 = vadd.f32 %v810_v26, %v618_v8  ;;  %v548_v5 = vmul.f32 0.999, %v356_v41  ;;  %v2599_v1 = vld [vmem:[#allocation3 + $0x480] sm:$0xff] }
 0x101   :  { %v3242_v48 = vmul.f32 0.001, %v2577_v47  ;;  %v2578_v12 = vld [vmem:[#allocation3 + $0x318] sm:$0xff]  ;;  %1266 = vst [vmem:[#allocation9 + $0x158] sm:$0xff] %v3240_v9  ;;  %v550_v10 = vmul.f32 0.999, %v358_v37 }
 0x102   :  { %v3246_v13 = vmul.f32 0.001, %v2578_v12  ;;  %v420_v18 = vld [vmem:[#allocation6 + $0x328] sm:$0xff]  ;;  %v422_v22 = vld [vmem:[#allocation6 + $0x338] sm:$0xff]  ;;  %1328 = vst [vmem:[#allocation9 + $0x348] sm:$0xff] %v1000_v36  ;;  %1330 = vst [vmem:[#allocation9 + $0x358] sm:$0xff] %v1002_v62  ;;  %v1832_v47 = vpack.c.bf16 %v1002_v62, %v1000_v36  ;;  %v3251_v11 = vadd.f32 %v740_v6, %v548_v5 }
 0x103   :  { %1952 = vmatpush2.bf16.msra.mxu0 %v1833_v44  ;;  %v612_v57 = vmul.f32 0.999, %v420_v18  ;;  %v614_v26 = vmul.f32 0.999, %v422_v22  ;;  %v2579_v29 = vld [vmem:[#allocation3 + $0x4e8] sm:$0xff]  ;;  %v2580_v25 = vld [vmem:[#allocation3 + $0x4f8] sm:$0xff]  ;;  %v3260_v44 = vadd.f32 %v3221_v46, %v550_v10 }
 0x104   :  { %v3253_v8 = vmul.f32 0.001, %v2579_v29  ;;  %v3255_v49 = vmul.f32 0.001, %v2580_v25  ;;  %v2581_v12 = vld [vmem:[#allocation9 + $0x340] sm:$0xff]  ;;  %v2582_v37 = vld [vmem:[#allocation9 + $0x350] sm:$0xff]  ;;  %1953 = vmatprep.subr.bf16.mxu0 %v1832_v47 }
 0x105   :  { %v1831_v40 = vpack.c.bf16 %v2582_v37, %v2581_v12  ;;  %v352_v54 = vld [vmem:[#allocation6 + $0x108] sm:$0xff]  ;;  %v354_v36 = vld [vmem:[#allocation6 + $0x118] sm:$0xff]  ;;  %v2583_v6 = vld [vmem:[#allocation3 + $0x4e0] sm:$0xff]  ;;  %1260 = vst [vmem:[#allocation9 + $0x128] sm:$0xff] %v3251_v11  ;;  %v996_v22 = vadd.f32 %v3226_v55, %v612_v57  ;;  %v998_v29 = vadd.f32 %v806_v42, %v614_v26  ;;  %v847_v33 = vmul.f32 0.001, %v2599_v1 }
 0x106   :  { %v3262_v62 = vmul.f32 0.001, %v2583_v6  ;;  %v2584_v5 = vld [vmem:[#allocation3 + $0x4f0] sm:$0xff]  ;;  %1262 = vst [vmem:[#allocation9 + $0x138] sm:$0xff] %v3260_v44  ;;  %v544_v10 = vmul.f32 0.999, %v352_v54 }
 0x107   :  { %v3264_v18 = vmul.f32 0.001, %v2584_v5  ;;  %v546_v12 = vmul.f32 0.999, %v354_v36  ;;  %v416_v37 = vld [vmem:[#allocation6 + $0x308] sm:$0xff]  ;;  %v418_v6 = vld [vmem:[#allocation6 + $0x318] sm:$0xff]  ;;  %1954 = vmatpush2.bf16.msra.mxu0 %v1831_v40  ;;  %v1830_v55 = vpack.c.bf16 %v998_v29, %v996_v22 }
 0x108   :  { %v2585_v31 = vld [vmem:[#allocation3 + $0x4c8] sm:$0xff]  ;;  %1324 = vst [vmem:[#allocation9 + $0x328] sm:$0xff] %v996_v22  ;;  %1326 = vst [vmem:[#allocation9 + $0x338] sm:$0xff] %v998_v29  ;;  %v608_v42 = vmul.f32 0.999, %v416_v37  ;;  %v2586_v26 = vld [vmem:[#allocation3 + $0x4d8] sm:$0xff]  ;;  %v3280_v56 = vadd.f32 %v3235_v52, %v544_v10 }
 0x109   :  { %v3273_v5 = vmul.f32 0.001, %v2585_v31  ;;  %v610_v57 = vmul.f32 0.999, %v418_v6  ;;  %v3277_v58 = vmul.f32 0.001, %v2586_v26  ;;  %v3283_v31 = vadd.f32 %v3237_v39, %v546_v12  ;;  %1955 = vmatprep.subr.bf16.mxu0 %v1830_v55 }
 0x10a   :  { %v2587_v46 = vld [vmem:[#allocation9 + $0x320] sm:$0xff]  ;;  %v2588_v54 = vld [vmem:[#allocation9 + $0x330] sm:$0xff]  ;;  %v476_v28 = vld [vmem:[#allocation6 + $0x4e8] sm:$0xff]  ;;  %v992_v29 = vadd.f32 %v3242_v48, %v608_v42  ;;  %1256 = vst [vmem:[#allocation9 + $0x108] sm:$0xff] %v3280_v56 }
 0x10b   :  { %v1829_v36 = vpack.c.bf16 %v2588_v54, %v2587_v46  ;;  %v478_v40 = vld [vmem:[#allocation6 + $0x4f8] sm:$0xff]  ;;  %v668_v37 = vmul.f32 0.999, %v476_v28  ;;  %v475_v6 = vld [vmem:[#allocation6 + $0x4e0] sm:$0xff]  ;;  %v477_v46 = vld [vmem:[#allocation6 + $0x4f0] sm:$0xff]  ;;  %1258 = vst [vmem:[#allocation9 + $0x118] sm:$0xff] %v3283_v31 }
 0x10c   :  { %v2590_v26 = vld [vmem:[#allocation3 + $0x4d0] sm:$0xff]  ;;  %v670_v39 = vmul.f32 0.999, %v478_v40  ;;  %v667_v12 = vmul.f32 0.999, %v475_v6  ;;  %v2591_v55 = vld [vmem:[#allocation3 + $0x4a8] sm:$0xff] }
 0x10d   :  { %v3289_v52 = vmul.f32 0.001, %v2590_v26  ;;  %v3295_v48 = vmul.f32 0.001, %v2591_v55  ;;  %1956 = vmatpush2.bf16.msra.mxu0 %v1829_v36  ;;  %1320 = vst [vmem:[#allocation9 + $0x308] sm:$0xff] %v992_v29  ;;  %v3298_v42 = vadd.f32 %v3253_v8, %v668_v37  ;;  %v2592_v54 = vld [vmem:[#allocation3 + $0x4b8] sm:$0xff] }
 0x10e   :  { %v854_v26 = vmul.f32 0.001, %v2592_v54  ;;  %v3301_v40 = vadd.f32 %v3255_v49, %v670_v39  ;;  %v3304_v6 = vadd.f32 %v3262_v62, %v667_v12  ;;  %v472_v55 = vld [vmem:[#allocation6 + $0x4c8] sm:$0xff]  ;;  %v474_v36 = vld [vmem:[#allocation6 + $0x4d8] sm:$0xff]  ;;  %v471_v49 = vld [vmem:[#allocation6 + $0x4c0] sm:$0xff] }
 0x10f   :  { %1380 = vst [vmem:[#allocation9 + $0x4e8] sm:$0xff] %v3298_v42  ;;  %v1770_v8 = vld [vmem:[%s4564_s24 + $0x18] sm:$0xff]  ;;  %v2595_v37 = vld [vmem:[#allocation3 + $0x4a0] sm:$0xff]  ;;  %v1769_v12 = vld [vmem:[%s4564_s24 + $0x10] sm:$0xff] }
 0x110   :  { %4563 = vst [vmem:[#allocation16_spill] sm:$0xff] %v3304_v6  ;;  %1382 = vst [vmem:[#allocation9 + $0x4f8] sm:$0xff] %v3301_v40  ;;  %v1776_v39 = vpack.c.bf16 %v1770_v8, %v1770_v8  ;;  %v1775_v54 = vpack.c.bf16 %v1769_v12, %v1769_v12 }
 0x111   :  { %1379 = vst [vmem:[#allocation9 + $0x4e0] sm:$0xff] %v3304_v6  ;;  %v500_v6 = vld [vmem:[#allocation6 + $0x5a8] sm:$0xff] }
 0x112   :  { %1959 = vmatprep.mubr.bf16.mxu0 %v1776_v39 }
 0x151   :  { %v3257_v41 = vpop.f32.mrf.mxu0 }
 0x153   :  { %v3268_v25 = vpop.f32.mrf.mxu0 }
 0x154   :  { %v3275_v47 = vpop.f32.mrf.mxu1 }
 0x155   :  { %v1610_v21 = vpop.f32.mrf.mxu0 }
 0x156   :  { %v3285_v22 = vpop.f32.mrf.mxu1  ;;  %v994_v21 = vadd.f32 %v3246_v13, %v610_v57  ;;  %v669_v57 = vmul.f32 0.999, %v477_v46  ;;  %v851_v46 = vmul.f32 0.001, %v2595_v37 }
 0x157   :  { %v1611_v10 = vpop.f32.mrf.mxu0 }
 0x158   :  { %v1651_v13 = vpop.f32.mrf.mxu1  ;;  %1322 = vst [vmem:[#allocation9 + $0x318] sm:$0xff] %v994_v21  ;;  %v1828_v28 = vpack.c.bf16 %v994_v21, %v992_v29  ;;  %v2593_v10 = vld [vmem:[#allocation9 + $0x300] sm:$0xff]  ;;  %v3311_v29 = vadd.f32 %v3264_v18, %v669_v57  ;;  %v666_v21 = vmul.f32 0.999, %v474_v36  ;;  %v663_v18 = vmul.f32 0.999, %v471_v49 }
 0x159   :  { %v1827_v53 = vpack.c.bf16 %v2594_v2, %v2593_v10  ;;  %v664_v2 = vmul.f32 0.999, %v472_v55  ;;  %v2596_v36 = vld [vmem:[#allocation3 + $0x4b0] sm:$0xff]  ;;  %v468_v49 = vld [vmem:[#allocation6 + $0x4a8] sm:$0xff]  ;;  %v467_v57 = vld [vmem:[#allocation6 + $0x4a0] sm:$0xff] }
 0x15a   :  { %v1652_v13 = vpop.f32.mrf.mxu1  ;;  %1957 = vmatprep.subr.bf16.mxu0 %v1828_v28  ;;  %4565 = vst [vmem:[#allocation17_spill] sm:$0xff] %v3311_v29  ;;  %v473_v28 = vld [vmem:[#allocation6 + $0x4d0] sm:$0xff]  ;;  %1381 = vst [vmem:[#allocation9 + $0x4f0] sm:$0xff] %v3311_v29  ;;  %v3327_v55 = vadd.f32 %v3277_v58, %v666_v21  ;;  %v3329_v37 = vadd.f32 %v855_v38, %v663_v18  ;;  %v2597_v21 = vld [vmem:[#allocation3 + $0x488] sm:$0xff]  ;;  %v659_v38 = vmul.f32 0.999, %v467_v57 }
 0x15b   :  { %1958 = vmatpush2.bf16.msra.mxu0 %v1827_v53  ;;  %v3324_v10 = vadd.f32 %v3273_v5, %v664_v2  ;;  %v853_v13 = vmul.f32 0.001, %v2596_v36  ;;  %v665_v8 = vmul.f32 0.999, %v473_v28  ;;  %v470_v53 = vld [vmem:[#allocation6 + $0x4b8] sm:$0xff]  ;;  %v469_v58 = vld [vmem:[#allocation6 + $0x4b0] sm:$0xff] }
 0x15c   :  { %4567 = vst [vmem:[#allocation19_spill] sm:$0xff] %v3327_v55  ;;  %4568 = vst [vmem:[#allocation20_spill] sm:$0xff] %v3329_v37  ;;  %v660_v5 = vmul.f32 0.999, %v468_v49  ;;  %v662_v2 = vmul.f32 0.999, %v470_v53 }
 0x15d   :  { %4566 = vst [vmem:[#allocation18_spill] sm:$0xff] %v3324_v10  ;;  %1376 = vst [vmem:[#allocation9 + $0x4c8] sm:$0xff] %v3324_v10  ;;  %v848_v62 = vmul.f32 0.001, %v2597_v21  ;;  %v3336_v39 = vadd.f32 %v3289_v52, %v665_v8  ;;  %v661_v28 = vmul.f32 0.999, %v469_v58 }
 0x15e   :  { %1378 = vst [vmem:[#allocation9 + $0x4d8] sm:$0xff] %v3327_v55  ;;  %1960 = vmatmul.mubr.bf16.vlgmr.msra.gmra.mxu0 %v1775_v54  ;;  %1375 = vst [vmem:[#allocation9 + $0x4c0] sm:$0xff] %v3329_v37  ;;  %v2598_v18 = vld [vmem:[#allocation3 + $0x498] sm:$0xff]  ;;  %v3340_v12 = vadd.f32 %v3295_v48, %v660_v5  ;;  %v3342_v49 = vadd.f32 %v854_v26, %v662_v2  ;;  %v2600_v53 = vld [vmem:[#allocation3 + $0x490] sm:$0xff]  ;;  %v3347_v54 = vadd.f32 %v851_v46, %v659_v38 }
 0x15f   :  { %4569 = vst [vmem:[#allocation21_spill] sm:$0xff] %v3336_v39  ;;  %v850_v36 = vmul.f32 0.001, %v2598_v18  ;;  %v849_v10 = vmul.f32 0.001, %v2600_v53  ;;  %1377 = vst [vmem:[#allocation9 + $0x4d0] sm:$0xff] %v3336_v39  ;;  %v3349_v57 = vadd.f32 %v853_v13, %v661_v28 }
 0x160   :  { %4570 = vst [vmem:[#allocation22_spill] sm:$0xff] %v3340_v12  ;;  %4571 = vst [vmem:[#allocation23_spill] sm:$0xff] %v3342_v49  ;;  %v464_v8 = vld [vmem:[#allocation6 + $0x488] sm:$0xff]  ;;  %v466_v58 = vld [vmem:[#allocation6 + $0x498] sm:$0xff] }
 0x161   :  { %4572 = vst [vmem:[#allocation24_spill] sm:$0xff] %v3347_v54  ;;  %4573 = vst [vmem:[#allocation25_spill] sm:$0xff] %v3349_v57  ;;  %v656_v48 = vmul.f32 0.999, %v464_v8  ;;  %v658_v26 = vmul.f32 0.999, %v466_v58 }
 0x162   :  { %1372 = vst [vmem:[#allocation9 + $0x4a8] sm:$0xff] %v3340_v12  ;;  %1374 = vst [vmem:[#allocation9 + $0x4b8] sm:$0xff] %v3342_v49  ;;  %v463_v5 = vld [vmem:[#allocation6 + $0x480] sm:$0xff]  ;;  %v465_v2 = vld [vmem:[#allocation6 + $0x490] sm:$0xff] }
 0x163   :  { %1371 = vst [vmem:[#allocation9 + $0x4a0] sm:$0xff] %v3347_v54  ;;  %1373 = vst [vmem:[#allocation9 + $0x4b0] sm:$0xff] %v3349_v57  ;;  %v655_v13 = vmul.f32 0.999, %v463_v5  ;;  %v657_v21 = vmul.f32 0.999, %v465_v2  ;;  %v3359_v52 = vadd.f32 %v848_v62, %v656_v48  ;;  %v3361_v1 = vadd.f32 %v850_v36, %v658_v26 }
 0x164   :  { %v2601_v38 = vld [vmem:[#allocation3 + $0x468] sm:$0xff]  ;;  %v2602_v18 = vld [vmem:[#allocation3 + $0x478] sm:$0xff]  ;;  %v2603_v8 = vld [vmem:[#allocation3 + $0x460] sm:$0xff] }
 0x165   :  { %v844_v28 = vmul.f32 0.001, %v2601_v38  ;;  %v846_v53 = vmul.f32 0.001, %v2602_v18  ;;  %4574 = vst [vmem:[#allocation26_spill] sm:$0xff] %v3359_v52  ;;  %4575 = vst [vmem:[#allocation27_spill] sm:$0xff] %v3361_v1  ;;  %v3363_v37 = vadd.f32 %v847_v33, %v655_v13  ;;  %v3365_v39 = vadd.f32 %v849_v10, %v657_v21 }
 0x166   :  { %v843_v58 = vmul.f32 0.001, %v2603_v8  ;;  %v2604_v12 = vld [vmem:[#allocation3 + $0x470] sm:$0xff]  ;;  %v460_v55 = vld [vmem:[#allocation6 + $0x468] sm:$0xff]  ;;  %v462_v46 = vld [vmem:[#allocation6 + $0x478] sm:$0xff]  ;;  %1368 = vst [vmem:[#allocation9 + $0x488] sm:$0xff] %v3359_v52 }
 0x167   :  { %v845_v49 = vmul.f32 0.001, %v2604_v12  ;;  %4576 = vst [vmem:[#allocation28_spill] sm:$0xff] %v3363_v37  ;;  %4577 = vst [vmem:[#allocation29_spill] sm:$0xff] %v3365_v39  ;;  %v652_v48 = vmul.f32 0.999, %v460_v55 }
 0x168   :  { %1370 = vst [vmem:[#allocation9 + $0x498] sm:$0xff] %v3361_v1  ;;  %v654_v36 = vmul.f32 0.999, %v462_v46  ;;  %v459_v26 = vld [vmem:[#allocation6 + $0x460] sm:$0xff]  ;;  %v461_v5 = vld [vmem:[#allocation6 + $0x470] sm:$0xff]  ;;  %1367 = vst [vmem:[#allocation9 + $0x480] sm:$0xff] %v3363_v37 }
 0x169   :  { %1369 = vst [vmem:[#allocation9 + $0x490] sm:$0xff] %v3365_v39  ;;  %v651_v10 = vmul.f32 0.999, %v459_v26  ;;  %v653_v12 = vmul.f32 0.999, %v461_v5  ;;  %v2605_v2 = vld [vmem:[#allocation3 + $0x448] sm:$0xff]  ;;  %v3375_v18 = vadd.f32 %v844_v28, %v652_v48 }
 0x16a   :  { %v840_v13 = vmul.f32 0.001, %v2605_v2  ;;  %v2606_v21 = vld [vmem:[#allocation3 + $0x458] sm:$0xff]  ;;  %v3377_v8 = vadd.f32 %v846_v53, %v654_v36  ;;  %v2607_v55 = vld [vmem:[#allocation3 + $0x440] sm:$0xff]  ;;  %v2608_v62 = vld [vmem:[#allocation3 + $0x450] sm:$0xff] }
 0x16b   :  { %v842_v38 = vmul.f32 0.001, %v2606_v21  ;;  %4578 = vst [vmem:[#allocation30_spill] sm:$0xff] %v3375_v18  ;;  %v839_v46 = vmul.f32 0.001, %v2607_v55  ;;  %v3379_v1 = vadd.f32 %v843_v58, %v651_v10  ;;  %v3381_v54 = vadd.f32 %v845_v49, %v653_v12  ;;  %v456_v57 = vld [vmem:[#allocation6 + $0x448] sm:$0xff] }
 0x16c   :  { %4579 = vst [vmem:[#allocation31_spill] sm:$0xff] %v3377_v8  ;;  %v841_v52 = vmul.f32 0.001, %v2608_v62  ;;  %v458_v33 = vld [vmem:[#allocation6 + $0x458] sm:$0xff]  ;;  %1364 = vst [vmem:[#allocation9 + $0x468] sm:$0xff] %v3375_v18  ;;  %v455_v36 = vld [vmem:[#allocation6 + $0x440] sm:$0xff] }
 0x16d   :  { %4580 = vst [vmem:[#allocation32_spill] sm:$0xff] %v3379_v1  ;;  %4581 = vst [vmem:[#allocation33_spill] sm:$0xff] %v3381_v54  ;;  %v648_v48 = vmul.f32 0.999, %v456_v57  ;;  %v650_v53 = vmul.f32 0.999, %v458_v33 }
 0x16e   :  { %1366 = vst [vmem:[#allocation9 + $0x478] sm:$0xff] %v3377_v8  ;;  %v457_v26 = vld [vmem:[#allocation6 + $0x450] sm:$0xff]  ;;  %1363 = vst [vmem:[#allocation9 + $0x460] sm:$0xff] %v3379_v1  ;;  %v647_v58 = vmul.f32 0.999, %v455_v36  ;;  %v2609_v5 = vld [vmem:[#allocation3 + $0x428] sm:$0xff] }
 0x16f   :  { %1365 = vst [vmem:[#allocation9 + $0x470] sm:$0xff] %v3381_v54  ;;  %v649_v62 = vmul.f32 0.999, %v457_v26  ;;  %v836_v10 = vmul.f32 0.001, %v2609_v5  ;;  %v2610_v12 = vld [vmem:[#allocation3 + $0x438] sm:$0xff]  ;;  %v3391_v21 = vadd.f32 %v840_v13, %v648_v48  ;;  %v3393_v55 = vadd.f32 %v842_v38, %v650_v53 }
 0x170   :  { %v838_v2 = vmul.f32 0.001, %v2610_v12  ;;  %v2611_v57 = vld [vmem:[#allocation3 + $0x420] sm:$0xff]  ;;  %v2612_v28 = vld [vmem:[#allocation3 + $0x430] sm:$0xff]  ;;  %v3395_v8 = vadd.f32 %v839_v46, %v647_v58  ;;  %v452_v39 = vld [vmem:[#allocation6 + $0x428] sm:$0xff] }
 0x171   :  { %4582 = vst [vmem:[#allocation34_spill] sm:$0xff] %v3391_v21  ;;  %4583 = vst [vmem:[#allocation35_spill] sm:$0xff] %v3393_v55  ;;  %v835_v33 = vmul.f32 0.001, %v2611_v57  ;;  %v837_v18 = vmul.f32 0.001, %v2612_v28  ;;  %v3397_v37 = vadd.f32 %v841_v52, %v649_v62 }
 0x172   :  { %4584 = vst [vmem:[#allocation36_spill] sm:$0xff] %v3395_v8  ;;  %v454_v49 = vld [vmem:[#allocation6 + $0x438] sm:$0xff]  ;;  %1360 = vst [vmem:[#allocation9 + $0x448] sm:$0xff] %v3391_v21  ;;  %v644_v48 = vmul.f32 0.999, %v452_v39  ;;  %v451_v53 = vld [vmem:[#allocation6 + $0x420] sm:$0xff] }
 0x173   :  { %4585 = vst [vmem:[#allocation37_spill] sm:$0xff] %v3397_v37  ;;  %1362 = vst [vmem:[#allocation9 + $0x458] sm:$0xff] %v3393_v55  ;;  %v646_v38 = vmul.f32 0.999, %v454_v49  ;;  %v453_v36 = vld [vmem:[#allocation6 + $0x430] sm:$0xff]  ;;  %v2613_v26 = vld [vmem:[#allocation3 + $0x408] sm:$0xff] }
 0x174   :  { %1359 = vst [vmem:[#allocation9 + $0x440] sm:$0xff] %v3395_v8  ;;  %1361 = vst [vmem:[#allocation9 + $0x450] sm:$0xff] %v3397_v37  ;;  %v643_v46 = vmul.f32 0.999, %v451_v53  ;;  %v645_v28 = vmul.f32 0.999, %v453_v36  ;;  %v3407_v12 = vadd.f32 %v836_v10, %v644_v48 }
 0x175   :  { %v832_v58 = vmul.f32 0.001, %v2613_v26  ;;  %v2614_v62 = vld [vmem:[#allocation3 + $0x418] sm:$0xff]  ;;  %v3409_v57 = vadd.f32 %v838_v2, %v646_v38  ;;  %v2615_v39 = vld [vmem:[#allocation3 + $0x400] sm:$0xff]  ;;  %v2616_v13 = vld [vmem:[#allocation3 + $0x410] sm:$0xff] }
 0x176   :  { %v834_v5 = vmul.f32 0.001, %v2614_v62  ;;  %4586 = vst [vmem:[#allocation38_spill] sm:$0xff] %v3407_v12  ;;  %v831_v49 = vmul.f32 0.001, %v2615_v39  ;;  %v3411_v55 = vadd.f32 %v835_v33, %v643_v46  ;;  %v3413_v1 = vadd.f32 %v837_v18, %v645_v28  ;;  %v448_v54 = vld [vmem:[#allocation6 + $0x408] sm:$0xff] }
 0x177   :  { %4587 = vst [vmem:[#allocation39_spill] sm:$0xff] %v3409_v57  ;;  %v833_v21 = vmul.f32 0.001, %v2616_v13  ;;  %v450_v52 = vld [vmem:[#allocation6 + $0x418] sm:$0xff]  ;;  %1356 = vst [vmem:[#allocation9 + $0x428] sm:$0xff] %v3407_v12  ;;  %v447_v38 = vld [vmem:[#allocation6 + $0x400] sm:$0xff] }
 0x178   :  { %4588 = vst [vmem:[#allocation40_spill] sm:$0xff] %v3411_v55  ;;  %4589 = vst [vmem:[#allocation41_spill] sm:$0xff] %v3413_v1  ;;  %v640_v48 = vmul.f32 0.999, %v448_v54  ;;  %v642_v2 = vmul.f32 0.999, %v450_v52 }
 0x179   :  { %1358 = vst [vmem:[#allocation9 + $0x438] sm:$0xff] %v3409_v57  ;;  %v449_v53 = vld [vmem:[#allocation6 + $0x410] sm:$0xff]  ;;  %1355 = vst [vmem:[#allocation9 + $0x420] sm:$0xff] %v3411_v55  ;;  %v639_v33 = vmul.f32 0.999, %v447_v38  ;;  %v2617_v36 = vld [vmem:[#allocation3 + $0x5e8] sm:$0xff] }
 0x17a   :  { %1357 = vst [vmem:[#allocation9 + $0x430] sm:$0xff] %v3413_v1  ;;  %v641_v13 = vmul.f32 0.999, %v449_v53  ;;  %v892_v46 = vmul.f32 0.001, %v2617_v36  ;;  %v2618_v28 = vld [vmem:[#allocation3 + $0x5f8] sm:$0xff]  ;;  %v3423_v62 = vadd.f32 %v832_v58, %v640_v48  ;;  %v3425_v39 = vadd.f32 %v834_v5, %v642_v2 }
 0x17b   :  { %v894_v26 = vmul.f32 0.001, %v2618_v28  ;;  %v2619_v54 = vld [vmem:[#allocation3 + $0x5e0] sm:$0xff]  ;;  %v2620_v10 = vld [vmem:[#allocation3 + $0x5f0] sm:$0xff]  ;;  %v3427_v57 = vadd.f32 %v831_v49, %v639_v33  ;;  %v508_v37 = vld [vmem:[#allocation6 + $0x5e8] sm:$0xff] }
 0x17c   :  { %4590 = vst [vmem:[#allocation42_spill] sm:$0xff] %v3423_v62  ;;  %4591 = vst [vmem:[#allocation43_spill] sm:$0xff] %v3425_v39  ;;  %v891_v52 = vmul.f32 0.001, %v2619_v54  ;;  %v893_v12 = vmul.f32 0.001, %v2620_v10  ;;  %v3429_v8 = vadd.f32 %v833_v21, %v641_v13 }
 0x17d   :  { %4592 = vst [vmem:[#allocation44_spill] sm:$0xff] %v3427_v57  ;;  %v510_v18 = vld [vmem:[#allocation6 + $0x5f8] sm:$0xff]  ;;  %1352 = vst [vmem:[#allocation9 + $0x408] sm:$0xff] %v3423_v62  ;;  %v700_v48 = vmul.f32 0.999, %v508_v37  ;;  %v507_v2 = vld [vmem:[#allocation6 + $0x5e0] sm:$0xff] }
 0x17e   :  { %4593 = vst [vmem:[#allocation45_spill] sm:$0xff] %v3429_v8  ;;  %1354 = vst [vmem:[#allocation9 + $0x418] sm:$0xff] %v3425_v39  ;;  %v702_v5 = vmul.f32 0.999, %v510_v18  ;;  %v509_v38 = vld [vmem:[#allocation6 + $0x5f0] sm:$0xff]  ;;  %v2621_v53 = vld [vmem:[#allocation3 + $0x5c8] sm:$0xff] }
 0x17f   :  { %1351 = vst [vmem:[#allocation9 + $0x400] sm:$0xff] %v3427_v57  ;;  %1353 = vst [vmem:[#allocation9 + $0x410] sm:$0xff] %v3429_v8  ;;  %v699_v49 = vmul.f32 0.999, %v507_v2  ;;  %v701_v10 = vmul.f32 0.999, %v509_v38  ;;  %v3439_v28 = vadd.f32 %v892_v46, %v700_v48 }
 0x180   :  { %v888_v33 = vmul.f32 0.001, %v2621_v53  ;;  %v2622_v13 = vld [vmem:[#allocation3 + $0x5d8] sm:$0xff]  ;;  %v3441_v54 = vadd.f32 %v894_v26, %v702_v5  ;;  %v2623_v37 = vld [vmem:[#allocation3 + $0x5c0] sm:$0xff]  ;;  %v2624_v58 = vld [vmem:[#allocation3 + $0x5d0] sm:$0xff] }
 0x181   :  { %v890_v36 = vmul.f32 0.001, %v2622_v13  ;;  %4594 = vst [vmem:[#allocation46_spill] sm:$0xff] %v3439_v28  ;;  %v887_v18 = vmul.f32 0.001, %v2623_v37  ;;  %v3443_v39 = vadd.f32 %v891_v52, %v699_v49  ;;  %v3445_v55 = vadd.f32 %v893_v12, %v701_v10  ;;  %v504_v1 = vld [vmem:[#allocation6 + $0x5c8] sm:$0xff] }
 0x182   :  { %4595 = vst [vmem:[#allocation47_spill] sm:$0xff] %v3441_v54  ;;  %v889_v62 = vmul.f32 0.001, %v2624_v58  ;;  %v506_v21 = vld [vmem:[#allocation6 + $0x5d8] sm:$0xff]  ;;  %1412 = vst [vmem:[#allocation9 + $0x5e8] sm:$0xff] %v3439_v28  ;;  %v503_v5 = vld [vmem:[#allocation6 + $0x5c0] sm:$0xff] }
 0x183   :  { %4596 = vst [vmem:[#allocation48_spill] sm:$0xff] %v3443_v39  ;;  %4597 = vst [vmem:[#allocation49_spill] sm:$0xff] %v3445_v55  ;;  %v696_v26 = vmul.f32 0.999, %v504_v1  ;;  %v698_v48 = vmul.f32 0.999, %v506_v21 }
 0x184   :  { %1414 = vst [vmem:[#allocation9 + $0x5f8] sm:$0xff] %v3441_v54  ;;  %v505_v38 = vld [vmem:[#allocation6 + $0x5d0] sm:$0xff]  ;;  %v2625_v53 = vld [vmem:[#allocation3 + $0x5a8] sm:$0xff]  ;;  %1411 = vst [vmem:[#allocation9 + $0x5e0] sm:$0xff] %v3443_v39  ;;  %v695_v52 = vmul.f32 0.999, %v503_v5 }
 0x185   :  { %v884_v58 = vmul.f32 0.001, %v2625_v53  ;;  %1413 = vst [vmem:[#allocation9 + $0x5f0] sm:$0xff] %v3445_v55  ;;  %v697_v49 = vmul.f32 0.999, %v505_v38  ;;  %v2626_v10 = vld [vmem:[#allocation3 + $0x5b8] sm:$0xff]  ;;  %v3455_v46 = vadd.f32 %v888_v33, %v696_v26  ;;  %v3457_v1 = vadd.f32 %v890_v36, %v698_v48 }
 0x186   :  { %v886_v13 = vmul.f32 0.001, %v2626_v10  ;;  %v2627_v37 = vld [vmem:[#allocation3 + $0x5a0] sm:$0xff]  ;;  %v2628_v21 = vld [vmem:[#allocation3 + $0x5b0] sm:$0xff]  ;;  %v2629_v53 = vld [vmem:[#allocation3 + $0x588] sm:$0xff]  ;;  %v3459_v57 = vadd.f32 %v887_v18, %v695_v52 }
 0x187   :  { %v883_v2 = vmul.f32 0.001, %v2627_v37  ;;  %4598 = vst [vmem:[#allocation50_spill] sm:$0xff] %v3455_v46  ;;  %4599 = vst [vmem:[#allocation51_spill] sm:$0xff] %v3457_v1  ;;  %v885_v28 = vmul.f32 0.001, %v2628_v21  ;;  %v3461_v8 = vadd.f32 %v889_v62, %v697_v49 }
 0x188   :  { %v880_v54 = vmul.f32 0.001, %v2629_v53  ;;  %4600 = vst [vmem:[#allocation52_spill] sm:$0xff] %v3459_v57  ;;  %v502_v12 = vld [vmem:[#allocation6 + $0x5b8] sm:$0xff]  ;;  %1408 = vst [vmem:[#allocation9 + $0x5c8] sm:$0xff] %v3455_v46  ;;  %v499_v48 = vld [vmem:[#allocation6 + $0x5a0] sm:$0xff] }
 0x189   :  { %4601 = vst [vmem:[#allocation53_spill] sm:$0xff] %v3461_v8  ;;  %1410 = vst [vmem:[#allocation9 + $0x5d8] sm:$0xff] %v3457_v1  ;;  %v692_v26 = vmul.f32 0.999, %v500_v6  ;;  %v694_v36 = vmul.f32 0.999, %v502_v12 }
 0x18a   :  { %v501_v5 = vld [vmem:[#allocation6 + $0x5b0] sm:$0xff]  ;;  %v2630_v38 = vld [vmem:[#allocation3 + $0x598] sm:$0xff]  ;;  %1407 = vst [vmem:[#allocation9 + $0x5c0] sm:$0xff] %v3459_v57  ;;  %1409 = vst [vmem:[#allocation9 + $0x5d0] sm:$0xff] %v3461_v8  ;;  %v691_v18 = vmul.f32 0.999, %v499_v48 }
 0x18b   :  { %v882_v10 = vmul.f32 0.001, %v2630_v38  ;;  %v693_v52 = vmul.f32 0.999, %v501_v5  ;;  %v2631_v49 = vld [vmem:[#allocation3 + $0x580] sm:$0xff]  ;;  %v2632_v21 = vld [vmem:[#allocation3 + $0x590] sm:$0xff]  ;;  %v3471_v33 = vadd.f32 %v884_v58, %v692_v26  ;;  %v3473_v6 = vadd.f32 %v886_v13, %v694_v36 }
 0x18c   :  { %v879_v37 = vmul.f32 0.001, %v2631_v49  ;;  %v881_v53 = vmul.f32 0.001, %v2632_v21  ;;  %v2633_v12 = vld [vmem:[#allocation3 + $0x568] sm:$0xff]  ;;  %v4604_v38 = vlaneseq  ;;  %v3478_v39 = vadd.f32 %v883_v2, %v691_v18  ;;  %v498_v48 = vld [vmem:[#allocation6 + $0x598] sm:$0xff] }
 0x18d   :  { %4602 = vst [vmem:[#allocation54_spill] sm:$0xff] %v3471_v33  ;;  %4603 = vst [vmem:[#allocation55_spill] sm:$0xff] %v3473_v6  ;;  %v876_v46 = vmul.f32 0.001, %v2633_v12  ;;  %v3480_v55 = vadd.f32 %v885_v28, %v693_v52  ;;  %v496_v62 = vld [vmem:[#allocation6 + $0x588] sm:$0xff]  ;;  %v495_v36 = vld [vmem:[#allocation6 + $0x580] sm:$0xff] }
 0x18e   :  { %v3476_v1 = vshrl.u32 %v4604_v38, 7  ;;  %4606 = vst [vmem:[#allocation57_spill] sm:$0xff] %v3478_v39  ;;  %1404 = vst [vmem:[#allocation9 + $0x5a8] sm:$0xff] %v3471_v33  ;;  %v688_v13 = vmul.f32 0.999, %v496_v62  ;;  %v497_v5 = vld [vmem:[#allocation6 + $0x590] sm:$0xff] }
 0x18f   :  { %4607 = vst [vmem:[#allocation58_spill] sm:$0xff] %v3480_v55  ;;  %1406 = vst [vmem:[#allocation9 + $0x5b8] sm:$0xff] %v3473_v6  ;;  %v690_v26 = vmul.f32 0.999, %v498_v48  ;;  %v2634_v49 = vld [vmem:[#allocation3 + $0x578] sm:$0xff]  ;;  %v2635_v52 = vld [vmem:[#allocation3 + $0x560] sm:$0xff] }
 0x190   :  { %4605 = vst [vmem:[#allocation56_spill] sm:$0xff] %v3476_v1  ;;  %v878_v21 = vmul.f32 0.001, %v2634_v49  ;;  %1403 = vst [vmem:[#allocation9 + $0x5a0] sm:$0xff] %v3478_v39  ;;  %v687_v2 = vmul.f32 0.999, %v495_v36  ;;  %v3490_v58 = vadd.f32 %v880_v54, %v688_v13 }
 0x191   :  { %1405 = vst [vmem:[#allocation9 + $0x5b0] sm:$0xff] %v3480_v55  ;;  %v689_v18 = vmul.f32 0.999, %v497_v5  ;;  %v875_v12 = vmul.f32 0.001, %v2635_v52  ;;  %v2636_v57 = vld [vmem:[#allocation3 + $0x570] sm:$0xff]  ;;  %v3492_v62 = vadd.f32 %v882_v10, %v690_v26 }
 0x192   :  { %v877_v8 = vmul.f32 0.001, %v2636_v57  ;;  %4608 = vst [vmem:[#allocation59_spill] sm:$0xff] %v3490_v58  ;;  %v3497_v48 = vld [vmem:[%s4487_s4] sm:$0x3]  ;;  %v3500_v49 = vsub.s32 0, %v3476_v1  ;;  %v3503_v36 = vadd.f32 %v879_v37, %v687_v2 }
 0x193   :  { %4609 = vst [vmem:[#allocation60_spill] sm:$0xff] %v3492_v62  ;;  %4610 = vst [vmem:[#allocation61_spill] sm:$0xff] %v3497_v48  ;;  %v3505_v5 = vadd.f32 %v881_v53, %v689_v18  ;;  %v492_v52 = vld [vmem:[#allocation6 + $0x568] sm:$0xff]  ;;  %v494_v57 = vld [vmem:[#allocation6 + $0x578] sm:$0xff] }
 0x194   :  { %4611 = vst [vmem:[#allocation62_spill] sm:$0xff] %v3500_v49  ;;  %4612 = vst [vmem:[#allocation63_spill] sm:$0xff] %v3503_v36  ;;  %v684_v10 = vmul.f32 0.999, %v492_v52  ;;  %v686_v13 = vmul.f32 0.999, %v494_v57 }
 0x195   :  { %4613 = vst [vmem:[#allocation64_spill] sm:$0xff] %v3505_v5  ;;  %1400 = vst [vmem:[#allocation9 + $0x588] sm:$0xff] %v3490_v58  ;;  %v491_v26 = vld [vmem:[#allocation6 + $0x560] sm:$0xff]  ;;  %v493_v39 = vld [vmem:[#allocation6 + $0x570] sm:$0xff] }
 0x196   :  { %1402 = vst [vmem:[#allocation9 + $0x598] sm:$0xff] %v3492_v62  ;;  %v2637_v55 = vld [vmem:[#allocation3 + $0x548] sm:$0xff]  ;;  %1399 = vst [vmem:[#allocation9 + $0x580] sm:$0xff] %v3503_v36  ;;  %v683_v53 = vmul.f32 0.999, %v491_v26  ;;  %v2638_v18 = vld [vmem:[#allocation3 + $0x558] sm:$0xff]  ;;  %v3515_v54 = vadd.f32 %v876_v46, %v684_v10  ;;  %v3517_v52 = vadd.f32 %v878_v21, %v686_v13 }
 0x197   :  { %v872_v33 = vmul.f32 0.001, %v2637_v55  ;;  %1401 = vst [vmem:[#allocation9 + $0x590] sm:$0xff] %v3505_v5  ;;  %v685_v2 = vmul.f32 0.999, %v493_v39  ;;  %v2639_v6 = vld [vmem:[#allocation3 + $0x540] sm:$0xff]  ;;  %v1565_v55 = vrot.slane %v3497_v48, %v3500_v49 }
 0x198   :  { %v874_v28 = vmul.f32 0.001, %v2638_v18  ;;  %v871_v38 = vmul.f32 0.001, %v2639_v6  ;;  %4614 = vst [vmem:[#allocation65_spill] sm:$0xff] %v3515_v54  ;;  %4615 = vst [vmem:[#allocation66_spill] sm:$0xff] %v3517_v52  ;;  %v3521_v62 = vadd.f32 %v875_v12, %v683_v53 }
 0x199   :  { %v2640_v57 = vld [vmem:[#allocation3 + $0x550] sm:$0xff]  ;;  %v3523_v29 = vadd.f32 %v877_v8, %v685_v2  ;;  %v488_v37 = vld [vmem:[#allocation6 + $0x548] sm:$0xff]  ;;  %v490_v26 = vld [vmem:[#allocation6 + $0x558] sm:$0xff]  ;;  %v4616_v39 = vsub.s32 1, %v3476_v1  ;;  %1396 = vst [vmem:[#allocation9 + $0x568] sm:$0xff] %v3515_v54 }
 0x19a   :  { %v873_v58 = vmul.f32 0.001, %v2640_v57  ;;  %1398 = vst [vmem:[#allocation9 + $0x578] sm:$0xff] %v3517_v52  ;;  %v680_v6 = vmul.f32 0.999, %v488_v37  ;;  %v487_v10 = vld [vmem:[#allocation6 + $0x540] sm:$0xff] }
 0x19b   :  { %v1569_v18 = vrot.slane %v3497_v48, %v4616_v39  ;;  %v682_v21 = vmul.f32 0.999, %v490_v26  ;;  %v489_v12 = vld [vmem:[#allocation6 + $0x550] sm:$0xff]  ;;  %v2641_v13 = vld [vmem:[#allocation3 + $0x528] sm:$0xff]  ;;  %1395 = vst [vmem:[#allocation9 + $0x560] sm:$0xff] %v3521_v62  ;;  %1397 = vst [vmem:[#allocation9 + $0x570] sm:$0xff] %v3523_v29 }
 0x19c   :  { %v868_v8 = vmul.f32 0.001, %v2641_v13  ;;  %v679_v2 = vmul.f32 0.999, %v487_v10  ;;  %v681_v57 = vmul.f32 0.999, %v489_v12  ;;  %v3536_v46 = vadd.f32 %v872_v33, %v680_v6 }
 0x19d   :  { %v2642_v39 = vld [vmem:[#allocation3 + $0x538] sm:$0xff]  ;;  %v2643_v49 = vld [vmem:[#allocation3 + $0x520] sm:$0xff]  ;;  %v3538_v37 = vadd.f32 %v874_v28, %v682_v21  ;;  %v2644_v26 = vld [vmem:[#allocation3 + $0x530] sm:$0xff]  ;;  %v1607_v13 = vadd.f32 %v3257_v41, %v1565_v55  ;;  %v1609_v10 = vadd.f32 %v3268_v25, %v1569_v18 }
 0x19e   :  { %v870_v1 = vmul.f32 0.001, %v2642_v39  ;;  %v867_v36 = vmul.f32 0.001, %v2643_v49  ;;  %4617 = vst [vmem:[#allocation67_spill] sm:$0xff] %v3536_v46  ;;  %v3541_v52 = vadd.f32 %v871_v38, %v679_v2  ;;  %v3543_v5 = vadd.f32 %v873_v58, %v681_v57  ;;  %v484_v48 = vld [vmem:[#allocation6 + $0x528] sm:$0xff] }
 0x19f   :  { %4618 = vst [vmem:[#allocation68_spill] sm:$0xff] %v3538_v37  ;;  %v869_v54 = vmul.f32 0.001, %v2644_v26  ;;  %v486_v53 = vld [vmem:[#allocation6 + $0x538] sm:$0xff]  ;;  %1392 = vst [vmem:[#allocation9 + $0x548] sm:$0xff] %v3536_v46  ;;  %v483_v6 = vld [vmem:[#allocation6 + $0x520] sm:$0xff] }
 0x1a0   :  { %1394 = vst [vmem:[#allocation9 + $0x558] sm:$0xff] %v3538_v37  ;;  %v676_v28 = vmul.f32 0.999, %v484_v48  ;;  %v678_v49 = vmul.f32 0.999, %v486_v53  ;;  %v485_v21 = vld [vmem:[#allocation6 + $0x530] sm:$0xff] }
 0x1a1   :  { %v2645_v41 = vld [vmem:[#allocation3 + $0x508] sm:$0xff]  ;;  %1391 = vst [vmem:[#allocation9 + $0x540] sm:$0xff] %v3541_v52  ;;  %1393 = vst [vmem:[#allocation9 + $0x550] sm:$0xff] %v3543_v5  ;;  %v675_v58 = vmul.f32 0.999, %v483_v6  ;;  %v2646_v18 = vld [vmem:[#allocation3 + $0x518] sm:$0xff]  ;;  %v1650_v6 = vadd.f32 %v3285_v22, %v1609_v10 }
 0x1a2   :  { %v864_v38 = vmul.f32 0.001, %v2645_v41  ;;  %v677_v55 = vmul.f32 0.999, %v485_v21  ;;  %v866_v12 = vmul.f32 0.001, %v2646_v18  ;;  %v3554_v39 = vadd.f32 %v868_v8, %v676_v28  ;;  %v1688_v21 = vpop.f32.mrf.mxu0 }
 0x1a3   :  { %v2647_v2 = vld [vmem:[#allocation3 + $0x500] sm:$0xff]  ;;  %v3556_v48 = vadd.f32 %v870_v1, %v678_v49  ;;  %v2648_v53 = vld [vmem:[#allocation3 + $0x510] sm:$0xff]  ;;  %v1648_v41 = vadd.f32 %v3275_v47, %v1607_v13  ;;  %v3559_v33 = vadd.f32 %v867_v36, %v675_v58  ;;  %v480_v37 = vld [vmem:[#allocation6 + $0x508] sm:$0xff] }
 0x1a4   :  { %v863_v57 = vmul.f32 0.001, %v2647_v2  ;;  %v865_v26 = vmul.f32 0.001, %v2648_v53  ;;  %v3561_v46 = vadd.f32 %v869_v54, %v677_v55  ;;  %v482_v25 = vld [vmem:[#allocation6 + $0x518] sm:$0xff]  ;;  %1388 = vst [vmem:[#allocation9 + $0x528] sm:$0xff] %v3554_v39  ;;  %v1690_v10 = vpop.f32.mrf.mxu0 }
 0x1a5   :  { %1390 = vst [vmem:[#allocation9 + $0x538] sm:$0xff] %v3556_v48  ;;  %v1862_v1 = vpack.c.bf16 %v3556_v48, %v3554_v39  ;;  %v672_v8 = vmul.f32 0.999, %v480_v37  ;;  %v674_v28 = vmul.f32 0.999, %v482_v25  ;;  %v479_v49 = vld [vmem:[#allocation6 + $0x500] sm:$0xff]  ;;  %v1689_v36 = vadd.f32 %v1688_v21, %v1648_v41 }
 0x1a6   :  { %v481_v47 = vld [vmem:[#allocation6 + $0x510] sm:$0xff]  ;;  %1387 = vst [vmem:[#allocation9 + $0x520] sm:$0xff] %v3559_v33  ;;  %1389 = vst [vmem:[#allocation9 + $0x530] sm:$0xff] %v3561_v46  ;;  %v1861_v22 = vpack.c.bf16 %v3561_v46, %v3559_v33  ;;  %v671_v54 = vmul.f32 0.999, %v479_v49  ;;  %v1691_v18 = vadd.f32 %v1690_v10, %v1650_v6  ;;  %v1692_v53 = vpop.f32.mrf.mxu0  ;;  %v1768_v41 = vld [vmem:[%s4564_s24 + $0x8] sm:$0xff]  ;;  %v4619_v10 = vpack.c.bf16 %v3069_v24, %v3067_v23 }
 0x1a7   :  { %v673_v13 = vmul.f32 0.999, %v481_v47  ;;  %v3572_v58 = vadd.f32 %v864_v38, %v672_v8  ;;  %v3574_v55 = vadd.f32 %v866_v12, %v674_v28  ;;  %v1695_v2 = vmax.f32 %v1689_v36, 0.0  ;;  %v2649_v21 = vld [vmem:[#allocation9 + $0xe0] sm:$0xff]  ;;  %v2650_v8 = vld [vmem:[#allocation9 + $0xf0] sm:$0xff]  ;;  %v2682_v46 = vld [vmem:[%s4488_s5 + $0xf8] sm:$0xff] }
 0x1a8   :  { %v3576_v37 = vadd.f32 %v863_v57, %v671_v54  ;;  %v1696_v12 = vmax.f32 %v1691_v18, 0.0  ;;  %v1793_v28 = vpack.c.bf16 %v2650_v8, %v2649_v21  ;;  %v1774_v49 = vpack.c.bf16 %v1768_v41, %v1768_v41  ;;  %v2651_v36 = vld [vmem:[#allocation9 + $0xc0] sm:$0xff]  ;;  %v2652_v54 = vld [vmem:[#allocation9 + $0xd0] sm:$0xff] }
 0x1a9   :  { %v3578_v25 = vadd.f32 %v865_v26, %v673_v13  ;;  %1384 = vst [vmem:[#allocation9 + $0x508] sm:$0xff] %v3572_v58  ;;  %1386 = vst [vmem:[#allocation9 + $0x518] sm:$0xff] %v3574_v55  ;;  %v1860_v38 = vpack.c.bf16 %v3574_v55, %v3572_v58  ;;  %v1693_v26 = vpop.f32.mrf.mxu0  ;;  %v1697_v47 = vpack.c.bf16 %v1695_v2, %v1695_v2  ;;  %v2653_v18 = vld [vmem:[#allocation9 + $0xa0] sm:$0xff]  ;;  %v2654_v53 = vld [vmem:[#allocation9 + $0xb0] sm:$0xff]  ;;  %v1186_v33 = vmul.f32 0.001, %v2682_v46 }
 0x1aa   :  { %1383 = vst [vmem:[#allocation9 + $0x500] sm:$0xff] %v3576_v37  ;;  %v1698_v6 = vpack.c.bf16 %v1696_v12, %v1696_v12  ;;  %v1791_v13 = vpack.c.bf16 %v2652_v54, %v2651_v36  ;;  %v1789_v12 = vpack.c.bf16 %v2654_v53, %v2653_v18  ;;  %v4620_v26 = vpack.c.bf16 %v3081_v43, %v3077_v34  ;;  %v2655_v2 = vld [vmem:[#allocation9 + $0x80] sm:$0xff]  ;;  %v2656_v41 = vld [vmem:[#allocation9 + $0x90] sm:$0xff] }
 0x1ab   :  { %1385 = vst [vmem:[#allocation9 + $0x510] sm:$0xff] %v3578_v25  ;;  %v1859_v57 = vpack.c.bf16 %v3578_v25, %v3576_v37  ;;  %v4621_v21 = vpack.c.bf16 %v3096_v7, %v3091_v59  ;;  %v2657_v8 = vld [vmem:[#allocation9 + $0x60] sm:$0xff]  ;;  %v2658_v23 = vld [vmem:[#allocation9 + $0x70] sm:$0xff]  ;;  %v4624_v54 = vpack.c.bf16 %v3140_v30, %v3135_v17  ;;  %v4626_v53 = vpack.c.bf16 %v3168_v27, %v3163_v4  ;;  %v2686_v37 = vld [vmem:[%s4488_s5 + $0xe8] sm:$0xff] }
 0x1ac   :  { %1753 = vmatprep.mubr.bf16.mxu1 %v1698_v6  ;;  %v1787_v6 = vpack.c.bf16 %v2656_v41, %v2655_v2  ;;  %v1785_v24 = vpack.c.bf16 %v2658_v23, %v2657_v8  ;;  %v2660_v34 = vld [vmem:[#allocation9 + $0x50] sm:$0xff]  ;;  %v2661_v36 = vld [vmem:[#allocation9 + $0x20] sm:$0xff]  ;;  %v4628_v41 = vpack.c.bf16 %v3196_v60, %v3191_v45  ;;  %v4630_v23 = vpack.c.bf16 %v3224_v19, %v3219_v15 }
 0x1ad   :  { %1754 = vmatmul.mubr.bf16.vlgmr.msra.gmra.mxu1 %v1697_v47  ;;  %v4623_v47 = vpack.c.bf16 %v3126_v61, %v3121_v50  ;;  %v2662_v59 = vld [vmem:[#allocation9 + $0x30] sm:$0xff]  ;;  %v2665_v18 = vld [vmem:[#allocation9 + $0x1e0] sm:$0xff]  ;;  %v3778_v25 = vmul.f32 0.001, %v2686_v37 }
 0x1ae   :  { %1887 = vmatpush1.bf16.msra.mxu1 %v1793_v28  ;;  %1918 = vmatprep.mubr.bf16.mxu1 %v1774_v49  ;;  %v4622_v28 = vpack.c.bf16 %v3112_v32, %v3107_v20  ;;  %v2659_v49 = vld [vmem:[#allocation9 + $0x40] sm:$0xff]  ;;  %v1781_v7 = vpack.c.bf16 %v2662_v59, %v2661_v36  ;;  %v2664_v20 = vld [vmem:[#allocation9 + $0x10] sm:$0xff]  ;;  %v4635_v59 = vld [vmem:[#allocation17_spill] sm:$0xff] }
 0x1af   :  { %1888 = vmatprep.subr.bf16.mxu1 %v4619_v10  ;;  %v1783_v43 = vpack.c.bf16 %v2660_v34, %v2659_v49  ;;  %v4625_v10 = vpack.c.bf16 %v3154_v3, %v3149_v51  ;;  %v2666_v50 = vld [vmem:[#allocation9 + $0x1f0] sm:$0xff]  ;;  %v2669_v2 = vld [vmem:[#allocation9 + $0x1a0] sm:$0xff]  ;;  %v4632_v34 = vpack.c.bf16 %v3260_v44, %v3251_v11  ;;  %v4634_v44 = vpack.c.bf16 %v3301_v40, %v3298_v42  ;;  %v4647_v42 = vld [vmem:[#allocation61_spill] sm:$0xff] }
 0x1b0   :  { %v1809_v61 = vpack.c.bf16 %v2666_v50, %v2665_v18  ;;  %v2668_v17 = vld [vmem:[#allocation9 + $0x1d0] sm:$0xff]  ;;  %v2673_v8 = vld [vmem:[#allocation9 + $0x160] sm:$0xff]  ;;  %v4644_v18 = vld [vmem:[#allocation23_spill] sm:$0xff]  ;;  %v1089_v40 = vmul.f32 0.001, %v4647_v42 }
 0x1b1   :  { %v2670_v51 = vld [vmem:[#allocation9 + $0x1b0] sm:$0xff]  ;;  %v2677_v49 = vld [vmem:[#allocation9 + $0x120] sm:$0xff]  ;;  %v4691_v42 = vld [vmem:[#allocation53_spill] sm:$0xff] }
 0x1b2   :  { %1889 = vmatpush1.bf16.msra.mxu1 %v1791_v13  ;;  %v2663_v13 = vld [vmem:[#allocation9] sm:$0xff]  ;;  %v1805_v3 = vpack.c.bf16 %v2670_v51, %v2669_v2  ;;  %v2672_v4 = vld [vmem:[#allocation9 + $0x190] sm:$0xff] }
 0x1b3   :  { %1890 = vmatprep.subr.bf16.mxu1 %v4620_v26  ;;  %v1779_v32 = vpack.c.bf16 %v2664_v20, %v2663_v13  ;;  %v4627_v26 = vpack.c.bf16 %v3182_v16, %v3177_v63  ;;  %v2674_v63 = vld [vmem:[#allocation9 + $0x170] sm:$0xff]  ;;  %v4638_v13 = vld [vmem:[#allocation19_spill] sm:$0xff]  ;;  %v4641_v20 = vld [vmem:[#allocation21_spill] sm:$0xff] }
 0x1b4   :  { %v1801_v16 = vpack.c.bf16 %v2674_v63, %v2673_v8  ;;  %v2676_v45 = vld [vmem:[#allocation9 + $0x150] sm:$0xff]  ;;  %v4658_v8 = vld [vmem:[#allocation31_spill] sm:$0xff]  ;;  %v2685_v58 = vld [vmem:[%s4488_s5 + $0xe0] sm:$0xff] }
 0x1b5   :  { %v2680_v15 = vld [vmem:[#allocation9 + $0x110] sm:$0xff]  ;;  %v3773_v55 = vmul.f32 0.001, %v2685_v58  ;;  %v1103_v58 = vld [vmem:[#allocation8 + $0x60] sm:$0xff] }
 0x1b6   :  { %1891 = vmatpush1.bf16.msra.mxu1 %v1789_v12  ;;  %v2667_v12 = vld [vmem:[#allocation9 + $0x1c0] sm:$0xff]  ;;  %v4645_v50 = vld [vmem:[#allocation22_spill] sm:$0xff] }
 0x1b7   :  { %1892 = vmatprep.subr.bf16.mxu1 %v4621_v21  ;;  %v1807_v30 = vpack.c.bf16 %v2668_v17, %v2667_v12  ;;  %v4629_v21 = vpack.c.bf16 %v3210_v14, %v3205_v0  ;;  %v2678_v0 = vld [vmem:[#allocation9 + $0x130] sm:$0xff]  ;;  %v4649_v12 = vld [vmem:[#allocation24_spill] sm:$0xff] }
 0x1b8   :  { %v1797_v14 = vpack.c.bf16 %v2678_v0, %v2677_v49  ;;  %v4652_v2 = vld [vmem:[#allocation26_spill] sm:$0xff]  ;;  %v4667_v0 = vld [vmem:[#allocation37_spill] sm:$0xff] }
 0x1b9   :  { %v4659_v63 = vld [vmem:[#allocation30_spill] sm:$0xff] }
 0x1ba   :  { %1893 = vmatpush1.bf16.msra.mxu1 %v1787_v6  ;;  %v2671_v6 = vld [vmem:[#allocation9 + $0x180] sm:$0xff]  ;;  %v2683_v39 = vld [vmem:[%s4488_s5 + $0x70] sm:$0xff] }
 0x1bb   :  { %1894 = vmatprep.subr.bf16.mxu1 %v4622_v28  ;;  %v1803_v27 = vpack.c.bf16 %v2672_v4, %v2671_v6  ;;  %v4631_v28 = vpack.c.bf16 %v3240_v9, %v3233_v35  ;;  %v4633_v35 = vpack.c.bf16 %v3283_v31, %v3280_v56  ;;  %v1772_v9 = vld [vmem:[%s4564_s24 + $0x28] sm:$0xff]  ;;  %v4639_v56 = vld [vmem:[#allocation18_spill] sm:$0xff]  ;;  %v3763_v48 = vmul.f32 0.001, %v2683_v39  ;;  %v1119_v39 = vld [vmem:[#allocation8 + $0xe0] sm:$0xff] }
 0x1bc   :  { %v1778_v11 = vpack.c.bf16 %v1772_v9, %v1772_v9  ;;  %v4640_v31 = vpack.c.bf16 %v4638_v13, %v4639_v56  ;;  %v4655_v4 = vld [vmem:[#allocation29_spill] sm:$0xff]  ;;  %v4682_v13 = vld [vmem:[#allocation47_spill] sm:$0xff]  ;;  %v4683_v56 = vld [vmem:[#allocation46_spill] sm:$0xff] }
 0x1be   :  { %1895 = vmatpush1.bf16.msra.mxu1 %v1785_v24  ;;  %v2675_v24 = vld [vmem:[#allocation9 + $0x140] sm:$0xff] }
 0x1bf   :  { %1896 = vmatprep.subr.bf16.mxu1 %v4623_v47  ;;  %v1799_v60 = vpack.c.bf16 %v2676_v45, %v2675_v24  ;;  %v1767_v47 = vld [vmem:[%s4564_s24] sm:$0xff] }
 0x1c0   :  { %v1773_v36 = vpack.c.bf16 %v1767_v47, %v1767_v47  ;;  %v4662_v24 = vld [vmem:[#allocation32_spill] sm:$0xff]  ;;  %v4673_v47 = vld [vmem:[#allocation41_spill] sm:$0xff] }
 0x1c2   :  { %1897 = vmatpush1.bf16.msra.mxu1 %v1783_v43  ;;  %v2679_v43 = vld [vmem:[#allocation9 + $0x100] sm:$0xff] }
 0x1c3   :  { %1898 = vmatprep.subr.bf16.mxu1 %v4624_v54  ;;  %v1795_v19 = vpack.c.bf16 %v2680_v15, %v2679_v43  ;;  %v4670_v43 = vld [vmem:[#allocation39_spill] sm:$0xff]  ;;  %v4671_v15 = vld [vmem:[#allocation38_spill] sm:$0xff] }
 0x1c6   :  { %1899 = vmatpush1.bf16.msra.mxu1 %v1781_v7  ;;  %v4636_v7 = vld [vmem:[#allocation16_spill] sm:$0xff] }
 0x1c7   :  { %1900 = vmatprep.subr.bf16.mxu1 %v4625_v10  ;;  %v4637_v54 = vpack.c.bf16 %v4635_v59, %v4636_v7  ;;  %v4679_v59 = vld [vmem:[#allocation45_spill] sm:$0xff]  ;;  %v4680_v7 = vld [vmem:[#allocation44_spill] sm:$0xff] }
 0x1ca   :  { %1901 = vmatpush1.bf16.msra.mxu1 %v1779_v32  ;;  %v4642_v32 = vld [vmem:[#allocation20_spill] sm:$0xff] }
 0x1cb   :  { %1902 = vmatprep.subr.bf16.mxu1 %v4626_v53  ;;  %v4643_v10 = vpack.c.bf16 %v4641_v20, %v4642_v32  ;;  %v4648_v53 = vld [vmem:[#allocation25_spill] sm:$0xff]  ;;  %v4686_v32 = vld [vmem:[#allocation48_spill] sm:$0xff] }
 0x1cc   :  { %v4650_v17 = vpack.c.bf16 %v4648_v53, %v4649_v12  ;;  %v4685_v20 = vld [vmem:[#allocation49_spill] sm:$0xff]  ;;  %v4694_v12 = vld [vmem:[#allocation55_spill] sm:$0xff] }
 0x1ce   :  { %1903 = vmatpush2.bf16.msra.mxu1 %v1809_v61  ;;  %v4646_v61 = vpack.c.bf16 %v4644_v18, %v4645_v50  ;;  %v4688_v18 = vld [vmem:[#allocation51_spill] sm:$0xff]  ;;  %v4689_v50 = vld [vmem:[#allocation50_spill] sm:$0xff] }
 0x1cf   :  { %1904 = vmatprep.subr.bf16.mxu1 %v4627_v26  ;;  %v4651_v26 = vld [vmem:[#allocation27_spill] sm:$0xff] }
 0x1d0   :  { %v4653_v51 = vpack.c.bf16 %v4651_v26, %v4652_v2  ;;  %v4697_v26 = vld [vmem:[#allocation58_spill] sm:$0xff]  ;;  %v4698_v2 = vld [vmem:[#allocation57_spill] sm:$0xff] }
 0x1d2   :  { %1905 = vmatpush2.bf16.msra.mxu1 %v1807_v30  ;;  %v1087_v30 = vld [vmem:[%s4491_s8] sm:$0x3] }
 0x1d3   :  { %1906 = vmatprep.subr.bf16.mxu1 %v4628_v41  ;;  %v4654_v41 = vlaneseq }
 0x1d5   :  { %vm1417_vm0 = vcmp.lt.s32.totalorder %v4654_v41, 256  ;;  %v4701_v41 = vld [vmem:[#allocation59_spill] sm:$0xff] }
 0x1d6   :  { %1907 = vmatpush2.bf16.msra.mxu1 %v1805_v3  ;;  %v1088_v3 = vmul.f32 0.999, %v1087_v30 }
 0x1d7   :  { %1908 = vmatprep.subr.bf16.mxu1 %v4629_v21 }
 0x1d8   :  { %v3668_v6 = vadd.f32 %v1089_v40, %v1088_v3  ;;  %v4692_v40 = vld [vmem:[#allocation52_spill] sm:$0xff] }
 0x1d9   :  { %v4693_v53 = vpack.c.bf16 %v4691_v42, %v4692_v40  ;;  %v4700_v3 = vld [vmem:[#allocation60_spill] sm:$0xff]  ;;  %v2700_v40 = vld [vmem:[%s4488_s5 + $0x38] sm:$0xff] }
 0x1da   :  { %1909 = vmatpush2.bf16.msra.mxu1 %v1803_v27  ;;  %v4656_v27 = vld [vmem:[#allocation28_spill] sm:$0xff]  ;;  %1419 = vst.msk [vmem:[%s4498_s15] sm:$0x3] %vm1417_vm0, %v3668_v6 }
 0x1db   :  { %1910 = vmatprep.subr.bf16.mxu1 %v4630_v23  ;;  %v4657_v21 = vpack.c.bf16 %v4655_v4, %v4656_v27  ;;  %v4661_v23 = vld [vmem:[#allocation33_spill] sm:$0xff]  ;;  %v4702_v4 = vpack.c.bf16 %v4700_v3, %v4701_v41  ;;  %v4703_v27 = vld [vmem:[#allocation64_spill] sm:$0xff]  ;;  %v1121_v41 = vld [vmem:[#allocation8 + $0xf0] sm:$0xff] }
 0x1dc   :  { %v4663_v45 = vpack.c.bf16 %v4661_v23, %v4662_v24  ;;  %v4709_v24 = vpack.c.bf16 %v3523_v29, %v3521_v62  ;;  %v1771_v29 = vld [vmem:[%s4564_s24 + $0x20] sm:$0xff] }
 0x1dd   :  { %v1777_v62 = vpack.c.bf16 %v1771_v29, %v1771_v29 }
 0x1de   :  { %1911 = vmatpush2.bf16.msra.mxu1 %v1801_v16  ;;  %v4660_v16 = vpack.c.bf16 %v4658_v8, %v4659_v63  ;;  %v4706_v63 = vld [vmem:[#allocation66_spill] sm:$0xff] }
 0x1df   :  { %1912 = vmatprep.subr.bf16.mxu1 %v4631_v28  ;;  %v4665_v28 = vld [vmem:[#allocation34_spill] sm:$0xff] }
 0x1e2   :  { %1913 = vmatpush2.bf16.msra.mxu1 %v1799_v60  ;;  %v4664_v60 = vld [vmem:[#allocation35_spill] sm:$0xff] }
 0x1e3   :  { %1914 = vmatprep.subr.bf16.mxu1 %v4632_v34  ;;  %v4666_v49 = vpack.c.bf16 %v4664_v60, %v4665_v28  ;;  %v4711_v60 = vld [vmem:[#allocation67_spill] sm:$0xff] }
 0x1e6   :  { %1915 = vmatpush2.bf16.msra.mxu1 %v1797_v14  ;;  %v4668_v14 = vld [vmem:[#allocation36_spill] sm:$0xff] }
 0x1e7   :  { %1916 = vmatprep.subr.bf16.mxu1 %v4633_v35  ;;  %v4669_v34 = vpack.c.bf16 %v4667_v0, %v4668_v14  ;;  %v4674_v35 = vld [vmem:[#allocation40_spill] sm:$0xff]  ;;  %v2688_v0 = vld [vmem:[%s4488_s5 + $0x68] sm:$0xff] }
 0x1e8   :  { %v4675_v9 = vpack.c.bf16 %v4673_v47, %v4674_v35  ;;  %v3788_v14 = vmul.f32 0.001, %v2688_v0  ;;  %v2691_v47 = vld [vmem:[%s4488_s5 + $0x50] sm:$0xff]  ;;  %v1151_v0 = vmul.f32 0.999, %v1119_v39 }
 0x1e9   :  { %v3803_v35 = vmul.f32 0.001, %v2691_v47 }
 0x1ea   :  { %1917 = vmatpush2.bf16.msra.mxu1 %v1795_v19  ;;  %v4672_v19 = vpack.c.bf16 %v4670_v43, %v4671_v15  ;;  %v2690_v15 = vld [vmem:[%s4488_s5 + $0xd8] sm:$0xff] }
 0x1eb   :  { %1968 = vmatprep.subr.bf16.mxu1 %v4634_v44 }
 0x1ed   :  { %1919 = vmatmul.mubr.bf16.vlgmr.msra.gmra.mxu1 %v1773_v36  ;;  %v4676_v36 = vld [vmem:[#allocation43_spill] sm:$0xff] }
 0x1ee   :  { %1969 = vmatpush1.bf16.msra.mxu1 %v4637_v54  ;;  %2000 = vmatprep.mubr.bf16.mxu1 %v1778_v11  ;;  %v4677_v11 = vld [vmem:[#allocation42_spill] sm:$0xff]  ;;  %v4681_v54 = vpack.c.bf16 %v4679_v59, %v4680_v7  ;;  %v2694_v59 = vld [vmem:[%s4488_s5 + $0xc8] sm:$0xff] }
 0x1ef   :  { %1970 = vmatprep.subr.bf16.mxu1 %v4640_v31  ;;  %v4678_v44 = vpack.c.bf16 %v4676_v36, %v4677_v11  ;;  %v4684_v31 = vpack.c.bf16 %v4682_v13, %v4683_v56  ;;  %v2693_v11 = vld [vmem:[%s4488_s5 + $0xc0] sm:$0xff]  ;;  %v3818_v7 = vmul.f32 0.001, %v2694_v59  ;;  %v2696_v56 = vld [vmem:[%s4488_s5 + $0x48] sm:$0xff]  ;;  %v1118_v59 = vld [vmem:[#allocation8 + $0xd8] sm:$0xff] }
 0x1f2   :  { %1971 = vmatpush1.bf16.msra.mxu1 %v4643_v10  ;;  %v4687_v10 = vpack.c.bf16 %v4685_v20, %v4686_v32  ;;  %v2697_v32 = vld [vmem:[%s4488_s5 + $0xb0] sm:$0xff] }
 0x1f3   :  { %1972 = vmatprep.subr.bf16.mxu1 %v4646_v61  ;;  %v4690_v61 = vpack.c.bf16 %v4688_v18, %v4689_v50  ;;  %v2698_v18 = vld [vmem:[%s4488_s5 + $0xb8] sm:$0xff] }
 0x1f4   :  { %v3840_v50 = vmul.f32 0.001, %v2698_v18  ;;  %v1150_v18 = vmul.f32 0.999, %v1118_v59  ;;  %v1095_v59 = vld [vmem:[#allocation8 + $0x20] sm:$0xff] }
 0x1f6   :  { %1973 = vmatpush1.bf16.msra.mxu1 %v4650_v17  ;;  %v4695_v17 = vld [vmem:[#allocation54_spill] sm:$0xff] }
 0x1f7   :  { %1974 = vmatprep.subr.bf16.mxu1 %v4653_v51  ;;  %v4696_v30 = vpack.c.bf16 %v4694_v12, %v4695_v17  ;;  %v4699_v51 = vpack.c.bf16 %v4697_v26, %v4698_v2  ;;  %v2701_v12 = vld [vmem:[%s4488_s5 + $0xa0] sm:$0xff] }
 0x1f8   :  { %v3855_v17 = vmul.f32 0.001, %v2701_v12 }
 0x1fa   :  { %1975 = vmatpush1.bf16.msra.mxu1 %v4657_v21  ;;  %v4704_v21 = vld [vmem:[#allocation63_spill] sm:$0xff] }
 0x1fb   :  { %1976 = vmatprep.subr.bf16.mxu1 %v4660_v16  ;;  %v4705_v8 = vpack.c.bf16 %v4703_v27, %v4704_v21  ;;  %v4707_v16 = vld [vmem:[#allocation65_spill] sm:$0xff]  ;;  %v2149_v27 = vld [vmem:[%s4494_s11 + $0x1f0] sm:$0xff]  ;;  %v1153_v21 = vmul.f32 0.999, %v1121_v41 }
 0x1fc   :  { %v4708_v23 = vpack.c.bf16 %v4706_v63, %v4707_v16  ;;  %v2150_v63 = vld [vmem:[%s4494_s11 + $0x1f8] sm:$0xff]  ;;  %v1105_v16 = vld [vmem:[#allocation8 + $0x70] sm:$0xff] }
 0x1fd   :  { %2336 = vst [vmem:[%s4501_s18 + $0x1f0] sm:$0xff] %v2149_v27  ;;  %2337 = vst [vmem:[%s4501_s18 + $0x1f8] sm:$0xff] %v2150_v63 }
 0x1fe   :  { %1977 = vmatpush1.bf16.msra.mxu1 %v4663_v45  ;;  %v4710_v45 = vld [vmem:[#allocation68_spill] sm:$0xff] }
 0x1ff   :  { %1978 = vmatprep.subr.bf16.mxu1 %v4666_v49  ;;  %v4712_v28 = vpack.c.bf16 %v4710_v45, %v4711_v60  ;;  %v4713_v49 = vpack.c.bf16 %v3543_v5, %v3541_v52  ;;  %v2681_v5 = vld [vmem:[%s4488_s5 + $0xf0] sm:$0xff]  ;;  %v1106_v45 = vld [vmem:[#allocation8 + $0x78] sm:$0xff]  ;;  %v1137_v60 = vmul.f32 0.999, %v1105_v16 }
 0x200   :  { %v3755_v52 = vmul.f32 0.001, %v2681_v5  ;;  %v1138_v5 = vmul.f32 0.999, %v1106_v45  ;;  %v1113_v45 = vld [vmem:[#allocation8 + $0xb0] sm:$0xff] }
 0x202   :  { %1979 = vmatpush1.bf16.msra.mxu1 %v4669_v34  ;;  %v2689_v34 = vld [vmem:[%s4488_s5 + $0xd0] sm:$0xff]  ;;  %v1217_v29 = vadd.f32 %v3755_v52, %v1153_v21  ;;  %v1115_v21 = vld [vmem:[#allocation8 + $0xc0] sm:$0xff] }
 0x203   :  { %1980 = vmatprep.subr.bf16.mxu1 %v4672_v19  ;;  %v3793_v43 = vmul.f32 0.001, %v2689_v34  ;;  %v3798_v19 = vmul.f32 0.001, %v2690_v15  ;;  %v1117_v34 = vld [vmem:[#allocation8 + $0xd0] sm:$0xff] }
 0x204   :  { %1450 = vst [vmem:[#allocation10 + $0xf0] sm:$0xff] %v1217_v29 }
 0x206   :  { %1981 = vmatpush1.bf16.msra.mxu1 %v4675_v9  ;;  %v2692_v9 = vld [vmem:[%s4488_s5 + $0x58] sm:$0xff] }
 0x207   :  { %1982 = vmatprep.subr.bf16.mxu1 %v4678_v44  ;;  %v3808_v36 = vmul.f32 0.001, %v2692_v9  ;;  %v3813_v44 = vmul.f32 0.001, %v2693_v11  ;;  %v1135_v9 = vmul.f32 0.999, %v1103_v58 }
 0x208   :  { %v1145_v58 = vmul.f32 0.999, %v1113_v45  ;;  %v1093_v45 = vld [vmem:[#allocation8 + $0x10] sm:$0xff] }
 0x20a   :  { %1983 = vmatpush1.bf16.msra.mxu1 %v4681_v54  ;;  %v2695_v54 = vld [vmem:[%s4488_s5 + $0x40] sm:$0xff] }
 0x20b   :  { %1984 = vmatprep.subr.bf16.mxu1 %v4684_v31  ;;  %v3823_v13 = vmul.f32 0.001, %v2695_v54  ;;  %v3828_v31 = vmul.f32 0.001, %v2696_v56 }
 0x20e   :  { %1985 = vmatpush2.bf16.msra.mxu1 %v4687_v10  ;;  %v3835_v10 = vmul.f32 0.001, %v2697_v32  ;;  %v1149_v32 = vmul.f32 0.999, %v1117_v34 }
 0x20f   :  { %1986 = vmatprep.subr.bf16.mxu1 %v4690_v61  ;;  %v2699_v61 = vld [vmem:[%s4488_s5 + $0x30] sm:$0xff] }
 0x210   :  { %v3845_v42 = vmul.f32 0.001, %v2699_v61 }
 0x212   :  { %1987 = vmatpush2.bf16.msra.mxu1 %v4693_v53  ;;  %v3850_v53 = vmul.f32 0.001, %v2700_v40 }
 0x213   :  { %1988 = vmatprep.subr.bf16.mxu1 %v4696_v30  ;;  %v2702_v30 = vld [vmem:[%s4488_s5 + $0xa8] sm:$0xff] }
 0x214   :  { %v3860_v26 = vmul.f32 0.001, %v2702_v30 }
 0x216   :  { %1989 = vmatpush2.bf16.msra.mxu1 %v4699_v51  ;;  %v2703_v51 = vld [vmem:[%s4488_s5 + $0x20] sm:$0xff] }
 0x217   :  { %1990 = vmatprep.subr.bf16.mxu1 %v4702_v4  ;;  %v3867_v3 = vmul.f32 0.001, %v2703_v51  ;;  %v1122_v4 = vld [vmem:[#allocation8 + $0xf8] sm:$0xff] }
 0x21a   :  { %1991 = vmatpush2.bf16.msra.mxu1 %v4705_v8  ;;  %v1154_v8 = vmul.f32 0.999, %v1122_v4 }
 0x21b   :  { %1992 = vmatprep.subr.bf16.mxu1 %v4708_v23 }
 0x21e   :  { %1993 = vmatpush2.bf16.msra.mxu1 %v4709_v24  ;;  %v3830_v20 = vpop.f32.mrf.mxu0  ;;  %v2183_v24 = vpack.c.bf16 %v2150_v63, %v2149_v27  ;;  %v1099_v63 = vld [vmem:[#allocation8 + $0x40] sm:$0xff] }
 0x21f   :  { %1994 = vmatprep.subr.bf16.mxu1 %v4712_v28  ;;  %v2133_v28 = vld [vmem:[%s4494_s11 + $0x170] sm:$0xff] }
 0x220   :  { %v3862_v2 = vpop.f32.mrf.mxu0 }
 0x222   :  { %1995 = vmatpush2.bf16.msra.mxu1 %v4713_v49  ;;  %v1965_v23 = vpop.f32.mrf.mxu0  ;;  %v2134_v49 = vld [vmem:[%s4494_s11 + $0x178] sm:$0xff] }
 0x223   :  { %1996 = vmatprep.subr.bf16.mxu1 %v1862_v1  ;;  %v2684_v1 = vld [vmem:[%s4488_s5 + $0x78] sm:$0xff]  ;;  %v2175_v46 = vpack.c.bf16 %v2134_v49, %v2133_v28  ;;  %2320 = vst [vmem:[%s4501_s18 + $0x170] sm:$0xff] %v2133_v28  ;;  %2321 = vst [vmem:[%s4501_s18 + $0x178] sm:$0xff] %v2134_v49 }
 0x224   :  { %v1966_v37 = vpop.f32.mrf.mxu0 }
 0x226   :  { %1997 = vmatpush2.bf16.msra.mxu1 %v1861_v22  ;;  %v3768_v22 = vmul.f32 0.001, %v2684_v1  ;;  %v1120_v1 = vld [vmem:[#allocation8 + $0xe8] sm:$0xff] }
 0x227   :  { %1998 = vmatprep.subr.bf16.mxu1 %v1860_v38  ;;  %v2687_v38 = vld [vmem:[%s4488_s5 + $0x60] sm:$0xff]  ;;  %v1152_v52 = vmul.f32 0.999, %v1120_v1 }
 0x228   :  { %v1202_v47 = vadd.f32 %v3768_v22, %v1138_v5  ;;  %v1101_v22 = vld [vmem:[#allocation8 + $0x50] sm:$0xff] }
 0x229   :  { %v1216_v56 = vadd.f32 %v3778_v25, %v1152_v52  ;;  %v1102_v25 = vld [vmem:[#allocation8 + $0x58] sm:$0xff]  ;;  %v1133_v27 = vmul.f32 0.999, %v1101_v22 }
 0x22a   :  { %1999 = vmatpush2.bf16.msra.mxu1 %v1859_v57  ;;  %v3783_v57 = vmul.f32 0.001, %v2687_v38  ;;  %v1201_v38 = vadd.f32 %v3763_v48, %v1137_v60  ;;  %v2147_v54 = vld [vmem:[%s4494_s11 + $0x1e0] sm:$0xff]  ;;  %v1215_v48 = vadd.f32 %v3773_v55, %v1151_v0  ;;  %v2148_v61 = vld [vmem:[%s4494_s11 + $0x1e8] sm:$0xff]  ;;  %1435 = vst [vmem:[#allocation10 + $0x78] sm:$0xff] %v1202_v47 }
 0x22b   :  { %2458 = vmatprep.subr.bf16.mxu1 %v2183_v24  ;;  %2334 = vst [vmem:[%s4501_s18 + $0x1e0] sm:$0xff] %v2147_v54  ;;  %v2182_v30 = vpack.c.bf16 %v2148_v61, %v2147_v54  ;;  %2335 = vst [vmem:[%s4501_s18 + $0x1e8] sm:$0xff] %v2148_v61  ;;  %v1100_v24 = vld [vmem:[#allocation8 + $0x48] sm:$0xff]  ;;  %v1197_v28 = vadd.f32 %v3803_v35, %v1133_v27  ;;  %v1097_v35 = vld [vmem:[#allocation8 + $0x30] sm:$0xff] }
 0x22c   :  { %1434 = vst [vmem:[#allocation10 + $0x70] sm:$0xff] %v1201_v38  ;;  %v2020_v40 = vpack.c.bf16 %v1202_v47, %v1201_v38  ;;  %v1199_v12 = vadd.f32 %v3783_v57, %v1135_v9  ;;  %1448 = vst [vmem:[#allocation10 + $0xe0] sm:$0xff] %v1215_v48  ;;  %v2027_v4 = vpack.c.bf16 %v1216_v56, %v1215_v48  ;;  %v1132_v1 = vmul.f32 0.999, %v1100_v24  ;;  %v1111_v9 = vld [vmem:[#allocation8 + $0xa0] sm:$0xff]  ;;  %v2704_v54 = vld [vmem:[%s4488_s5 + $0x28] sm:$0xff] }
 0x22d   :  { %2001 = vmatmul.mubr.bf16.vlgmr.msra.gmra.mxu1 %v1777_v62  ;;  %v1218_v62 = vadd.f32 %v1186_v33, %v1154_v8  ;;  %v1104_v33 = vld [vmem:[#allocation8 + $0x68] sm:$0xff]  ;;  %1449 = vst [vmem:[#allocation10 + $0xe8] sm:$0xff] %v1216_v56  ;;  %v1213_v57 = vadd.f32 %v3793_v43, %v1149_v32  ;;  %v1134_v43 = vmul.f32 0.999, %v1102_v25  ;;  %1430 = vst [vmem:[#allocation10 + $0x50] sm:$0xff] %v1197_v28 }
 0x22e   :  { %2459 = vmatpush3.bf16.xpose.msra.mxu1 %v2175_v46  ;;  %v1136_v11 = vmul.f32 0.999, %v1104_v33  ;;  %v1116_v8 = vld [vmem:[#allocation8 + $0xc8] sm:$0xff]  ;;  %1432 = vst [vmem:[#allocation10 + $0x60] sm:$0xff] %v1199_v12  ;;  %v1129_v47 = vmul.f32 0.999, %v1097_v35 }
 0x22f   :  { %1451 = vst [vmem:[#allocation10 + $0xf8] sm:$0xff] %v1218_v62  ;;  %v2028_v15 = vpack.c.bf16 %v1218_v62, %v1217_v29  ;;  %2460 = vmatprep.subr.bf16.mxu1 %v2182_v30  ;;  %1446 = vst [vmem:[#allocation10 + $0xd0] sm:$0xff] %v1213_v57  ;;  %v1148_v49 = vmul.f32 0.999, %v1116_v8  ;;  %v1131_v29 = vmul.f32 0.999, %v1099_v63  ;;  %v1198_v46 = vadd.f32 %v3808_v36, %v1134_v43 }
 0x230   :  { %v1200_v55 = vadd.f32 %v3788_v14, %v1136_v11  ;;  %v1214_v14 = vadd.f32 %v3798_v19, %v1150_v18  ;;  %v1147_v19 = vmul.f32 0.999, %v1115_v21  ;;  %v1114_v62 = vld [vmem:[#allocation8 + $0xb8] sm:$0xff]  ;;  %v1112_v11 = vld [vmem:[#allocation8 + $0xa8] sm:$0xff]  ;;  %v1160_v48 = vmul.f32 0.001, %v2704_v54 }
 0x231   :  { %2418 = vmatprep.subr.bf16.mxu0 %v2028_v15  ;;  %v1212_v38 = vadd.f32 %v3818_v7, %v1148_v49  ;;  %v1195_v0 = vadd.f32 %v3823_v13, %v1131_v29  ;;  %v1146_v52 = vmul.f32 0.999, %v1114_v62  ;;  %1431 = vst [vmem:[#allocation10 + $0x58] sm:$0xff] %v1198_v46  ;;  %v2018_v7 = vpack.c.bf16 %v1198_v46, %v1197_v28  ;;  %v1096_v32 = vld [vmem:[#allocation8 + $0x28] sm:$0xff]  ;;  %v2707_v21 = vld [vmem:[%s4488_s5 + $0x10] sm:$0xff]  ;;  %v2708_v63 = vld [vmem:[%s4488_s5 + $0x18] sm:$0xff] }
 0x232   :  { %v2131_v51 = vld [vmem:[%s4494_s11 + $0x160] sm:$0xff]  ;;  %v2132_v41 = vld [vmem:[%s4494_s11 + $0x168] sm:$0xff]  ;;  %2419 = vmatpush3.bf16.msra.mxu0 %v2020_v40  ;;  %1433 = vst [vmem:[#allocation10 + $0x68] sm:$0xff] %v1200_v55  ;;  %v2019_v16 = vpack.c.bf16 %v1200_v55, %v1199_v12  ;;  %1447 = vst [vmem:[#allocation10 + $0xd8] sm:$0xff] %v1214_v14  ;;  %v2026_v60 = vpack.c.bf16 %v1214_v14, %v1213_v57  ;;  %v1211_v39 = vadd.f32 %v3813_v44, %v1147_v19 }
 0x233   :  { %2318 = vst [vmem:[%s4501_s18 + $0x160] sm:$0xff] %v2131_v51  ;;  %2319 = vst [vmem:[%s4501_s18 + $0x168] sm:$0xff] %v2132_v41  ;;  %v2174_v23 = vpack.c.bf16 %v2132_v41, %v2131_v51  ;;  %2420 = vmatprep.subr.bf16.mxu0 %v2027_v4  ;;  %v1098_v44 = vld [vmem:[#allocation8 + $0x38] sm:$0xff]  ;;  %v1196_v13 = vadd.f32 %v3828_v31, %v1132_v1  ;;  %v1209_v15 = vadd.f32 %v3835_v10, %v1145_v58  ;;  %v1109_v43 = vld [vmem:[#allocation8 + $0x90] sm:$0xff] }
 0x234   :  { %1444 = vst [vmem:[#allocation10 + $0xc0] sm:$0xff] %v1211_v39  ;;  %1445 = vst [vmem:[#allocation10 + $0xc8] sm:$0xff] %v1212_v38  ;;  %v2025_v31 = vpack.c.bf16 %v1212_v38, %v1211_v39  ;;  %v1210_v10 = vadd.f32 %v3840_v50, %v1146_v52  ;;  %v1130_v56 = vmul.f32 0.999, %v1098_v44  ;;  %v1193_v61 = vadd.f32 %v3845_v42, %v1129_v47  ;;  %v2709_v28 = vld [vmem:[%s4488_s5 + $0x80] sm:$0xff]  ;;  %v2712_v38 = vld [vmem:[%s4488_s5 + $0x8] sm:$0xff] }
 0x235   :  { %1428 = vst [vmem:[#allocation10 + $0x40] sm:$0xff] %v1195_v0  ;;  %1429 = vst [vmem:[#allocation10 + $0x48] sm:$0xff] %v1196_v13  ;;  %v2017_v18 = vpack.c.bf16 %v1196_v13, %v1195_v0  ;;  %v1143_v22 = vmul.f32 0.999, %v1111_v9  ;;  %v1144_v40 = vmul.f32 0.999, %v1112_v11 }
 0x236   :  { %2421 = vmatpush3.bf16.msra.mxu0 %v2019_v16  ;;  %2461 = vmatpush3.bf16.xpose.msra.mxu1 %v2174_v23  ;;  %1442 = vst [vmem:[#allocation10 + $0xb0] sm:$0xff] %v1209_v15  ;;  %1443 = vst [vmem:[#allocation10 + $0xb8] sm:$0xff] %v1210_v10  ;;  %v2024_v12 = vpack.c.bf16 %v1210_v10, %v1209_v15  ;;  %v1194_v55 = vadd.f32 %v3850_v53, %v1130_v56  ;;  %v1127_v30 = vmul.f32 0.999, %v1095_v59  ;;  %v1110_v23 = vld [vmem:[#allocation8 + $0x98] sm:$0xff]  ;;  %v2711_v39 = vld [vmem:[%s4488_s5] sm:$0xff] }
 0x237   :  { %2422 = vmatprep.subr.bf16.mxu0 %v2026_v60  ;;  %v1128_v25 = vmul.f32 0.999, %v1096_v32  ;;  %1426 = vst [vmem:[#allocation10 + $0x30] sm:$0xff] %v1193_v61  ;;  %v1207_v50 = vadd.f32 %v3855_v17, %v1143_v22  ;;  %v1208_v41 = vadd.f32 %v3860_v26, %v1144_v40  ;;  %v2705_v17 = vld [vmem:[%s4488_s5 + $0x90] sm:$0xff]  ;;  %v1157_v8 = vmul.f32 0.001, %v2707_v21 }
 0x238   :  { %1427 = vst [vmem:[#allocation10 + $0x38] sm:$0xff] %v1194_v55  ;;  %v2016_v4 = vpack.c.bf16 %v1194_v55, %v1193_v61  ;;  %v1191_v42 = vadd.f32 %v3867_v3, %v1127_v30  ;;  %v1173_v26 = vmul.f32 0.001, %v2705_v17  ;;  %v2706_v3 = vld [vmem:[%s4488_s5 + $0x98] sm:$0xff]  ;;  %v1158_v16 = vmul.f32 0.001, %v2708_v63 }
 0x239   :  { %v1192_v57 = vadd.f32 %v1160_v48, %v1128_v25  ;;  %1440 = vst [vmem:[#allocation10 + $0xa0] sm:$0xff] %v1207_v50  ;;  %1441 = vst [vmem:[#allocation10 + $0xa8] sm:$0xff] %v1208_v41  ;;  %v2023_v14 = vpack.c.bf16 %v1208_v41, %v1207_v50  ;;  %v1174_v27 = vmul.f32 0.001, %v2706_v3  ;;  %v1141_v19 = vmul.f32 0.999, %v1109_v43 }
 0x23a   :  { %v2145_v5 = vld [vmem:[%s4494_s11 + $0x1d0] sm:$0xff]  ;;  %v2146_v37 = vld [vmem:[%s4494_s11 + $0x1d8] sm:$0xff]  ;;  %2423 = vmatpush3.bf16.msra.mxu0 %v2018_v7  ;;  %1424 = vst [vmem:[#allocation10 + $0x20] sm:$0xff] %v1191_v42  ;;  %v1142_v24 = vmul.f32 0.999, %v1110_v23  ;;  %v1108_v9 = vld [vmem:[#allocation8 + $0x88] sm:$0xff] }
 0x23b   :  { %2332 = vst [vmem:[%s4501_s18 + $0x1d0] sm:$0xff] %v2145_v5  ;;  %v2181_v36 = vpack.c.bf16 %v2146_v37, %v2145_v5  ;;  %2333 = vst [vmem:[%s4501_s18 + $0x1d8] sm:$0xff] %v2146_v37  ;;  %2424 = vmatprep.subr.bf16.mxu0 %v2025_v31  ;;  %v2015_v53 = vpack.c.bf16 %v1192_v57, %v1191_v42  ;;  %v1094_v60 = vld [vmem:[#allocation8 + $0x18] sm:$0xff]  ;;  %v1171_v49 = vmul.f32 0.001, %v2709_v28  ;;  %v2710_v5 = vld [vmem:[%s4488_s5 + $0x88] sm:$0xff] }
 0x23c   :  { %1425 = vst [vmem:[#allocation10 + $0x28] sm:$0xff] %v1192_v57  ;;  %v1125_v29 = vmul.f32 0.999, %v1093_v45  ;;  %v1126_v62 = vmul.f32 0.999, %v1094_v60  ;;  %v1205_v37 = vadd.f32 %v1173_v26, %v1141_v19  ;;  %v1206_v35 = vadd.f32 %v1174_v27, %v1142_v24  ;;  %v1091_v10 = vld [vmem:[#allocation8] sm:$0xff] }
 0x23d   :  { %2462 = vmatprep.subr.bf16.mxu1 %v2181_v36  ;;  %v1172_v46 = vmul.f32 0.001, %v2710_v5  ;;  %v1155_v1 = vmul.f32 0.001, %v2711_v39  ;;  %v3990_v58 = vld [vmem:[%s4489_s6] sm:$0x1] }
 0x23e   :  { %2425 = vmatpush3.bf16.msra.mxu0 %v2017_v18  ;;  %v1156_v0 = vmul.f32 0.001, %v2712_v38  ;;  %v1189_v44 = vadd.f32 %v1157_v8, %v1125_v29  ;;  %1438 = vst [vmem:[#allocation10 + $0x90] sm:$0xff] %v1205_v37  ;;  %1439 = vst [vmem:[#allocation10 + $0x98] sm:$0xff] %v1206_v35  ;;  %v2022_v7 = vpack.c.bf16 %v1206_v35, %v1205_v37  ;;  %v1140_v31 = vmul.f32 0.999, %v1108_v9 }
 0x23f   :  { %2426 = vmatprep.subr.bf16.mxu0 %v2024_v12  ;;  %v1092_v56 = vld [vmem:[#allocation8 + $0x8] sm:$0xff]  ;;  %v4714_v32 = vld [vmem:[#allocation62_spill] sm:$0xff]  ;;  %v1123_v22 = vmul.f32 0.999, %v1091_v10 }
 0x240   :  { %1422 = vst [vmem:[#allocation10 + $0x10] sm:$0xff] %v1189_v44  ;;  %v1719_v18 = vrot.slane %v3990_v58, %v4714_v32  ;;  %v1124_v40 = vmul.f32 0.999, %v1092_v56  ;;  %v1204_v55 = vadd.f32 %v1172_v46, %v1140_v31 }
 0x241   :  { %v1187_v25 = vadd.f32 %v1155_v1, %v1123_v22 }
 0x242   :  { %v2129_v33 = vld [vmem:[%s4494_s11 + $0x150] sm:$0xff]  ;;  %v2130_v34 = vld [vmem:[%s4494_s11 + $0x158] sm:$0xff]  ;;  %2427 = vmatpush3.bf16.msra.mxu0 %v2016_v4  ;;  %1437 = vst [vmem:[#allocation10 + $0x88] sm:$0xff] %v1204_v55 }
 0x243   :  { %2316 = vst [vmem:[%s4501_s18 + $0x150] sm:$0xff] %v2129_v33  ;;  %2317 = vst [vmem:[%s4501_s18 + $0x158] sm:$0xff] %v2130_v34  ;;  %v2173_v51 = vpack.c.bf16 %v2130_v34, %v2129_v33  ;;  %2428 = vmatprep.subr.bf16.mxu0 %v2023_v14  ;;  %v1190_v33 = vadd.f32 %v1158_v16, %v1126_v62  ;;  %v1107_v34 = vld [vmem:[#allocation8 + $0x80] sm:$0xff] }
 0x244   :  { %v1139_v11 = vmul.f32 0.999, %v1107_v34  ;;  %1420 = vst [vmem:[#allocation10] sm:$0xff] %v1187_v25 }
 0x245   :  { %2463 = vmatpush3.bf16.xpose.msra.mxu1 %v2173_v51  ;;  %1423 = vst [vmem:[#allocation10 + $0x18] sm:$0xff] %v1190_v33  ;;  %v2014_v54 = vpack.c.bf16 %v1190_v33, %v1189_v44  ;;  %v1188_v51 = vadd.f32 %v1156_v0, %v1124_v40 }
 0x246   :  { %2429 = vmatpush3.bf16.msra.mxu0 %v2015_v53  ;;  %v1203_v61 = vadd.f32 %v1171_v49, %v1139_v11 }
 0x247   :  { %2430 = vmatprep.subr.bf16.mxu0 %v2022_v7  ;;  %1421 = vst [vmem:[#allocation10 + $0x8] sm:$0xff] %v1188_v51  ;;  %v2013_v42 = vpack.c.bf16 %v1188_v51, %v1187_v25 }
 0x248   :  { %1436 = vst [vmem:[#allocation10 + $0x80] sm:$0xff] %v1203_v61  ;;  %v2021_v41 = vpack.c.bf16 %v1204_v55, %v1203_v61 }
 0x24a   :  { %v2143_v52 = vld [vmem:[%s4494_s11 + $0x1c0] sm:$0xff]  ;;  %v2144_v36 = vld [vmem:[%s4494_s11 + $0x1c8] sm:$0xff]  ;;  %2431 = vmatpush3.bf16.msra.mxu0 %v2014_v54 }
 0x24b   :  { %v2180_v13 = vpack.c.bf16 %v2144_v36, %v2143_v52  ;;  %2330 = vst [vmem:[%s4501_s18 + $0x1c0] sm:$0xff] %v2143_v52  ;;  %2331 = vst [vmem:[%s4501_s18 + $0x1c8] sm:$0xff] %v2144_v36  ;;  %2432 = vmatprep.subr.bf16.mxu0 %v2021_v41 }
 0x24d   :  { %2464 = vmatprep.subr.bf16.mxu1 %v2180_v13 }
 0x24e   :  { %2433 = vmatpush3.bf16.msra.mxu0 %v2013_v42 }
 0x252   :  { %v2127_v15 = vld [vmem:[%s4494_s11 + $0x140] sm:$0xff]  ;;  %v2128_v47 = vld [vmem:[%s4494_s11 + $0x148] sm:$0xff] }
 0x253   :  { %v2172_v48 = vpack.c.bf16 %v2128_v47, %v2127_v15  ;;  %2314 = vst [vmem:[%s4501_s18 + $0x140] sm:$0xff] %v2127_v15  ;;  %2315 = vst [vmem:[%s4501_s18 + $0x148] sm:$0xff] %v2128_v47 }
 0x255   :  { %2465 = vmatpush3.bf16.xpose.msra.mxu1 %v2172_v48 }
 0x25a   :  { %v2117_v14 = vld [vmem:[%s4494_s11 + $0xf0] sm:$0xff]  ;;  %v2118_v53 = vld [vmem:[%s4494_s11 + $0xf8] sm:$0xff] }
 0x25b   :  { %v2141_v17 = vld [vmem:[%s4494_s11 + $0x1b0] sm:$0xff]  ;;  %v2167_v3 = vpack.c.bf16 %v2118_v53, %v2117_v14 }
 0x25c   :  { %2304 = vst [vmem:[%s4501_s18 + $0xf0] sm:$0xff] %v2117_v14  ;;  %2305 = vst [vmem:[%s4501_s18 + $0xf8] sm:$0xff] %v2118_v53 }
 0x25d   :  { %2440 = vmatprep.subr.bf16.mxu0 %v2167_v3 }
 0x263   :  { %v2142_v27 = vld [vmem:[%s4494_s11 + $0x1b8] sm:$0xff] }
 0x264   :  { %2328 = vst [vmem:[%s4501_s18 + $0x1b0] sm:$0xff] %v2141_v17  ;;  %v2179_v63 = vpack.c.bf16 %v2142_v27, %v2141_v17 }
 0x266   :  { %2466 = vmatprep.subr.bf16.mxu1 %v2179_v63 }
 0x26b   :  { %v4049_v21 = vld [vmem:[%s4494_s11 + $0x70] sm:$0xff]  ;;  %v4054_v8 = vld [vmem:[%s4494_s11 + $0x78] sm:$0xff] }
 0x26c   :  { %2329 = vst [vmem:[%s4501_s18 + $0x1b8] sm:$0xff] %v2142_v27  ;;  %v2159_v16 = vpack.c.bf16 %v4054_v8, %v4049_v21  ;;  %2288 = vst [vmem:[%s4501_s18 + $0x70] sm:$0xff] %v4049_v21 }
 0x26d   :  { %v2412_v59 = vpop.f32.mrf.mxu1  ;;  %2289 = vst [vmem:[%s4501_s18 + $0x78] sm:$0xff] %v4054_v8 }
 0x26f   :  { %v2413_v12 = vpop.f32.mrf.mxu1 }
 0x270   :  { %v2414_v30 = vadd.f32 %v2413_v12, %v2412_v59 }
 0x271   :  { %v2415_v50 = vpop.f32.mrf.mxu1 }
 0x272   :  { %v4021_v4 = vadd.f32 %v2414_v30, %v1719_v18 }
 0x273   :  { %v2416_v57 = vpop.f32.mrf.mxu1 }
 0x274   :  { %v1761_v26 = vmul.f32 %v4021_v4, %v4021_v4  ;;  %v2125_v43 = vld [vmem:[%s4494_s11 + $0x130] sm:$0xff]  ;;  %v2126_v23 = vld [vmem:[%s4494_s11 + $0x138] sm:$0xff] }
 0x275   :  { %v2171_v19 = vpack.c.bf16 %v2126_v23, %v2125_v43  ;;  %2312 = vst [vmem:[%s4501_s18 + $0x130] sm:$0xff] %v2125_v43  ;;  %2313 = vst [vmem:[%s4501_s18 + $0x138] sm:$0xff] %v2126_v23 }
 0x276   :  { %1762 = vadd.xlane.f32.xlu0 %v1761_v26 }
 0x277   :  { %2467 = vmatpush3.bf16.xpose.msra.mxu1 %v2171_v19 }
 0x27c   :  { %v4084_v24 = vld [vmem:[%s4494_s11 + $0xe0] sm:$0xff]  ;;  %v4089_v45 = vld [vmem:[%s4494_s11 + $0xe8] sm:$0xff] }
 0x27d   :  { %v2166_v60 = vpack.c.bf16 %v4089_v45, %v4084_v24  ;;  %2302 = vst [vmem:[%s4501_s18 + $0xe0] sm:$0xff] %v4084_v24  ;;  %2303 = vst [vmem:[%s4501_s18 + $0xe8] sm:$0xff] %v4089_v45 }
 0x284   :  { %v2139_v28 = vld [vmem:[%s4494_s11 + $0x1a0] sm:$0xff]  ;;  %v2140_v49 = vld [vmem:[%s4494_s11 + $0x1a8] sm:$0xff] }
 0x285   :  { %v4110_v29 = vld [vmem:[%s4494_s11 + $0x60] sm:$0xff]  ;;  %v2178_v62 = vpack.c.bf16 %v2140_v49, %v2139_v28 }
 0x286   :  { %2326 = vst [vmem:[%s4501_s18 + $0x1a0] sm:$0xff] %v2139_v28  ;;  %2327 = vst [vmem:[%s4501_s18 + $0x1a8] sm:$0xff] %v2140_v49 }
 0x287   :  { %2468 = vmatprep.subr.bf16.mxu1 %v2178_v62 }
 0x28d   :  { %v4121_v5 = vld [vmem:[%s4494_s11 + $0x68] sm:$0xff] }
 0x28e   :  { %2286 = vst [vmem:[%s4501_s18 + $0x60] sm:$0xff] %v4110_v29  ;;  %v2158_v46 = vpack.c.bf16 %v4121_v5, %v4110_v29  ;;  %2287 = vst [vmem:[%s4501_s18 + $0x68] sm:$0xff] %v4121_v5 }
 0x295   :  { %v2123_v39 = vld [vmem:[%s4494_s11 + $0x120] sm:$0xff]  ;;  %v2124_v1 = vld [vmem:[%s4494_s11 + $0x128] sm:$0xff] }
 0x296   :  { %v2170_v37 = vpack.c.bf16 %v2124_v1, %v2123_v39  ;;  %2310 = vst [vmem:[%s4501_s18 + $0x120] sm:$0xff] %v2123_v39  ;;  %2311 = vst [vmem:[%s4501_s18 + $0x128] sm:$0xff] %v2124_v1 }
 0x298   :  { %2469 = vmatpush3.bf16.xpose.msra.mxu1 %v2170_v37 }
 0x29d   :  { %v4148_v35 = vld [vmem:[%s4494_s11 + $0xd0] sm:$0xff]  ;;  %v4153_v38 = vld [vmem:[%s4494_s11 + $0xd8] sm:$0xff] }
 0x29e   :  { %v2137_v0 = vld [vmem:[%s4494_s11 + $0x190] sm:$0xff]  ;;  %v2165_v52 = vpack.c.bf16 %v4153_v38, %v4148_v35 }
 0x29f   :  { %2300 = vst [vmem:[%s4501_s18 + $0xd0] sm:$0xff] %v4148_v35  ;;  %2301 = vst [vmem:[%s4501_s18 + $0xd8] sm:$0xff] %v4153_v38 }
 0x2a6   :  { %v2138_v36 = vld [vmem:[%s4494_s11 + $0x198] sm:$0xff] }
 0x2a7   :  { %2324 = vst [vmem:[%s4501_s18 + $0x190] sm:$0xff] %v2137_v0  ;;  %v2177_v34 = vpack.c.bf16 %v2138_v36, %v2137_v0 }
 0x2a9   :  { %2470 = vmatprep.subr.bf16.mxu1 %v2177_v34 }
 0x2ad   :  { %v1920_v37 = vpop.f32.mrf.mxu1 }
 0x2ae   :  { %v4177_v44 = vld [vmem:[%s4494_s11 + $0x50] sm:$0xff]  ;;  %v4182_v33 = vld [vmem:[%s4494_s11 + $0x58] sm:$0xff] }
 0x2af   :  { %2325 = vst [vmem:[%s4501_s18 + $0x198] sm:$0xff] %v2138_v36  ;;  %v2157_v7 = vpack.c.bf16 %v4182_v33, %v4177_v44  ;;  %2284 = vst [vmem:[%s4501_s18 + $0x50] sm:$0xff] %v4177_v44  ;;  %v1922_v0 = vpop.f32.mrf.mxu1 }
 0x2b0   :  { %2285 = vst [vmem:[%s4501_s18 + $0x58] sm:$0xff] %v4182_v33 }
 0x2b1   :  { %v1924_v36 = vpop.f32.mrf.mxu1 }
 0x2b3   :  { %v1925_v34 = vpop.f32.mrf.mxu1 }
 0x2b7   :  { %v2121_v13 = vld [vmem:[%s4494_s11 + $0x110] sm:$0xff]  ;;  %v2122_v15 = vld [vmem:[%s4494_s11 + $0x118] sm:$0xff] }
 0x2b8   :  { %v2169_v47 = vpack.c.bf16 %v2122_v15, %v2121_v13  ;;  %2308 = vst [vmem:[%s4501_s18 + $0x110] sm:$0xff] %v2121_v13  ;;  %2309 = vst [vmem:[%s4501_s18 + $0x118] sm:$0xff] %v2122_v15  ;;  %v1879_v13 = vrot.slane %v3668_v6, %v4714_v32  ;;  %v4715_v15 = vld [vmem:[#allocation56_spill] sm:$0xff] }
 0x2ba   :  { %2471 = vmatpush3.bf16.xpose.msra.mxu1 %v2169_v47  ;;  %v4716_v47 = vsub.s32 1, %v4715_v15 }
 0x2bf   :  { %v4212_v9 = vld [vmem:[%s4494_s11 + $0xc0] sm:$0xff]  ;;  %v4217_v11 = vld [vmem:[%s4494_s11 + $0xc8] sm:$0xff] }
 0x2c0   :  { %v2164_v59 = vpack.c.bf16 %v4217_v11, %v4212_v9  ;;  %2298 = vst [vmem:[%s4501_s18 + $0xc0] sm:$0xff] %v4212_v9  ;;  %2299 = vst [vmem:[%s4501_s18 + $0xc8] sm:$0xff] %v4217_v11 }
 0x2c7   :  { %v2135_v54 = vld [vmem:[%s4494_s11 + $0x180] sm:$0xff]  ;;  %v2136_v48 = vld [vmem:[%s4494_s11 + $0x188] sm:$0xff] }
 0x2c8   :  { %v4238_v31 = vld [vmem:[%s4494_s11 + $0x40] sm:$0xff]  ;;  %v2176_v10 = vpack.c.bf16 %v2136_v48, %v2135_v54 }
 0x2c9   :  { %2322 = vst [vmem:[%s4501_s18 + $0x180] sm:$0xff] %v2135_v54  ;;  %2323 = vst [vmem:[%s4501_s18 + $0x188] sm:$0xff] %v2136_v48  ;;  %v1883_v54 = vrot.slane %v3668_v6, %v4716_v47  ;;  %v1921_v48 = vadd.f32 %v1920_v37, %v1879_v13 }
 0x2ca   :  { %2472 = vmatprep.subr.bf16.mxu1 %v2176_v10 }
 0x2cb   :  { %v1923_v10 = vadd.f32 %v1922_v0, %v1883_v54 }
 0x2d0   :  { %v4249_v56 = vld [vmem:[%s4494_s11 + $0x48] sm:$0xff] }
 0x2d1   :  { %2282 = vst [vmem:[%s4501_s18 + $0x40] sm:$0xff] %v4238_v31  ;;  %v2156_v18 = vpack.c.bf16 %v4249_v56, %v4238_v31  ;;  %2283 = vst [vmem:[%s4501_s18 + $0x48] sm:$0xff] %v4249_v56 }
 0x2d8   :  { %v2119_v61 = vld [vmem:[%s4494_s11 + $0x100] sm:$0xff]  ;;  %v2120_v22 = vld [vmem:[%s4494_s11 + $0x108] sm:$0xff] }
 0x2d9   :  { %v2168_v40 = vpack.c.bf16 %v2120_v22, %v2119_v61  ;;  %2306 = vst [vmem:[%s4501_s18 + $0x100] sm:$0xff] %v2119_v61  ;;  %2307 = vst [vmem:[%s4501_s18 + $0x108] sm:$0xff] %v2120_v22  ;;  %v1962_v61 = vadd.f32 %v3830_v20, %v1921_v48 }
 0x2db   :  { %2473 = vmatpush3.bf16.xpose.msra.mxu1 %v2168_v40  ;;  %v1964_v40 = vadd.f32 %v3862_v2, %v1923_v10 }
 0x2e0   :  { %v4276_v12 = vld [vmem:[%s4494_s11 + $0xb0] sm:$0xff]  ;;  %v4281_v55 = vld [vmem:[%s4494_s11 + $0xb8] sm:$0xff] }
 0x2e1   :  { %v2163_v30 = vpack.c.bf16 %v4281_v55, %v4276_v12  ;;  %2296 = vst [vmem:[%s4501_s18 + $0xb0] sm:$0xff] %v4276_v12  ;;  %2297 = vst [vmem:[%s4501_s18 + $0xb8] sm:$0xff] %v4281_v55 }
 0x2e8   :  { %v4296_v25 = vld [vmem:[%s4494_s11 + $0x30] sm:$0xff]  ;;  %v4301_v51 = vld [vmem:[%s4494_s11 + $0x38] sm:$0xff] }
 0x2e9   :  { %v2155_v50 = vpack.c.bf16 %v4301_v51, %v4296_v25  ;;  %2280 = vst [vmem:[%s4501_s18 + $0x30] sm:$0xff] %v4296_v25  ;;  %2281 = vst [vmem:[%s4501_s18 + $0x38] sm:$0xff] %v4301_v51 }
 0x2ed   :  { %v2002_v22 = vpop.f32.mrf.mxu1 }
 0x2f0   :  { %v4316_v41 = vld [vmem:[%s4494_s11 + $0xa0] sm:$0xff]  ;;  %v4321_v42 = vld [vmem:[%s4494_s11 + $0xa8] sm:$0xff] }
 0x2f1   :  { %v2162_v57 = vpack.c.bf16 %v4321_v42, %v4316_v41  ;;  %2294 = vst [vmem:[%s4501_s18 + $0xa0] sm:$0xff] %v4316_v41  ;;  %2295 = vst [vmem:[%s4501_s18 + $0xa8] sm:$0xff] %v4321_v42 }
 0x2f8   :  { %v4336_v14 = vld [vmem:[%s4494_s11 + $0x20] sm:$0xff]  ;;  %v4341_v53 = vld [vmem:[%s4494_s11 + $0x28] sm:$0xff] }
 0x2f9   :  { %v2154_v17 = vpack.c.bf16 %v4341_v53, %v4336_v14  ;;  %2278 = vst [vmem:[%s4501_s18 + $0x20] sm:$0xff] %v4336_v14  ;;  %2279 = vst [vmem:[%s4501_s18 + $0x28] sm:$0xff] %v4341_v53 }
 0x2ff   :  { %v1763_v6 = vpop.xlane.xlu0 %1762 }
 0x300   :  { %v2105_v26 = vld [vmem:[%s4494_s11 + $0x90] sm:$0xff]  ;;  %v2106_v3 = vld [vmem:[%s4494_s11 + $0x98] sm:$0xff]  ;;  %v1764_v20 = vmax.f32 %v1763_v6, 1e-24 }
 0x301   :  { %v2161_v27 = vpack.c.bf16 %v2106_v3, %v2105_v26  ;;  %2292 = vst [vmem:[%s4501_s18 + $0x90] sm:$0xff] %v2105_v26  ;;  %2293 = vst [vmem:[%s4501_s18 + $0x98] sm:$0xff] %v2106_v3  ;;  %v2003_v26 = vadd.f32 %v2002_v22, %v1962_v61  ;;  %v2004_v3 = vpop.f32.mrf.mxu1 }
 0x302   :  { %2485 = vrsqrt.f32 %v1764_v20 }
 0x308   :  { %v2089_v63 = vld [vmem:[%s4494_s11 + $0x10] sm:$0xff]  ;;  %v2090_v43 = vld [vmem:[%s4494_s11 + $0x18] sm:$0xff] }
 0x309   :  { %v2153_v23 = vpack.c.bf16 %v2090_v43, %v2089_v63  ;;  %2276 = vst [vmem:[%s4501_s18 + $0x10] sm:$0xff] %v2089_v63  ;;  %2277 = vst [vmem:[%s4501_s18 + $0x18] sm:$0xff] %v2090_v43  ;;  %v2005_v63 = vadd.f32 %v2004_v3, %v1964_v40  ;;  %v2009_v43 = vmax.f32 %v2003_v26, 0.0 }
 0x30b   :  { %v2011_v36 = vpack.c.bf16 %v2009_v43, %v2009_v43 }
 0x30f   :  { %v2486_v2 = vpop.eup %2485 }
 0x310   :  { %v2103_v19 = vld [vmem:[%s4494_s11 + $0x80] sm:$0xff]  ;;  %v2104_v28 = vld [vmem:[%s4494_s11 + $0x88] sm:$0xff]  ;;  %v1766_v21 = vmul.f32 %v2486_v2, %v4021_v4  ;;  %v1221_v4 = vmul.f32 0.001, %v3990_v58 }
 0x311   :  { %v2160_v49 = vpack.c.bf16 %v2104_v28, %v2103_v19  ;;  %2290 = vst [vmem:[%s4501_s18 + $0x80] sm:$0xff] %v2103_v19  ;;  %2291 = vst [vmem:[%s4501_s18 + $0x88] sm:$0xff] %v2104_v28  ;;  %v2006_v19 = vpop.f32.mrf.mxu1  ;;  %v2010_v28 = vmax.f32 %v2005_v63, 0.0 }
 0x312   :  { %v2151_v8 = vpack.c.bf16 %v1766_v21, %v1766_v21 }
 0x314   :  { %2474 = vmatprep.mubr.bf16.mxu1 %v2151_v8 }
 0x315   :  { %2475 = vmatmul.mubr.bf16.vlgmr.msra.gmra.mxu1 %v2151_v8 }
 0x318   :  { %v2087_v62 = vld [vmem:[%s4494_s11] sm:$0xff]  ;;  %v2088_v39 = vld [vmem:[%s4494_s11 + $0x8] sm:$0xff] }
 0x319   :  { %v2152_v1 = vpack.c.bf16 %v2088_v39, %v2087_v62  ;;  %2274 = vst [vmem:[%s4501_s18] sm:$0xff] %v2087_v62  ;;  %2275 = vst [vmem:[%s4501_s18 + $0x8] sm:$0xff] %v2088_v39  ;;  %v2007_v62 = vpop.f32.mrf.mxu1  ;;  %v2012_v39 = vpack.c.bf16 %v2010_v28, %v2010_v28 }
 0x31b   :  { %2067 = vmatprep.mubr.bf16.mxu0 %v2012_v39 }
 0x31c   :  { %2068 = vmatmul.mubr.bf16.vlgmr.msra.gmra.mxu0 %v2011_v36 }
 0x31d   :  { %2441 = vmatpush3.bf16.xpose.msra.mxu0 %v2159_v16  ;;  %2456 = vmatprep.mubr.bf16.mxu0 %v2151_v8  ;;  %v1219_v16 = vld [vmem:[%s4493_s10] sm:$0x1] }
 0x31e   :  { %2442 = vmatprep.subr.bf16.mxu0 %v2166_v60  ;;  %v1220_v24 = vmul.f32 0.999, %v1219_v16 }
 0x320   :  { %v1222_v45 = vadd.f32 %v1221_v4, %v1220_v24 }
 0x322   :  { %1452 = vst [vmem:[%s4500_s17] sm:$0x1] %v1222_v45  ;;  %v2033_v29 = vrot.slane %v1222_v45, %v4714_v32 }
 0x325   :  { %2443 = vmatpush3.bf16.xpose.msra.mxu0 %v2158_v46 }
 0x326   :  { %2444 = vmatprep.subr.bf16.mxu0 %v2165_v52 }
 0x32d   :  { %2445 = vmatpush3.bf16.xpose.msra.mxu0 %v2157_v7 }
 0x32e   :  { %2446 = vmatprep.subr.bf16.mxu0 %v2164_v59 }
 0x335   :  { %2447 = vmatpush3.bf16.xpose.msra.mxu0 %v2156_v18 }
 0x336   :  { %2448 = vmatprep.subr.bf16.mxu0 %v2163_v30 }
 0x33d   :  { %2449 = vmatpush3.bf16.xpose.msra.mxu0 %v2155_v50 }
 0x33e   :  { %2450 = vmatprep.subr.bf16.mxu0 %v2162_v57 }
 0x345   :  { %2451 = vmatpush3.bf16.xpose.msra.mxu0 %v2154_v17 }
 0x346   :  { %2452 = vmatprep.subr.bf16.mxu0 %v2161_v27 }
 0x34d   :  { %2453 = vmatpush3.bf16.xpose.msra.mxu0 %v2153_v23 }
 0x34e   :  { %2454 = vmatprep.subr.bf16.mxu0 %v2160_v49 }
 0x355   :  { %2455 = vmatpush3.bf16.xpose.msra.mxu0 %v2152_v1 }
 0x35c   :  { %2457 = vmatmul.mubr.bf16.vlgmr.msra.gmra.mxu0 %v2151_v8 }
 0x3d5   :  { %v2259_v44 = vpop.f32.mrf.mxu1 }
 0x3d6   :  { %v2268_v33 = vmul.f32 14.285714, %v2259_v44 }
 0x3d7   :  { %v2261_v7 = vpop.f32.mrf.mxu1 }
 0x3d8   :  { %2272 = vst [vmem:[%s4496_s13 + $0x10] sm:$0xff] %v2268_v33  ;;  %v2269_v9 = vmul.f32 14.285714, %v2261_v7 }
 0x3d9   :  { %v2263_v11 = vpop.f32.mrf.mxu1 }
 0x3da   :  { %2273 = vst [vmem:[%s4496_s13 + $0x18] sm:$0xff] %v2269_v9 }
 0x3db   :  { %v2264_v32 = vpop.f32.mrf.mxu1 }
 0x3dc   :  { %v2434_v60 = vpop.f32.mrf.mxu0 }
 0x3de   :  { %v2435_v5 = vpop.f32.mrf.mxu0 }
 0x3df   :  { %v2436_v46 = vadd.f32 %v2435_v5, %v2434_v60 }
 0x3e0   :  { %v2437_v35 = vpop.f32.mrf.mxu0 }
 0x3e1   :  { %v2070_v38 = vadd.f32 %v2436_v46, %v2033_v29 }
 0x3e2   :  { %v2438_v52 = vpop.f32.mrf.mxu0 }
 0x3e3   :  { %v2075_v58 = vmul.f32 %v2070_v38, %v2070_v38 }
 0x3e5   :  { %2076 = vadd.xlane.f32.xlu0 %v2075_v58 }
 0x41c   :  { %v2218_v59 = vpop.f32.mrf.mxu0 }
 0x41d   :  { %v2266_v31 = vmul.f32 14.285714, %v2218_v59 }
 0x41e   :  { %v2220_v56 = vpop.f32.mrf.mxu0 }
 0x41f   :  { %2270 = vst [vmem:[%s4496_s13] sm:$0xff] %v2266_v31  ;;  %v2267_v18 = vmul.f32 14.285714, %v2220_v56 }
 0x420   :  { %v2222_v12 = vpop.f32.mrf.mxu0 }
 0x421   :  { %2271 = vst [vmem:[%s4496_s13 + $0x8] sm:$0xff] %v2267_v18  ;;  %s2364_s13 = sshll.u32 %s2829_s20, 4  ;;  %s2365_s13 = int_to_ptr.vmem [resolvable:$true] %s2364_s13 }
 0x422   :  { %v2223_v55 = vpop.f32.mrf.mxu0 }
 0x46e   :  { %v2077_v30 = vpop.xlane.xlu0 %2076 }
 0x46f   :  { %v2078_v25 = vmax.f32 %v2077_v30, 1e-24 }
 0x471   :  { %2487 = vrsqrt.f32 %v2078_v25 }
 0x47e   :  { %v2488_v51 = vpop.eup %2487 }
 0x47f   :  { %v2080_v50 = vmul.f32 %v2488_v51, %v2070_v38 }
 0x481   :  { %v2081_v41 = vmul.f32 %v2080_v50, %v1766_v21  ;;  %2340 = vst [vmem:[%s2339_s3] sm:$0xff] %v2080_v50 }
 0x483   :  { %2082 = vadd.xlane.f32.xlu1 %v2081_v41 }
 0x484   :  { %2784 = shalt.err (!%p2781_p5)
}
 0x485   :  { %2356 = dma.vmem_to_hbm [thread:$0]  %s2351_s0, 24576, %s4497_s14, [#allocation5], %s2823_s19, %s2823_s19, %s2824_s1  }
 0x486   :  { %s2793_s22 = scalar_lea.vmem %s2365_s13, 4096  ;;  %p2798_p7 = scmp.lt.s32.totalorder %s2365_s13, %s2365_s13 }
 0x487   :  { %p2794_p6 = scmp.ne.s32.totalorder %s2365_s13, %s2793_s22  ;;  %p2799_p8 = scmp.lt.s32.totalorder %s2793_s22, %s2793_s22 }
 0x489   :  { %p2800_p9 = por %p2799_p8, %p2798_p7 }
 0x48b   :  { %p2801_p10 = pnand %p2800_p9, %p2794_p6 }
 0x48d   :  { %2804 = shalt.err (!%p2801_p10)
}
 0x48e   :  { %2370 = dma.vmem_to_hbm [thread:$0]  %s2365_s13, 4096, %s4499_s16, [#allocation11], %s2826_s7, %s2826_s7, %s2827_s27   ;;  %vm2085_vm1 = vcmask 7168  }
 0x50c   :  { %v2083_v42 = vpop.xlane.xlu1 %2082 }
 0x50d   :  { %v2084_v57 = vmul.f32 14.285714, %v2083_v42 }
 0x50f   :  { %2086 = vst.msk [vmem:[%s4495_s12] sm:$0xff] %vm2085_vm1, %v2084_v57 }
 0x510   :  { %2817 = dma.done.wait [#allocation5], 24576  }
 0x511   :  { %2818 = vsyncadd [#allocation5], 4294942720 }
 0x512   :  { %2819 = dma.done.wait [#allocation11], 4096  }
 0x513   :  { %2820 = vsyncadd [#allocation11], 4294963200 }
 0x514   :  { %2391 = vsyncpa [#allocation4], 1 }
 0x515   :  { %2392 = vsyncpa [#allocation7], 1 }
 0x516   :  { %2393 = vsyncpa [#allocation5], 1 }
 0x517   :  { %2394 = vsyncpa [#allocation11], 1 }

</bundles_post_ra>
